<compile_context>
chip_gen: v7x
topology: tpu7x:2x2x1
jax: 0.10.0
libtpu: 0.0.40
codegen_flags: <defaults>
</compile_context>

<pallas_src>
import functools

import jax
import jax.numpy as jnp
from jax import lax
from jax.experimental import pallas as pl
from jax.experimental.pallas import tpu as pltpu


def _neg_limit(dtype):
    """Identity element of max() for the given dtype."""
    dtype = jnp.dtype(dtype)
    if jnp.issubdtype(dtype, jnp.floating):
        return float("-inf")
    return int(jnp.iinfo(dtype).min)


def _round_up(x, m):
    return ((x + m - 1) // m) * m


def _spp_kernel(x_ref, o_ref, cur_ref, hbuf_ref, *, H, W, k, n_pools, use_xlu_roll):
    """One (image, channel-block, branch) grid step, channels-last.

    Grid = (N, C_pad // cb, n_pools + 1).  Last axis b is the branch step:
      b == 0        -> identity branch (copy x, seed the cascade carry)
      b == s >= 1   -> cascade stage s: one k x k stride-1 'same' max pool applied to the
                       previous stage's output (SPPF equivalence: 5∘5 = 9, 5∘9 = 13).

    x_ref:    (1, H, W, cb)    input channel tile (same block for every b)
    o_ref:    (1, H, W, cb)    this branch's slab of the fused NHWC output
    cur_ref:  (H, W, cb)       cascade carry across b steps (VMEM scratch)
    hbuf_ref: (H+2p, W, cb)    H-halo scratch          (use_xlu_roll=True)
              (H+2p, W+2p, cb) full halo scratch       (use_xlu_roll=False)
    """
    b = pl.program_id(2)
    p = k // 2
    neg = _neg_limit(x_ref.dtype)
    cb = cur_ref.shape[-1]

    @pl.when(b == 0)
    def _init():
        # Fill only the -inf halo borders; the centre is overwritten every stage.
        # Gating on b == 0 (not on a "first grid step") is megacore-safe: every (n, j)
        # runs its b == 0 step on the same core, before any of its cascade steps.
        if use_xlu_roll:
            hbuf_ref[0:p, :, :] = jnp.full((p, W, cb), neg, hbuf_ref.dtype)
            hbuf_ref[p + H:, :, :] = jnp.full((p, W, cb), neg, hbuf_ref.dtype)
        else:
            Wp = W + 2 * p
            hbuf_ref[0:p, :, :] = jnp.full((p, Wp, cb), neg, hbuf_ref.dtype)
            hbuf_ref[p + H:, :, :] = jnp.full((p, Wp, cb), neg, hbuf_ref.dtype)
            hbuf_ref[:, 0:p, :] = jnp.full((H + 2 * p, p, cb), neg, hbuf_ref.dtype)
            hbuf_ref[:, p + W:, :] = jnp.full((H + 2 * p, p, cb), neg, hbuf_ref.dtype)
        xv = x_ref[0]
        cur_ref[...] = xv
        o_ref[0] = xv                      # identity branch slab

    @pl.when(b > 0)
    def _stage():
        cur = cur_ref[...]                 # (H, W, cb)
        if use_xlu_roll:
            # ---- W pass: sublane-axis shifts via XLU rolls + edge masks (no extra scratch).
            col = lax.broadcasted_iota(jnp.int32, (H, W, cb), 1)
            m = cur
            for d in range(1, p + 1):
                right = pltpu.roll(cur, (W - d) % W, axis=1)    # m[w] <- cur[w + d]
                m = jnp.maximum(m, jnp.where(col < (W - d), right, neg))
                left = pltpu.roll(cur, d % W, axis=1)           # m[w] <- cur[w - d]
                m = jnp.maximum(m, jnp.where(col >= d, left, neg))
            # ---- H pass: one centre store, then k address-offset slices of the halo scratch.
            hbuf_ref[p:p + H, :, :] = m
            out = hbuf_ref[0:H, :, :]
            for d in range(1, k):
                out = jnp.maximum(out, hbuf_ref[d:d + H, :, :])
        else:
            # Fallback: both passes via slices of a fully -inf-bordered scratch.
            hbuf_ref[p:p + H, p:p + W, :] = cur
            m = hbuf_ref[p:p + H, 0:W, :]
            for d in range(1, k):
                m = jnp.maximum(m, hbuf_ref[p:p + H, d:d + W, :])
            hbuf_ref[p:p + H, p:p + W, :] = m
            out = hbuf_ref[0:H, p:p + W, :]
            for d in range(1, k):
                out = jnp.maximum(out, hbuf_ref[d:d + H, p:p + W, :])

        o_ref[0] = out

        @pl.when(b < n_pools)              # last stage does not need to carry forward
        def _carry():
            cur_ref[...] = out


def _pick_channel_block(C_pad, N, H, W, p, itemsize, use_xlu_roll):
    """Largest lane-dense channel block meeting a ~12 MiB/tile VMEM budget and, when
    possible, >=2 parallel grid steps (v7x megacore)."""
    W_sub = _round_up(W, 8)
    hbuf_w = W_sub if use_xlu_roll else _round_up(W + 2 * p, 8)

    def vmem_need(cb):
        tile = H * W_sub * cb * itemsize
        hbuf = (H + 2 * p) * hbuf_w * cb * itemsize
        # 2x input + 2x output (double-buffered) + carry + halo scratch
        return 4 * tile + tile + hbuf

    budget = 12 * 1024 * 1024
    cands = [c for c in range(C_pad, 0, -128) if C_pad % c == 0]
    for cb in cands:
        if vmem_need(cb) <= budget and N * (C_pad // cb) >= 2:
            return cb, vmem_need(cb)
    for cb in cands:
        if vmem_need(cb) <= budget:
            return cb, vmem_need(cb)
    cb = cands[-1]                         # 128
    return cb, vmem_need(cb)


def spatial_pyramid_pooling_nhwc(x, pool_sizes=(5, 9, 13), *, use_xlu_roll=True):
    """Fused NHWC path (preferred on TPU): x (N, H, W, C) -> (N, H, W, (len(pool_sizes)+1)*C)
    with channel order [pool_largest, ..., pool_smallest, x] matching the PyTorch concat."""
    N, H, W, C = x.shape
    pool_sizes = tuple(int(k) for k in pool_sizes)
    n_pools = len(pool_sizes)
    assert all(k % 2 == 1 for k in pool_sizes), "pool sizes must be odd"
    assert tuple(sorted(pool_sizes)) == pool_sizes, "pool sizes must be ascending"

    # SPPF incremental windows; require a uniform odd increment (true for (5, 9, 13)).
    inc = [pool_sizes[0]] + [pool_sizes[i] - pool_sizes[i - 1] + 1 for i in range(1, n_pools)]
    assert all(w == inc[0] for w in inc) and inc[0] % 2 == 1, \
        "cascade requires uniform odd incremental windows (holds for (5, 9, 13))"
    k = inc[0]
    p = k // 2
    n_br = n_pools + 1

    dtype = x.dtype
    itemsize = jnp.dtype(dtype).itemsize

    # Lane-dense channels: pad C to a multiple of 128, slice the result afterwards.
    C_pad = _round_up(C, 128)
    if C_pad != C:
        x = jnp.pad(x, ((0, 0), (0, 0), (0, 0), (0, C_pad - C)))

    cb, need = _pick_channel_block(C_pad, N, H, W, p, itemsize, use_xlu_roll)
    n_cb = C_pad // cb

    # Explicit scoped-VMEM limit: at least the requirement (+headroom), capped below
    # physical VMEM (v7x has only 64 MiB/TC; v5e's *default* scoped limit is 16 MiB).
    try:
        cap = int(pltpu.get_tpu_info().vmem_capacity_bytes)
    except Exception:
        cap = 64 * 1024 * 1024
    vmem_limit = int(min(max(need + (8 << 20), 32 << 20), max(cap - (8 << 20), 32 << 20)))

    hbuf_shape = (H + 2 * p, W, cb) if use_xlu_roll else (H + 2 * p, W + 2 * p, cb)

    kernel = functools.partial(_spp_kernel, H=H, W=W, k=k, n_pools=n_pools,
                               use_xlu_roll=use_xlu_roll)

    cost = pl.CostEstimate(
        flops=int(2 * n_pools * k) * N * H * W * C_pad,
        transcendentals=0,
        bytes_accessed=int((1 + n_br) * N * H * W * C_pad * itemsize),
    )

    out = pl.pallas_call(
        kernel,
        out_shape=jax.ShapeDtypeStruct((N, H, W, n_br * C_pad), dtype),
        grid=(N, n_cb, n_br),
        in_specs=[pl.BlockSpec((1, H, W, cb), lambda n, j, b: (n, 0, 0, j))],
        out_specs=pl.BlockSpec((1, H, W, cb),
                               lambda n, j, b: (n, 0, 0, (n_pools - b) * n_cb + j)),
        scratch_shapes=[pltpu.VMEM((H, W, cb), dtype),       # cascade carry
                        pltpu.VMEM(hbuf_shape, dtype)],      # -inf-bordered halo scratch
        compiler_params=pltpu.CompilerParams(
            dimension_semantics=("parallel", "parallel", "arbitrary"),
            vmem_limit_bytes=vmem_limit,
        ),
        cost_estimate=cost,
    )(x)

    if C_pad != C:
        out = out.reshape(N, H, W, n_br, C_pad)[..., :C].reshape(N, H, W, n_br * C)
    return out


def spatial_pyramid_pooling(x, pool_sizes=(5, 9, 13), *, use_xlu_roll=True):
    """NCHW drop-in for the PyTorch module: x (N, C, H, W) -> (N, (len(pool_sizes)+1)*C, H, W).

    Prefer `spatial_pyramid_pooling_nhwc` on TPU: it skips the NCHW<->NHWC layout plumbing
    that otherwise accounts for ~2/3 of the HBM traffic of this memory-bound op."""
    x_nhwc = jnp.transpose(x, (0, 2, 3, 1))
    y = spatial_pyramid_pooling_nhwc(x_nhwc, pool_sizes, use_xlu_roll=use_xlu_roll)
    return jnp.transpose(y, (0, 3, 1, 2))


def _spp_reference(x, pool_sizes=(5, 9, 13)):
    """Pure-JAX reference matching torch semantics (dtype-aware max identity)."""
    init = _neg_limit(x.dtype)
    feats = []
    for k in pool_sizes[::-1]:
        p = k // 2
        feats.append(lax.reduce_window(
            x, init, lax.max,
            window_dimensions=(1, 1, k, k),
            window_strides=(1, 1, 1, 1),
            padding=((0, 0), (0, 0), (p, p), (p, p)),
        ))
    feats.append(x)
    return jnp.concatenate(feats, axis=1)


if __name__ == "__main__":
    key = jax.random.PRNGKey(0)
    x = jax.random.normal(key, (2, 4, 16, 16), dtype=jnp.float32)
    ref = _spp_reference(x)

    def run(use_xlu_roll):
        out = spatial_pyramid_pooling(x, use_xlu_roll=use_xlu_roll)
        out = jax.block_until_ready(out)
        assert out.shape == (2, 16, 16, 16), out.shape
        return out, bool(jnp.allclose(out, ref, atol=1e-6, rtol=1e-6))

    ok = False
    try:
        out, ok = run(True)           # preferred path: XLU rolls for the W pass
    except Exception:
        ok = False
    if not ok:
        out, ok = run(False)          # conservative fallback: padded-scratch slices

    assert ok, "mismatch vs reference"
    print("KERNEL_OK")
</pallas_src>

<mosaic_0001>
module attributes {stable_mosaic.version = 11 : i64} {
  func.func @_spp_kernel(%arg0: i32, %arg1: i32, %arg2: i32, %arg3: memref<1x16x16x128xf32, #tpu.memory_space<vmem>>, %arg4: memref<1x16x16x128xf32, #tpu.memory_space<vmem>>, %arg5: memref<16x16x128xf32, #tpu.memory_space<vmem>>, %arg6: memref<20x16x128xf32, #tpu.memory_space<vmem>>) attributes {dimension_semantics = [#tpu.dimension_semantics<parallel>, #tpu.dimension_semantics<parallel>, #tpu.dimension_semantics<arbitrary>], iteration_bounds = array<i64: 2, 1, 4>, scalar_prefetch = 0 : i64, scratch_operands = 2 : i64, tpu.core_type = #tpu.core_type<tc>, window_params = [{transform_indices = @transform_0, window_bounds = array<i64: 1, 16, 16, 128>}, {transform_indices = @transform_1, window_bounds = array<i64: 1, 16, 16, 128>}]} {
    %c0_i32 = arith.constant 0 : i32
    %0 = arith.cmpi eq, %arg2, %c0_i32 : i32
    %1 = arith.extui %0 : i1 to i32
    %c0_i32_0 = arith.constant 0 : i32
    %2 = arith.cmpi ne, %1, %c0_i32_0 : i32
    scf.if %2 {
      %cst = arith.constant 0xFF800000 : f32
      %6 = vector.broadcast %cst : f32 to vector<2x16x128xf32>
      %c0 = arith.constant 0 : index
      %c0_3 = arith.constant 0 : index
      %c0_4 = arith.constant 0 : index
      %7 = vector.load %arg6[%c0, %c0_3, %c0_4] : memref<20x16x128xf32, #tpu.memory_space<vmem>>, vector<2x16x128xf32>
      tpu.vector_store %arg6[%c0, %c0_3, %c0_4], %6 {strides = array<i32>} : memref<20x16x128xf32, #tpu.memory_space<vmem>>, vector<2x16x128xf32>,
      %cst_5 = arith.constant 0xFF800000 : f32
      %8 = vector.broadcast %cst_5 : f32 to vector<2x16x128xf32>
      %c18 = arith.constant 18 : index
      %c0_6 = arith.constant 0 : index
      %c0_7 = arith.constant 0 : index
      %9 = vector.load %arg6[%c18, %c0_6, %c0_7] : memref<20x16x128xf32, #tpu.memory_space<vmem>>, vector<2x16x128xf32>
      tpu.vector_store %arg6[%c18, %c0_6, %c0_7], %8 {strides = array<i32>} : memref<20x16x128xf32, #tpu.memory_space<vmem>>, vector<2x16x128xf32>,
      %c0_8 = arith.constant 0 : index
      %c0_9 = arith.constant 0 : index
      %c0_10 = arith.constant 0 : index
      %c0_11 = arith.constant 0 : index
      %10 = vector.load %arg3[%c0_8, %c0_9, %c0_10, %c0_11] : memref<1x16x16x128xf32, #tpu.memory_space<vmem>>, vector<1x16x16x128xf32>
      %11 = vector.shape_cast %10 : vector<1x16x16x128xf32> to vector<16x16x128xf32>
      %c0_12 = arith.constant 0 : index
      %c0_13 = arith.constant 0 : index
      %c0_14 = arith.constant 0 : index
      %12 = vector.load %arg5[%c0_12, %c0_13, %c0_14] : memref<16x16x128xf32, #tpu.memory_space<vmem>>, vector<16x16x128xf32>
      tpu.vector_store %arg5[%c0_12, %c0_13, %c0_14], %11 {strides = array<i32>} : memref<16x16x128xf32, #tpu.memory_space<vmem>>, vector<16x16x128xf32>,
      %c0_15 = arith.constant 0 : index
      %c0_16 = arith.constant 0 : index
      %c0_17 = arith.constant 0 : index
      %c0_18 = arith.constant 0 : index
      %13 = vector.load %arg4[%c0_15, %c0_16, %c0_17, %c0_18] : memref<1x16x16x128xf32, #tpu.memory_space<vmem>>, vector<1x16x16x128xf32>
      %14 = vector.shape_cast %13 : vector<1x16x16x128xf32> to vector<16x16x128xf32>
      %15 = vector.shape_cast %11 : vector<16x16x128xf32> to vector<1x16x16x128xf32>
      tpu.vector_store %arg4[%c0_15, %c0_16, %c0_17, %c0_18], %15 {strides = array<i32>} : memref<1x16x16x128xf32, #tpu.memory_space<vmem>>, vector<1x16x16x128xf32>,
    } else {
    }
    %c0_i32_1 = arith.constant 0 : i32
    %3 = arith.cmpi sgt, %arg2, %c0_i32_1 : i32
    %4 = arith.extui %3 : i1 to i32
    %c0_i32_2 = arith.constant 0 : i32
    %5 = arith.cmpi ne, %4, %c0_i32_2 : i32
    scf.if %5 {
      %c0 = arith.constant 0 : index
      %c0_3 = arith.constant 0 : index
      %c0_4 = arith.constant 0 : index
      %6 = vector.load %arg5[%c0, %c0_3, %c0_4] : memref<16x16x128xf32, #tpu.memory_space<vmem>>, vector<16x16x128xf32>
      %7 = tpu.iota {dimensions = array<i32: 1>} : vector<16x16x128xi32>
      %c15_i32 = arith.constant 15 : i32
      %8 = tpu.dynamic_rotate %6 by %c15_i32 dim 1 : vector<16x16x128xf32>, i32 -> vector<16x16x128xf32>
      %c15_i32_5 = arith.constant 15 : i32
      %9 = vector.broadcast %c15_i32_5 : i32 to vector<16x16x128xi32>
      %10 = arith.cmpi slt, %7, %9 : vector<16x16x128xi32>
      %cst = arith.constant 0xFF800000 : f32
      %11 = vector.broadcast %cst : f32 to vector<16x16x128xf32>
      %12 = arith.select %10, %8, %11 : vector<16x16x128xi1>, vector<16x16x128xf32>
      %13 = arith.maximumf %6, %12 : vector<16x16x128xf32>
      %c1_i32 = arith.constant 1 : i32
      %14 = tpu.dynamic_rotate %6 by %c1_i32 dim 1 : vector<16x16x128xf32>, i32 -> vector<16x16x128xf32>
      %c1_i32_6 = arith.constant 1 : i32
      %15 = vector.broadcast %c1_i32_6 : i32 to vector<16x16x128xi32>
      %16 = arith.cmpi sge, %7, %15 : vector<16x16x128xi32>
      %cst_7 = arith.constant 0xFF800000 : f32
      %17 = vector.broadcast %cst_7 : f32 to vector<16x16x128xf32>
      %18 = arith.select %16, %14, %17 : vector<16x16x128xi1>, vector<16x16x128xf32>
      %19 = arith.maximumf %13, %18 : vector<16x16x128xf32>
      %c14_i32 = arith.constant 14 : i32
      %20 = tpu.dynamic_rotate %6 by %c14_i32 dim 1 : vector<16x16x128xf32>, i32 -> vector<16x16x128xf32>
      %c14_i32_8 = arith.constant 14 : i32
      %21 = vector.broadcast %c14_i32_8 : i32 to vector<16x16x128xi32>
      %22 = arith.cmpi slt, %7, %21 : vector<16x16x128xi32>
      %cst_9 = arith.constant 0xFF800000 : f32
      %23 = vector.broadcast %cst_9 : f32 to vector<16x16x128xf32>
      %24 = arith.select %22, %20, %23 : vector<16x16x128xi1>, vector<16x16x128xf32>
      %25 = arith.maximumf %19, %24 : vector<16x16x128xf32>
      %c2_i32 = arith.constant 2 : i32
      %26 = tpu.dynamic_rotate %6 by %c2_i32 dim 1 : vector<16x16x128xf32>, i32 -> vector<16x16x128xf32>
      %c2_i32_10 = arith.constant 2 : i32
      %27 = vector.broadcast %c2_i32_10 : i32 to vector<16x16x128xi32>
      %28 = arith.cmpi sge, %7, %27 : vector<16x16x128xi32>
      %cst_11 = arith.constant 0xFF800000 : f32
      %29 = vector.broadcast %cst_11 : f32 to vector<16x16x128xf32>
      %30 = arith.select %28, %26, %29 : vector<16x16x128xi1>, vector<16x16x128xf32>
      %31 = arith.maximumf %25, %30 : vector<16x16x128xf32>
      %c2 = arith.constant 2 : index
      %c0_12 = arith.constant 0 : index
      %c0_13 = arith.constant 0 : index
      %32 = vector.load %arg6[%c2, %c0_12, %c0_13] : memref<20x16x128xf32, #tpu.memory_space<vmem>>, vector<16x16x128xf32>
      tpu.vector_store %arg6[%c2, %c0_12, %c0_13], %31 {strides = array<i32>} : memref<20x16x128xf32, #tpu.memory_space<vmem>>, vector<16x16x128xf32>,
      %c0_14 = arith.constant 0 : index
      %c0_15 = arith.constant 0 : index
      %c0_16 = arith.constant 0 : index
      %33 = vector.load %arg6[%c0_14, %c0_15, %c0_16] : memref<20x16x128xf32, #tpu.memory_space<vmem>>, vector<16x16x128xf32>
      %c1 = arith.constant 1 : index
      %c0_17 = arith.constant 0 : index
      %c0_18 = arith.constant 0 : index
      %34 = vector.load %arg6[%c1, %c0_17, %c0_18] : memref<20x16x128xf32, #tpu.memory_space<vmem>>, vector<16x16x128xf32>
      %35 = arith.maximumf %33, %34 : vector<16x16x128xf32>
      %c2_19 = arith.constant 2 : index
      %c0_20 = arith.constant 0 : index
      %c0_21 = arith.constant 0 : index
      %36 = vector.load %arg6[%c2_19, %c0_20, %c0_21] : memref<20x16x128xf32, #tpu.memory_space<vmem>>, vector<16x16x128xf32>
      %37 = arith.maximumf %35, %36 : vector<16x16x128xf32>
      %c3 = arith.constant 3 : index
      %c0_22 = arith.constant 0 : index
      %c0_23 = arith.constant 0 : index
      %38 = vector.load %arg6[%c3, %c0_22, %c0_23] : memref<20x16x128xf32, #tpu.memory_space<vmem>>, vector<16x16x128xf32>
      %39 = arith.maximumf %37, %38 : vector<16x16x128xf32>
      %c4 = arith.constant 4 : index
      %c0_24 = arith.constant 0 : index
      %c0_25 = arith.constant 0 : index
      %40 = vector.load %arg6[%c4, %c0_24, %c0_25] : memref<20x16x128xf32, #tpu.memory_space<vmem>>, vector<16x16x128xf32>
      %41 = arith.maximumf %39, %40 : vector<16x16x128xf32>
      %c0_26 = arith.constant 0 : index
      %c0_27 = arith.constant 0 : index
      %c0_28 = arith.constant 0 : index
      %c0_29 = arith.constant 0 : index
      %42 = vector.load %arg4[%c0_26, %c0_27, %c0_28, %c0_29] : memref<1x16x16x128xf32, #tpu.memory_space<vmem>>, vector<1x16x16x128xf32>
      %43 = vector.shape_cast %42 : vector<1x16x16x128xf32> to vector<16x16x128xf32>
      %44 = vector.shape_cast %41 : vector<16x16x128xf32> to vector<1x16x16x128xf32>
      tpu.vector_store %arg4[%c0_26, %c0_27, %c0_28, %c0_29], %44 {strides = array<i32>} : memref<1x16x16x128xf32, #tpu.memory_space<vmem>>, vector<1x16x16x128xf32>,
      %c3_i32 = arith.constant 3 : i32
      %45 = arith.cmpi slt, %arg2, %c3_i32 : i32
      %46 = arith.extui %45 : i1 to i32
      %c0_i32_30 = arith.constant 0 : i32
      %47 = arith.cmpi ne, %46, %c0_i32_30 : i32
      scf.if %47 {
        %c0_31 = arith.constant 0 : index
        %c0_32 = arith.constant 0 : index
        %c0_33 = arith.constant 0 : index
        %48 = vector.load %arg5[%c0_31, %c0_32, %c0_33] : memref<16x16x128xf32, #tpu.memory_space<vmem>>, vector<16x16x128xf32>
        tpu.vector_store %arg5[%c0_31, %c0_32, %c0_33], %41 {strides = array<i32>} : memref<16x16x128xf32, #tpu.memory_space<vmem>>, vector<16x16x128xf32>,
      } else {
      }
    } else {
    }
    return
  }
  func.func @transform_0(%arg0: i32, %arg1: i32, %arg2: i32) -> (i32, i32, i32, i32) {
    %c0_i32 = arith.constant 0 : i32
    %c0_i32_0 = arith.constant 0 : i32
    %c0_i32_1 = arith.constant 0 : i32
    return %arg0, %c0_i32, %c0_i32_0, %arg1 : i32, i32, i32, i32
  }
  func.func @transform_1(%arg0: i32, %arg1: i32, %arg2: i32) -> (i32, i32, i32, i32) {
    %c3_i32 = arith.constant 3 : i32
    %0 = arith.subi %c3_i32, %arg2 : i32
    %c1_i32 = arith.constant 1 : i32
    %1 = arith.muli %0, %c1_i32 : i32
    %2 = arith.addi %1, %arg1 : i32
    %c0_i32 = arith.constant 0 : i32
    %c0_i32_0 = arith.constant 0 : i32
    %c0_i32_1 = arith.constant 0 : i32
    return %arg0, %c0_i32, %c0_i32_0, %2 : i32, i32, i32, i32
  }
}

module attributes {stable_mosaic.version = 11 : i64} {
  func.func @_spp_kernel(%arg0: i32, %arg1: i32, %arg2: i32, %arg3: memref<1x16x16x128xf32, #tpu.memory_space<vmem>>, %arg4: memref<1x16x16x128xf32, #tpu.memory_space<vmem>>, %arg5: memref<16x16x128xf32, #tpu.memory_space<vmem>>, %arg6: memref<20x20x128xf32, #tpu.memory_space<vmem>>) attributes {dimension_semantics = [#tpu.dimension_semantics<parallel>, #tpu.dimension_semantics<parallel>, #tpu.dimension_semantics<arbitrary>], iteration_bounds = array<i64: 2, 1, 4>, scalar_prefetch = 0 : i64, scratch_operands = 2 : i64, tpu.core_type = #tpu.core_type<tc>, window_params = [{transform_indices = @transform_0, window_bounds = array<i64: 1, 16, 16, 128>}, {transform_indices = @transform_1, window_bounds = array<i64: 1, 16, 16, 128>}]} {
    %c0_i32 = arith.constant 0 : i32
    %0 = arith.cmpi eq, %arg2, %c0_i32 : i32
    %1 = arith.extui %0 : i1 to i32
    %c0_i32_0 = arith.constant 0 : i32
    %2 = arith.cmpi ne, %1, %c0_i32_0 : i32
    scf.if %2 {
      %cst = arith.constant 0xFF800000 : f32
      %6 = vector.broadcast %cst : f32 to vector<2x20x128xf32>
      %c0 = arith.constant 0 : index
      %c0_3 = arith.constant 0 : index
      %c0_4 = arith.constant 0 : index
      %7 = vector.load %arg6[%c0, %c0_3, %c0_4] : memref<20x20x128xf32, #tpu.memory_space<vmem>>, vector<2x20x128xf32>
      tpu.vector_store %arg6[%c0, %c0_3, %c0_4], %6 {strides = array<i32>} : memref<20x20x128xf32, #tpu.memory_space<vmem>>, vector<2x20x128xf32>,
      %cst_5 = arith.constant 0xFF800000 : f32
      %8 = vector.broadcast %cst_5 : f32 to vector<2x20x128xf32>
      %c18 = arith.constant 18 : index
      %c0_6 = arith.constant 0 : index
      %c0_7 = arith.constant 0 : index
      %9 = vector.load %arg6[%c18, %c0_6, %c0_7] : memref<20x20x128xf32, #tpu.memory_space<vmem>>, vector<2x20x128xf32>
      tpu.vector_store %arg6[%c18, %c0_6, %c0_7], %8 {strides = array<i32>} : memref<20x20x128xf32, #tpu.memory_space<vmem>>, vector<2x20x128xf32>,
      %cst_8 = arith.constant 0xFF800000 : f32
      %10 = vector.broadcast %cst_8 : f32 to vector<20x2x128xf32>
      %c0_9 = arith.constant 0 : index
      %c0_10 = arith.constant 0 : index
      %c0_11 = arith.constant 0 : index
      %11 = vector.load %arg6[%c0_9, %c0_10, %c0_11] : memref<20x20x128xf32, #tpu.memory_space<vmem>>, vector<20x2x128xf32>
      tpu.vector_store %arg6[%c0_9, %c0_10, %c0_11], %10 {strides = array<i32>} : memref<20x20x128xf32, #tpu.memory_space<vmem>>, vector<20x2x128xf32>,
      %cst_12 = arith.constant 0xFF800000 : f32
      %12 = vector.broadcast %cst_12 : f32 to vector<20x2x128xf32>
      %c0_13 = arith.constant 0 : index
      %c18_14 = arith.constant 18 : index
      %c0_15 = arith.constant 0 : index
      %13 = vector.load %arg6[%c0_13, %c18_14, %c0_15] : memref<20x20x128xf32, #tpu.memory_space<vmem>>, vector<20x2x128xf32>
      tpu.vector_store %arg6[%c0_13, %c18_14, %c0_15], %12 {strides = array<i32>} : memref<20x20x128xf32, #tpu.memory_space<vmem>>, vector<20x2x128xf32>,
      %c0_16 = arith.constant 0 : index
      %c0_17 = arith.constant 0 : index
      %c0_18 = arith.constant 0 : index
      %c0_19 = arith.constant 0 : index
      %14 = vector.load %arg3[%c0_16, %c0_17, %c0_18, %c0_19] : memref<1x16x16x128xf32, #tpu.memory_space<vmem>>, vector<1x16x16x128xf32>
      %15 = vector.shape_cast %14 : vector<1x16x16x128xf32> to vector<16x16x128xf32>
      %c0_20 = arith.constant 0 : index
      %c0_21 = arith.constant 0 : index
      %c0_22 = arith.constant 0 : index
      %16 = vector.load %arg5[%c0_20, %c0_21, %c0_22] : memref<16x16x128xf32, #tpu.memory_space<vmem>>, vector<16x16x128xf32>
      tpu.vector_store %arg5[%c0_20, %c0_21, %c0_22], %15 {strides = array<i32>} : memref<16x16x128xf32, #tpu.memory_space<vmem>>, vector<16x16x128xf32>,
      %c0_23 = arith.constant 0 : index
      %c0_24 = arith.constant 0 : index
      %c0_25 = arith.constant 0 : index
      %c0_26 = arith.constant 0 : index
      %17 = vector.load %arg4[%c0_23, %c0_24, %c0_25, %c0_26] : memref<1x16x16x128xf32, #tpu.memory_space<vmem>>, vector<1x16x16x128xf32>
      %18 = vector.shape_cast %17 : vector<1x16x16x128xf32> to vector<16x16x128xf32>
      %19 = vector.shape_cast %15 : vector<16x16x128xf32> to vector<1x16x16x128xf32>
      tpu.vector_store %arg4[%c0_23, %c0_24, %c0_25, %c0_26], %19 {strides = array<i32>} : memref<1x16x16x128xf32, #tpu.memory_space<vmem>>, vector<1x16x16x128xf32>,
    } else {
    }
    %c0_i32_1 = arith.constant 0 : i32
    %3 = arith.cmpi sgt, %arg2, %c0_i32_1 : i32
    %4 = arith.extui %3 : i1 to i32
    %c0_i32_2 = arith.constant 0 : i32
    %5 = arith.cmpi ne, %4, %c0_i32_2 : i32
    scf.if %5 {
      %c0 = arith.constant 0 : index
      %c0_3 = arith.constant 0 : index
      %c0_4 = arith.constant 0 : index
      %6 = vector.load %arg5[%c0, %c0_3, %c0_4] : memref<16x16x128xf32, #tpu.memory_space<vmem>>, vector<16x16x128xf32>
      %c2 = arith.constant 2 : index
      %c2_5 = arith.constant 2 : index
      %c0_6 = arith.constant 0 : index
      %7 = vector.load %arg6[%c2, %c2_5, %c0_6] : memref<20x20x128xf32, #tpu.memory_space<vmem>>, vector<16x16x128xf32>
      tpu.vector_store %arg6[%c2, %c2_5, %c0_6], %6 {strides = array<i32>} : memref<20x20x128xf32, #tpu.memory_space<vmem>>, vector<16x16x128xf32>,
      %c2_7 = arith.constant 2 : index
      %c0_8 = arith.constant 0 : index
      %c0_9 = arith.constant 0 : index
      %8 = vector.load %arg6[%c2_7, %c0_8, %c0_9] : memref<20x20x128xf32, #tpu.memory_space<vmem>>, vector<16x16x128xf32>
      %c2_10 = arith.constant 2 : index
      %c1 = arith.constant 1 : index
      %c0_11 = arith.constant 0 : index
      %9 = vector.load %arg6[%c2_10, %c1, %c0_11] : memref<20x20x128xf32, #tpu.memory_space<vmem>>, vector<16x16x128xf32>
      %10 = arith.maximumf %8, %9 : vector<16x16x128xf32>
      %c2_12 = arith.constant 2 : index
      %c2_13 = arith.constant 2 : index
      %c0_14 = arith.constant 0 : index
      %11 = vector.load %arg6[%c2_12, %c2_13, %c0_14] : memref<20x20x128xf32, #tpu.memory_space<vmem>>, vector<16x16x128xf32>
      %12 = arith.maximumf %10, %11 : vector<16x16x128xf32>
      %c2_15 = arith.constant 2 : index
      %c3 = arith.constant 3 : index
      %c0_16 = arith.constant 0 : index
      %13 = vector.load %arg6[%c2_15, %c3, %c0_16] : memref<20x20x128xf32, #tpu.memory_space<vmem>>, vector<16x16x128xf32>
      %14 = arith.maximumf %12, %13 : vector<16x16x128xf32>
      %c2_17 = arith.constant 2 : index
      %c4 = arith.constant 4 : index
      %c0_18 = arith.constant 0 : index
      %15 = vector.load %arg6[%c2_17, %c4, %c0_18] : memref<20x20x128xf32, #tpu.memory_space<vmem>>, vector<16x16x128xf32>
      %16 = arith.maximumf %14, %15 : vector<16x16x128xf32>
      %c2_19 = arith.constant 2 : index
      %c2_20 = arith.constant 2 : index
      %c0_21 = arith.constant 0 : index
      %17 = vector.load %arg6[%c2_19, %c2_20, %c0_21] : memref<20x20x128xf32, #tpu.memory_space<vmem>>, vector<16x16x128xf32>
      tpu.vector_store %arg6[%c2_19, %c2_20, %c0_21], %16 {strides = array<i32>} : memref<20x20x128xf32, #tpu.memory_space<vmem>>, vector<16x16x128xf32>,
      %c0_22 = arith.constant 0 : index
      %c2_23 = arith.constant 2 : index
      %c0_24 = arith.constant 0 : index
      %18 = vector.load %arg6[%c0_22, %c2_23, %c0_24] : memref<20x20x128xf32, #tpu.memory_space<vmem>>, vector<16x16x128xf32>
      %c1_25 = arith.constant 1 : index
      %c2_26 = arith.constant 2 : index
      %c0_27 = arith.constant 0 : index
      %19 = vector.load %arg6[%c1_25, %c2_26, %c0_27] : memref<20x20x128xf32, #tpu.memory_space<vmem>>, vector<16x16x128xf32>
      %20 = arith.maximumf %18, %19 : vector<16x16x128xf32>
      %c2_28 = arith.constant 2 : index
      %c2_29 = arith.constant 2 : index
      %c0_30 = arith.constant 0 : index
      %21 = vector.load %arg6[%c2_28, %c2_29, %c0_30] : memref<20x20x128xf32, #tpu.memory_space<vmem>>, vector<16x16x128xf32>
      %22 = arith.maximumf %20, %21 : vector<16x16x128xf32>
      %c3_31 = arith.constant 3 : index
      %c2_32 = arith.constant 2 : index
      %c0_33 = arith.constant 0 : index
      %23 = vector.load %arg6[%c3_31, %c2_32, %c0_33] : memref<20x20x128xf32, #tpu.memory_space<vmem>>, vector<16x16x128xf32>
      %24 = arith.maximumf %22, %23 : vector<16x16x128xf32>
      %c4_34 = arith.constant 4 : index
      %c2_35 = arith.constant 2 : index
      %c0_36 = arith.constant 0 : index
      %25 = vector.load %arg6[%c4_34, %c2_35, %c0_36] : memref<20x20x128xf32, #tpu.memory_space<vmem>>, vector<16x16x128xf32>
      %26 = arith.maximumf %24, %25 : vector<16x16x128xf32>
      %c0_37 = arith.constant 0 : index
      %c0_38 = arith.constant 0 : index
      %c0_39 = arith.constant 0 : index
      %c0_40 = arith.constant 0 : index
      %27 = vector.load %arg4[%c0_37, %c0_38, %c0_39, %c0_40] : memref<1x16x16x128xf32, #tpu.memory_space<vmem>>, vector<1x16x16x128xf32>
      %28 = vector.shape_cast %27 : vector<1x16x16x128xf32> to vector<16x16x128xf32>
      %29 = vector.shape_cast %26 : vector<16x16x128xf32> to vector<1x16x16x128xf32>
      tpu.vector_store %arg4[%c0_37, %c0_38, %c0_39, %c0_40], %29 {strides = array<i32>} : memref<1x16x16x128xf32, #tpu.memory_space<vmem>>, vector<1x16x16x128xf32>,
      %c3_i32 = arith.constant 3 : i32
      %30 = arith.cmpi slt, %arg2, %c3_i32 : i32
      %31 = arith.extui %30 : i1 to i32
      %c0_i32_41 = arith.constant 0 : i32
      %32 = arith.cmpi ne, %31, %c0_i32_41 : i32
      scf.if %32 {
        %c0_42 = arith.constant 0 : index
        %c0_43 = arith.constant 0 : index
        %c0_44 = arith.constant 0 : index
        %33 = vector.load %arg5[%c0_42, %c0_43, %c0_44] : memref<16x16x128xf32, #tpu.memory_space<vmem>>, vector<16x16x128xf32>
        tpu.vector_store %arg5[%c0_42, %c0_43, %c0_44], %26 {strides = array<i32>} : memref<16x16x128xf32, #tpu.memory_space<vmem>>, vector<16x16x128xf32>,
      } else {
      }
    } else {
    }
    return
  }
  func.func @transform_0(%arg0: i32, %arg1: i32, %arg2: i32) -> (i32, i32, i32, i32) {
    %c0_i32 = arith.constant 0 : i32
    %c0_i32_0 = arith.constant 0 : i32
    %c0_i32_1 = arith.constant 0 : i32
    return %arg0, %c0_i32, %c0_i32_0, %arg1 : i32, i32, i32, i32
  }
  func.func @transform_1(%arg0: i32, %arg1: i32, %arg2: i32) -> (i32, i32, i32, i32) {
    %c3_i32 = arith.constant 3 : i32
    %0 = arith.subi %c3_i32, %arg2 : i32
    %c1_i32 = arith.constant 1 : i32
    %1 = arith.muli %0, %c1_i32 : i32
    %2 = arith.addi %1, %arg1 : i32
    %c0_i32 = arith.constant 0 : i32
    %c0_i32_0 = arith.constant 0 : i32
    %c0_i32_1 = arith.constant 0 : i32
    return %arg0, %c0_i32, %c0_i32_0, %2 : i32, i32, i32, i32
  }
}

</mosaic_0001>

<bundles_post_ra>
// kernel: tpu_custom_call.1
= control target key start
LH: loop header
LB: loop body
LE: loop exit
PB: predicated region body
PF: predicated region fallthrough
CT: control target
= control target key end

     0   :  { %6 = vsyncpa [#allocation5], 0  ;;  %s3315_s0 = inlined_call_operand.hbm [shape: f32[2,16,16,128], index: 0, kind: input, shape index: {}]   ;;  %s3316_s1 = inlined_call_operand.hbm [shape: f32[2,16,16,512], index: 1, kind: output, shape index: {}]  }
   0x1   :  { %8 = vsyncpa [#allocation5 + $0x1], 0 }
   0x2   :  { %9 = vsyncpa [#allocation6], 0 }
   0x3   :  { %11 = vsyncpa [#allocation6 + $0x1], 0  ;;  %s1637_s6 = smov 0   ;;  %s1639_s7 = smov 0  }
   0x4   :  { %s1641_s8 = smov 0   ;;  %s1643_s9 = smov 0  }
   0x5   :  { %s1645_s10 = smov 0   ;;  %s1647_s11 = smov 0  }
   0x6   :  { %s1649_s12 = smov 0   ;;  %s1651_s13 = smov 0  }
   0x7   :  { %s1653_s14 = smov 0   ;;  %s1655_s15 = smov 0  }
   0x8   :  { %s1657_s16 = smov 0  }
   0x9 LB: > { %s1338_s17 = sadd.s32 4294967295, %s1617_s16   ;;  %s1339_s18 = sadd.s32 4294967294, %s1617_s16   ;;  %s1617_s16 = sphi %s1657_s16, %s17_s16   ;;  %s1613_s15 = sphi %s1655_s15, %s3537_s15   ;;  %s1609_s14 = sphi %s1653_s14, %s3536_s14   ;;  %s1605_s13 = sphi %s1651_s13, %s3535_s13   ;;  %s1601_s12 = sphi %s1649_s12, %s3534_s12   ;;  %s1597_s11 = sphi %s1647_s11, %s3533_s11   ;;  %s1593_s10 = sphi %s1645_s10, %s3532_s10   ;;  %s1589_s9 = sphi %s1643_s9, %s3531_s9   ;;  %s1585_s8 = sphi %s1641_s8, %s3530_s8   ;;  %s1581_s7 = sphi %s1639_s7, %s3529_s7   ;;  %s1577_s6 = sphi %s1637_s6, %s3528_s6  }
   0xa   : > { %s29_s19 = sadd.s32 1, %s1609_s14  ;;  %s36_s20 = sadd.s32 1, %s1613_s15 }
   0xb   : > { %p30_p0 = scmp.ge.s32.totalorder %s29_s19, 4  ;;  %s45_s21 = sadd.s32 1, %s1597_s11 }
   0xc   : > { %p52_p1 = scmp.ne.s32.totalorder %s1597_s11, %s1593_s10  ;;  %p53_p2 = scmp.eq.s32.totalorder %s1617_s16, 0 }
   0xd   : > { %s3539_s19 = smov (%p30_p0, %s29_s19), 0  ;;  %s3541_s20 = smov (!%p30_p0, %s36_s20), %s1613_s15 }
   0xe   : > { %p1701_p3 = por %p53_p2, %p52_p1  ;;  %p58_p4 = scmp.ne.s32.totalorder %s1593_s10, %s1589_s9 }
   0xf   : > { %p38_p5 = scmp.ge.s32.totalorder %s3541_s20, 2  ;;  %p59_p6 = scmp.eq.s32.totalorder %s1338_s17, 0 }
  0x10   : > { %s68_s23 = ssub.s32 3, %s1609_s14  ;;  %s70_s24 = ssub.s32 3, %s3539_s19 }
  0x11   : > { %s3543_s20 = smov (%p38_p5, %s3541_s20), 0  ;;  %p1710_p7 = por %p59_p6, %p58_p4 }
  0x12   : > { %s73_s26 = ssub.s32 %s68_s23, %s70_s24  ;;  %s40_s27 = ssub.s32 %s1613_s15, %s3543_s20 }
  0x13   : > { %s77_s28 = sadd.s32 1, %s1585_s8  ;;  %p43_p8 = scmp.eq.s32.totalorder %s40_s27, 0 }
  0x14   : > { %s74_s29 = sor.u32 %s73_s26, %s40_s27  ;;  %p87_p10 = scmp.ne.s32.totalorder %s1585_s8, %s1581_s7 }
  0x15   : > { %p75_p9 = scmp.eq.s32.totalorder %s74_s29, 0  ;;  %p88_p11 = scmp.eq.s32.totalorder %s1338_s17, 7 }
  0x16   : > { %s1720_s30 = scalar_select %p43_p8, %s1597_s11, %s45_s21  }
  0x17   : > { %s1723_s2 = scalar_select %p75_p9, %s1585_s8, %s77_s28  }
  0x18   : > { %p93_p12 = scmp.ne.s32.totalorder %s1581_s7, %s1577_s6  ;;  %p94_p13 = scmp.eq.s32.totalorder %s1339_s18, 7 }
  0x19   : > { %p1727_p0 = por %p88_p11, %p87_p10  ;;  %p1369_p1 = scmp.lt.s32.totalorder %s1617_s16, 8 }
  0x1a   : > { %p1732_p2 = por %p94_p13, %p93_p12  ;;  %s114_s5 = sand.u32 1, %s1597_s11  }
  0x1b   : > { %s3421_s3 = scalar_select %p1727_p0, 1, 0 }
  0x1c   : > { %s3422_s4 = scalar_select %p1732_p2, 1, 0 }
  0x1d   : > { %s1342_s9 = sshll.u32 %s114_s5, 8  ;;  %s1356_s23 = sshll.u32 %s1613_s15, 12 }
  0x1e   : > { %s1741_s26 = scalar_lea.hbm %s3315_s0, %s1356_s23  ;;  %s118_s17 = scalar_lea.vmem [#allocation4], %s1342_s9 }
  0x1f   : > { %s126_s18 = sshll.u32 %s118_s17, 4  ;;  %p1747_p4 = pnand %p1369_p1, %p1701_p3  ;;  %s1743_s18 = int_to_ptr.vmem [resolvable:$true] %s126_s18 }
  0x20   : > { %s1752_s28 = scalar_lea.sflag [#allocation5], %s114_s5  ;;  %s1465_s29 = scalar_lea.hbm %s1741_s26, 4096 }
  0x21   : > { %p1466_p6 = scmp.ne.s32.totalorder %s1741_s26, %s1465_s29  ;;  %p1467_p8 = pneg %p1747_p4 }
  0x22   : > { %s1470_s22 = scalar_lea.hbm %s3315_s0, 8192  ;;  %p1471_p3 = scmp.lt.u32.totalorder %s1741_s26, %s3315_s0 }
  0x23   : > { %p1468_p9 = pnand %p1467_p8, %p1466_p6  ;;  %p1472_p11 = scmp.lt.u32.totalorder %s1470_s22, %s1465_s29 }
  0x24   : > { %p1474_p13 = scmp.lt.u32.totalorder %s1465_s29, %s1741_s26 }
  0x25   : > { %p1469_p10 = pneg %p1468_p9  ;;  %p1473_p12 = por %p1472_p11, %p1471_p3 }
  0x27   : > { %p1475_p1 = por %p1474_p13, %p1473_p12 }
  0x29   : > { %p1476_p5 = pnand %p1475_p1, %p1469_p10 }
  0x2b   : > { %1479 = shalt.err (!%p1476_p5)
}
  0x2c   : > { %s1480_s5 = scalar_lea.vmem %s1743_s18, 4096  ;;  %s1619_s17 = smov [#allocation4]  }
  0x2d   : > { %p1481_p6 = scmp.ne.s32.totalorder %s1743_s18, %s1480_s5  ;;  %s1485_s9 = sshll.u32 %s1619_s17, 4  ;;  %s1486_s9 = int_to_ptr.vmem [resolvable:$false] %s1485_s9 }
  0x2e   : > { %s1487_s23 = scalar_lea.vmem %s1486_s9, 8192  ;;  %p1488_p0 = scmp.lt.s32.totalorder %s1743_s18, %s1486_s9 }
  0x2f   : > { %p1483_p9 = pnand %p1481_p6, %p1467_p8  ;;  %p1489_p3 = scmp.lt.s32.totalorder %s1487_s23, %s1480_s5 }
  0x31   : > { %p1484_p2 = pneg %p1483_p9  ;;  %p1490_p11 = por %p1489_p3, %p1488_p0 }
  0x33   : > { %p1491_p12 = pnand %p1490_p11, %p1484_p2 }
  0x35   : > { %1494 = shalt.err (!%p1491_p12)
}
  0x36   : > { %s1620_s29 = smov 128   ;;  %s1621_s22 = smov 8  }
  0x37   : > { %1364 = dma.hbm_to_vmem [thread:$0]  (!%p1747_p4), %s1741_s26, 4096, %s1743_s18, %s1752_s28, %s1620_s29, %s1620_s29, %s1621_s22  }
  0x38   : > { %p134_p5 = scmp.lt.s32.totalorder %s1617_s16, 9  ;;  %p3424_p8 = scmp.ge.s32.totalorder %s1617_s16, 1 }
  0x3a   : > { %p135_p10 = pnand %p3424_p8, %p134_p5 }
  0x3b   : > { %s140_s21 = sand.u32 (!%p135_p10), 1, %s1593_s10  }
  0x3c   : > { %138 = sbr.rel (%p135_p10) target bundleno = 325 (0x145), region = 24  ;;  %s1346_s24 = sshll.u32 (!%p135_p10), %s140_s21, 8 }
  0x3d   : > { %s141_s5 = scalar_lea.sflag (!%p135_p10), [#allocation5], %s140_s21  ;;  %s1784_s17 = scalar_lea.vmem (!%p135_p10), [#allocation4], %s1346_s24 }
  0x43   : > { %1568 = dma.done.wait (%p1710_p7), %s141_s5, 4096  }
  0x44   : > { %1570 = vsyncadd (%p1710_p7), %s141_s5, 4294963200  ;;  %s160_s27 = sand.u32 1, %s1581_s7   ;;  %p1348_p0 = scmp.ne.s32.totalorder %s1601_s12, 0 }
  0x45   : > { %s1347_s26 = sshll.u32 %s160_s27, 8  ;;  %v178_v0 = vld [vmem:[%s1784_s17] sm:$0xff] (!%p1348_p0)  ;;  %v179_v1 = vld [vmem:[%s1784_s17 + $0x8] sm:$0xff] (!%p1348_p0)  ;;  %v180_v2 = vld [vmem:[%s1784_s17 + $0x10] sm:$0xff] (!%p1348_p0)  ;;  %v1622_v3 = vmov (!%p1348_p0), -inf  }
  0x46   : > { %s1793_s18 = scalar_lea.vmem [#allocation7], %s1347_s26  ;;  %168 = sbr.rel (%p1348_p0) target bundleno = 106 (0x6a), region = 32  ;;  %169 = vst [vmem:[#allocation3] sm:$0xff] (!%p1348_p0), %v1622_v3  ;;  %170 = vst [vmem:[#allocation3 + $0x8] sm:$0xff] (!%p1348_p0), %v1622_v3  ;;  %v181_v4 = vld [vmem:[%s1784_s17 + $0x18] sm:$0xff] (!%p1348_p0)  ;;  %v182_v5 = vld [vmem:[%s1784_s17 + $0x20] sm:$0xff] (!%p1348_p0) }
  0x47   : > { %171 = vst [vmem:[#allocation3 + $0x10] sm:$0xff] (!%p1348_p0), %v1622_v3  ;;  %172 = vst [vmem:[#allocation3 + $0x18] sm:$0xff] (!%p1348_p0), %v1622_v3  ;;  %v183_v6 = vld [vmem:[%s1784_s17 + $0x28] sm:$0xff] (!%p1348_p0)  ;;  %v184_v7 = vld [vmem:[%s1784_s17 + $0x30] sm:$0xff] (!%p1348_p0) }
  0x48   : > { %174 = vst [vmem:[#allocation3 + $0x120] sm:$0xff] (!%p1348_p0), %v1622_v3  ;;  %175 = vst [vmem:[#allocation3 + $0x128] sm:$0xff] (!%p1348_p0), %v1622_v3  ;;  %v185_v8 = vld [vmem:[%s1784_s17 + $0x38] sm:$0xff] (!%p1348_p0)  ;;  %v186_v9 = vld [vmem:[%s1784_s17 + $0x40] sm:$0xff] (!%p1348_p0) }
  0x49   : > { %176 = vst [vmem:[#allocation3 + $0x130] sm:$0xff] (!%p1348_p0), %v1622_v3  ;;  %177 = vst [vmem:[#allocation3 + $0x138] sm:$0xff] (!%p1348_p0), %v1622_v3  ;;  %v187_v10 = vld [vmem:[%s1784_s17 + $0x48] sm:$0xff] (!%p1348_p0)  ;;  %v188_v11 = vld [vmem:[%s1784_s17 + $0x50] sm:$0xff] (!%p1348_p0) }
  0x4a   : > { %210 = vst [vmem:[#allocation2] sm:$0xff] (!%p1348_p0), %v178_v0  ;;  %242 = vst [vmem:[%s1793_s18] sm:$0xff] (!%p1348_p0), %v178_v0  ;;  %v189_v12 = vld [vmem:[%s1784_s17 + $0x58] sm:$0xff] (!%p1348_p0)  ;;  %v190_v13 = vld [vmem:[%s1784_s17 + $0x60] sm:$0xff] (!%p1348_p0) }
  0x4b   : > { %211 = vst [vmem:[#allocation2 + $0x8] sm:$0xff] (!%p1348_p0), %v179_v1  ;;  %243 = vst [vmem:[%s1793_s18 + $0x8] sm:$0xff] (!%p1348_p0), %v179_v1  ;;  %v191_v14 = vld [vmem:[%s1784_s17 + $0x68] sm:$0xff] (!%p1348_p0)  ;;  %v192_v15 = vld [vmem:[%s1784_s17 + $0x70] sm:$0xff] (!%p1348_p0) }
  0x4c   : > { %212 = vst [vmem:[#allocation2 + $0x10] sm:$0xff] (!%p1348_p0), %v180_v2  ;;  %244 = vst [vmem:[%s1793_s18 + $0x10] sm:$0xff] (!%p1348_p0), %v180_v2  ;;  %v193_v16 = vld [vmem:[%s1784_s17 + $0x78] sm:$0xff] (!%p1348_p0)  ;;  %v194_v17 = vld [vmem:[%s1784_s17 + $0x80] sm:$0xff] (!%p1348_p0) }
  0x4d   : > { %213 = vst [vmem:[#allocation2 + $0x18] sm:$0xff] %v181_v4  ;;  %245 = vst [vmem:[%s1793_s18 + $0x18] sm:$0xff] %v181_v4  ;;  %v195_v18 = vld [vmem:[%s1784_s17 + $0x88] sm:$0xff]  ;;  %v196_v19 = vld [vmem:[%s1784_s17 + $0x90] sm:$0xff] }
  0x4e   : > { %214 = vst [vmem:[#allocation2 + $0x20] sm:$0xff] %v182_v5  ;;  %246 = vst [vmem:[%s1793_s18 + $0x20] sm:$0xff] %v182_v5  ;;  %v197_v20 = vld [vmem:[%s1784_s17 + $0x98] sm:$0xff]  ;;  %v198_v21 = vld [vmem:[%s1784_s17 + $0xa0] sm:$0xff] }
  0x4f   : > { %215 = vst [vmem:[#allocation2 + $0x28] sm:$0xff] %v183_v6  ;;  %247 = vst [vmem:[%s1793_s18 + $0x28] sm:$0xff] %v183_v6  ;;  %v199_v22 = vld [vmem:[%s1784_s17 + $0xa8] sm:$0xff]  ;;  %v200_v23 = vld [vmem:[%s1784_s17 + $0xb0] sm:$0xff] }
  0x50   : > { %216 = vst [vmem:[#allocation2 + $0x30] sm:$0xff] %v184_v7  ;;  %248 = vst [vmem:[%s1793_s18 + $0x30] sm:$0xff] %v184_v7  ;;  %v201_v24 = vld [vmem:[%s1784_s17 + $0xb8] sm:$0xff]  ;;  %v202_v25 = vld [vmem:[%s1784_s17 + $0xc0] sm:$0xff] }
  0x51   : > { %217 = vst [vmem:[#allocation2 + $0x38] sm:$0xff] %v185_v8  ;;  %249 = vst [vmem:[%s1793_s18 + $0x38] sm:$0xff] %v185_v8  ;;  %v203_v26 = vld [vmem:[%s1784_s17 + $0xc8] sm:$0xff]  ;;  %v204_v27 = vld [vmem:[%s1784_s17 + $0xd0] sm:$0xff] }
  0x52   : > { %218 = vst [vmem:[#allocation2 + $0x40] sm:$0xff] %v186_v9  ;;  %250 = vst [vmem:[%s1793_s18 + $0x40] sm:$0xff] %v186_v9  ;;  %v205_v28 = vld [vmem:[%s1784_s17 + $0xd8] sm:$0xff]  ;;  %v206_v29 = vld [vmem:[%s1784_s17 + $0xe0] sm:$0xff] }
  0x53   : > { %219 = vst [vmem:[#allocation2 + $0x48] sm:$0xff] %v187_v10  ;;  %251 = vst [vmem:[%s1793_s18 + $0x48] sm:$0xff] %v187_v10  ;;  %v207_v30 = vld [vmem:[%s1784_s17 + $0xe8] sm:$0xff]  ;;  %v208_v31 = vld [vmem:[%s1784_s17 + $0xf0] sm:$0xff] }
  0x54   : > { %220 = vst [vmem:[#allocation2 + $0x50] sm:$0xff] %v188_v11  ;;  %252 = vst [vmem:[%s1793_s18 + $0x50] sm:$0xff] %v188_v11  ;;  %v209_v32 = vld [vmem:[%s1784_s17 + $0xf8] sm:$0xff] }
  0x55   : > { %221 = vst [vmem:[#allocation2 + $0x58] sm:$0xff] %v189_v12  ;;  %253 = vst [vmem:[%s1793_s18 + $0x58] sm:$0xff] %v189_v12 }
  0x56   : > { %222 = vst [vmem:[#allocation2 + $0x60] sm:$0xff] %v190_v13  ;;  %254 = vst [vmem:[%s1793_s18 + $0x60] sm:$0xff] %v190_v13 }
  0x57   : > { %223 = vst [vmem:[#allocation2 + $0x68] sm:$0xff] %v191_v14  ;;  %255 = vst [vmem:[%s1793_s18 + $0x68] sm:$0xff] %v191_v14 }
  0x58   : > { %224 = vst [vmem:[#allocation2 + $0x70] sm:$0xff] %v192_v15  ;;  %256 = vst [vmem:[%s1793_s18 + $0x70] sm:$0xff] %v192_v15 }
  0x59   : > { %225 = vst [vmem:[#allocation2 + $0x78] sm:$0xff] %v193_v16  ;;  %257 = vst [vmem:[%s1793_s18 + $0x78] sm:$0xff] %v193_v16 }
  0x5a   : > { %226 = vst [vmem:[#allocation2 + $0x80] sm:$0xff] %v194_v17  ;;  %258 = vst [vmem:[%s1793_s18 + $0x80] sm:$0xff] %v194_v17 }
  0x5b   : > { %227 = vst [vmem:[#allocation2 + $0x88] sm:$0xff] %v195_v18  ;;  %259 = vst [vmem:[%s1793_s18 + $0x88] sm:$0xff] %v195_v18 }
  0x5c   : > { %228 = vst [vmem:[#allocation2 + $0x90] sm:$0xff] %v196_v19  ;;  %260 = vst [vmem:[%s1793_s18 + $0x90] sm:$0xff] %v196_v19 }
  0x5d   : > { %229 = vst [vmem:[#allocation2 + $0x98] sm:$0xff] %v197_v20  ;;  %261 = vst [vmem:[%s1793_s18 + $0x98] sm:$0xff] %v197_v20 }
  0x5e   : > { %230 = vst [vmem:[#allocation2 + $0xa0] sm:$0xff] %v198_v21  ;;  %262 = vst [vmem:[%s1793_s18 + $0xa0] sm:$0xff] %v198_v21 }
  0x5f   : > { %231 = vst [vmem:[#allocation2 + $0xa8] sm:$0xff] %v199_v22  ;;  %263 = vst [vmem:[%s1793_s18 + $0xa8] sm:$0xff] %v199_v22 }
  0x60   : > { %232 = vst [vmem:[#allocation2 + $0xb0] sm:$0xff] %v200_v23  ;;  %264 = vst [vmem:[%s1793_s18 + $0xb0] sm:$0xff] %v200_v23 }
  0x61   : > { %233 = vst [vmem:[#allocation2 + $0xb8] sm:$0xff] %v201_v24  ;;  %265 = vst [vmem:[%s1793_s18 + $0xb8] sm:$0xff] %v201_v24 }
  0x62   : > { %234 = vst [vmem:[#allocation2 + $0xc0] sm:$0xff] %v202_v25  ;;  %266 = vst [vmem:[%s1793_s18 + $0xc0] sm:$0xff] %v202_v25 }
  0x63   : > { %235 = vst [vmem:[#allocation2 + $0xc8] sm:$0xff] %v203_v26  ;;  %267 = vst [vmem:[%s1793_s18 + $0xc8] sm:$0xff] %v203_v26 }
  0x64   : > { %236 = vst [vmem:[#allocation2 + $0xd0] sm:$0xff] %v204_v27  ;;  %268 = vst [vmem:[%s1793_s18 + $0xd0] sm:$0xff] %v204_v27 }
  0x65   : > { %237 = vst [vmem:[#allocation2 + $0xd8] sm:$0xff] %v205_v28  ;;  %269 = vst [vmem:[%s1793_s18 + $0xd8] sm:$0xff] %v205_v28 }
  0x66   : > { %238 = vst [vmem:[#allocation2 + $0xe0] sm:$0xff] %v206_v29  ;;  %270 = vst [vmem:[%s1793_s18 + $0xe0] sm:$0xff] %v206_v29 }
  0x67   : > { %239 = vst [vmem:[#allocation2 + $0xe8] sm:$0xff] %v207_v30  ;;  %271 = vst [vmem:[%s1793_s18 + $0xe8] sm:$0xff] %v207_v30 }
  0x68   : > { %240 = vst [vmem:[#allocation2 + $0xf0] sm:$0xff] %v208_v31  ;;  %272 = vst [vmem:[%s1793_s18 + $0xf0] sm:$0xff] %v208_v31 }
  0x69   : > { %241 = vst [vmem:[#allocation2 + $0xf8] sm:$0xff] %v209_v32  ;;  %273 = vst [vmem:[%s1793_s18 + $0xf8] sm:$0xff] %v209_v32 }
  0x6a PF: > { %p1349_p7 = scmp.le.s32.totalorder %s1601_s12, 0 }
  0x6b   : > { %v310_v35 = vlaneseq (!%p1349_p7)  ;;  %v1915_v56 = vld [vmem:[#allocation2 + $0x20] sm:$0xff] (!%p1349_p7)  ;;  %v1917_v57 = vld [vmem:[#allocation2 + $0x28] sm:$0xff] (!%p1349_p7)  ;;  %v1963_v14 = vld [vmem:[#allocation2 + $0x30] sm:$0xff] (!%p1349_p7)  ;;  %p1350_p2 = scmp.ge.s32.totalorder (!%p1349_p7), %s1601_s12, 3 }
  0x6c   : > { %277 = sbr.rel (%p1349_p7) target bundleno = 296 (0x128), region = 36  ;;  %v3381_v4 = vrot.slane (!%p1349_p7), %v1915_v56, 1  ;;  %v3374_v5 = vrot.slane (!%p1349_p7), %v1917_v57, 1  ;;  %v3370_v9 = vrot.slane (!%p1349_p7), %v1915_v56, 7  ;;  %v3373_v13 = vrot.slane (!%p1349_p7), %v1917_v57, 7  ;;  %v1965_v15 = vld [vmem:[#allocation2 + $0x38] sm:$0xff] (!%p1349_p7) }
  0x6d   : > { %v1873_v42 = vshrl.u32 (!%p1349_p7), %v310_v35, 7  ;;  %v3367_v19 = vrot.slane (!%p1349_p7), %v1915_v56, 2  ;;  %v3362_v22 = vrot.slane (!%p1349_p7), %v1917_v57, 2  ;;  %v3352_v23 = vrot.slane (!%p1349_p7), %v1915_v56, 6  ;;  %v1996_v32 = vld [vmem:[#allocation2 + $0x40] sm:$0xff] (!%p1349_p7) }
  0x6e   : > { %v1861_v33 = vld [vmem:[#allocation2] sm:$0xff] (!%p1349_p7)  ;;  %v3359_v25 = vrot.slane (!%p1349_p7), %v1917_v57, 6  ;;  %v3351_v26 = vrot.slane (!%p1349_p7), %v1963_v14, 1  ;;  %v3348_v27 = vrot.slane (!%p1349_p7), %v1965_v15, 1  ;;  %v3340_v31 = vrot.slane (!%p1349_p7), %v1963_v14, 7 }
  0x6f   : > { %v1863_v34 = vld [vmem:[#allocation2 + $0x8] sm:$0xff] (!%p1349_p7)  ;;  %v313_v37 = vrot.slane (!%p1349_p7), %v1861_v33, 1  ;;  %v444_v39 = vrot.slane (!%p1349_p7), %v1861_v33, 7  ;;  %v575_v43 = vrot.slane (!%p1349_p7), %v1861_v33, 2  ;;  %v706_v45 = vrot.slane (!%p1349_p7), %v1861_v33, 6 }
  0x70   : > { %v1865_v36 = vld [vmem:[#allocation2 + $0x10] sm:$0xff] (!%p1349_p7)  ;;  %v329_v38 = vrot.slane (!%p1349_p7), %v1863_v34, 1  ;;  %v460_v40 = vrot.slane (!%p1349_p7), %v1863_v34, 7  ;;  %v591_v44 = vrot.slane (!%p1349_p7), %v1863_v34, 2  ;;  %v722_v46 = vrot.slane (!%p1349_p7), %v1863_v34, 6 }
  0x71   : > { %v1871_v41 = vld [vmem:[#allocation2 + $0x18] sm:$0xff] (!%p1349_p7)  ;;  %v3411_v47 = vrot.slane (!%p1349_p7), %v1865_v36, 1  ;;  %v3396_v49 = vrot.slane (!%p1349_p7), %v1865_v36, 7  ;;  %vm345_vm0 = vcmp.lt.s32.totalorder (!%p1349_p7), %v1873_v42, 7  ;;  %vm476_vm1 = vcmp.lt.s32.totalorder (!%p1349_p7), %v1873_v42, 1 }
  0x72   : > { %v3406_v48 = vrot.slane (!%p1349_p7), %v1871_v41, 1  ;;  %vm509_vm2 = vcmp.ge.s32.totalorder (!%p1349_p7), %v1873_v42, 1  ;;  %vm607_vm3 = vcmp.lt.s32.totalorder (!%p1349_p7), %v1873_v42, 6  ;;  %v346_v50 = vsel (!%p1349_p7), %vm345_vm0, %v313_v37, %v329_v38 }
  0x73   : > { %v493_v51 = vsel %vm476_vm1, %v460_v40, %v444_v39  ;;  %v608_v52 = vsel %vm607_vm3, %v575_v43, %v591_v44  ;;  %vm738_vm4 = vcmp.lt.s32.totalorder %v1873_v42, 2  ;;  %v412_v53 = vmax.f32 %v1861_v33, %v346_v50 }
  0x74   : > { %v511_v54 = vsel %vm509_vm2, %v493_v51, -inf  ;;  %v755_v55 = vsel %vm738_vm4, %v722_v46, %v706_v45  ;;  %vm771_vm5 = vcmp.ge.s32.totalorder %v1873_v42, 2  ;;  %v347_v59 = vsel %vm345_vm0, %v3411_v47, %v3406_v48 }
  0x75   : > { %v773_v58 = vsel %vm771_vm5, %v755_v55, -inf  ;;  %v3403_v60 = vrot.slane %v1871_v41, 7  ;;  %v3395_v61 = vrot.slane %v1865_v36, 2  ;;  %v543_v62 = vmax.f32 %v412_v53, %v511_v54  ;;  %v2012_v53 = vld [vmem:[#allocation2 + $0x48] sm:$0xff] }
  0x76   : > { %v414_v63 = vmax.f32 %v1865_v36, %v347_v59  ;;  %v3392_v0 = vrot.slane %v1871_v41, 2  ;;  %v3384_v1 = vrot.slane %v1865_v36, 6  ;;  %v3389_v3 = vrot.slane %v1871_v41, 6 }
  0x77   : > { %v494_v2 = vsel %vm476_vm1, %v3403_v60, %v3396_v49  ;;  %v674_v6 = vmax.f32 %v543_v62, %v608_v52  ;;  %v348_v12 = vsel %vm345_vm0, %v3381_v4, %v3374_v5  ;;  %v495_v21 = vsel %vm476_vm1, %v3373_v13, %v3370_v9 }
  0x78   : > { %v513_v7 = vsel %vm509_vm2, %v494_v2, -inf  ;;  %v609_v8 = vsel %vm607_vm3, %v3395_v61, %v3392_v0  ;;  %v756_v11 = vsel %vm738_vm4, %v3389_v3, %v3384_v1  ;;  %v416_v18 = vmax.f32 %v1915_v56, %v348_v12 }
  0x79   : > { %v545_v10 = vmax.f32 %v414_v63, %v513_v7  ;;  %v1967_v16 = vmax.f32 %v674_v6, %v773_v58  ;;  %v775_v17 = vsel %vm771_vm5, %v756_v11, -inf  ;;  %v515_v24 = vsel %vm509_vm2, %v495_v21, -inf  ;;  %v2047_v21 = vld [vmem:[#allocation2 + $0x50] sm:$0xff] }
  0x7a   : > { %v547_v29 = vmax.f32 %v416_v18, %v515_v24  ;;  %v610_v30 = vsel %vm607_vm3, %v3367_v19, %v3362_v22  ;;  %v757_v35 = vsel %vm738_vm4, %v3359_v25, %v3352_v23  ;;  %v349_v50 = vsel %vm345_vm0, %v3351_v26, %v3348_v27 }
  0x7b   : > { %v676_v20 = vmax.f32 %v545_v10, %v609_v8  ;;  %838 = vst [vmem:[#allocation3 + $0x20] sm:$0xff] %v1967_v16  ;;  %v3345_v51 = vrot.slane %v1965_v15, 7  ;;  %v3337_v52 = vrot.slane %v1963_v14, 2  ;;  %v777_v55 = vsel %vm771_vm5, %v757_v35, -inf }
  0x7c   : > { %v678_v54 = vmax.f32 %v547_v29, %v610_v30  ;;  %v418_v58 = vmax.f32 %v1963_v14, %v349_v50  ;;  %v3330_v59 = vrot.slane %v1965_v15, 2  ;;  %v3326_v63 = vrot.slane %v1963_v14, 6  ;;  %v2059_v50 = vld [vmem:[#allocation2 + $0x58] sm:$0xff] }
  0x7d   : > { %v1987_v28 = vmax.f32 %v676_v20, %v775_v17  ;;  %v496_v62 = vsel %vm476_vm1, %v3345_v51, %v3340_v31  ;;  %v3329_v2 = vrot.slane %v1965_v15, 6  ;;  %v3323_v6 = vrot.slane %v1996_v32, 1 }
  0x7e   : > { %v2028_v7 = vmax.f32 %v678_v54, %v777_v55  ;;  %v517_v8 = vsel %vm509_vm2, %v496_v62, -inf  ;;  %v611_v10 = vsel %vm607_vm3, %v3337_v52, %v3330_v59  ;;  %v3318_v11 = vrot.slane %v2012_v53, 1 }
  0x7f   : > { %840 = vst [vmem:[#allocation3 + $0x30] sm:$0xff] %v1987_v28  ;;  %v549_v12 = vmax.f32 %v418_v58, %v517_v8  ;;  %v758_v17 = vsel %vm738_vm4, %v3329_v2, %v3326_v63  ;;  %v3319_v18 = vrot.slane %v1996_v32, 7  ;;  %v3320_v20 = vrot.slane %v2012_v53, 7 }
  0x80   : > { %v779_v24 = vsel %vm771_vm5, %v758_v17, -inf  ;;  %v350_v29 = vsel %vm345_vm0, %v3323_v6, %v3318_v11  ;;  %v3322_v30 = vrot.slane %v1996_v32, 2  ;;  %v3321_v35 = vrot.slane %v2012_v53, 2 }
  0x81   : > { %v680_v54 = vmax.f32 %v549_v12, %v611_v10  ;;  %v420_v55 = vmax.f32 %v1996_v32, %v350_v29  ;;  %v497_v58 = vsel %vm476_vm1, %v3320_v20, %v3319_v18  ;;  %v3324_v62 = vrot.slane %v1996_v32, 6 }
  0x82   : > { %v519_v8 = vsel %vm509_vm2, %v497_v58, -inf  ;;  %v612_v10 = vsel %vm607_vm3, %v3322_v30, %v3321_v35  ;;  %v3325_v12 = vrot.slane %v2012_v53, 6  ;;  %v3328_v17 = vrot.slane %v2047_v21, 1 }
  0x83   : > { %v2079_v29 = vmax.f32 %v680_v54, %v779_v24  ;;  %v551_v11 = vmax.f32 %v420_v55, %v519_v8  ;;  %v3327_v18 = vrot.slane %v2059_v50, 1  ;;  %v3331_v20 = vrot.slane %v2047_v21, 7  ;;  %v2092_v24 = vld [vmem:[#allocation2 + $0x60] sm:$0xff]  ;;  %v2094_v54 = vld [vmem:[#allocation2 + $0x68] sm:$0xff] }
  0x84   : > { %v759_v58 = vsel %vm738_vm4, %v3325_v12, %v3324_v62  ;;  %v3336_v35 = vrot.slane %v2059_v50, 7  ;;  %v3335_v30 = vrot.slane %v2047_v21, 2  ;;  %v3332_v6 = vrot.slane %v2059_v50, 2 }
  0x85   : > { %v682_v55 = vmax.f32 %v551_v11, %v612_v10  ;;  %v781_v8 = vsel %vm771_vm5, %v759_v58, -inf  ;;  %v351_v62 = vsel %vm345_vm0, %v3328_v17, %v3327_v18  ;;  %v3333_v12 = vrot.slane %v2047_v21, 6 }
  0x86   : > { %v422_v63 = vmax.f32 %v2047_v21, %v351_v62  ;;  %v498_v11 = vsel %vm476_vm1, %v3336_v35, %v3331_v20  ;;  %v613_v10 = vsel %vm607_vm3, %v3335_v30, %v3332_v6  ;;  %v3334_v58 = vrot.slane %v2059_v50, 6 }
  0x87   : > { %v2119_v18 = vmax.f32 %v682_v55, %v781_v8  ;;  %v521_v62 = vsel %vm509_vm2, %v498_v11, -inf  ;;  %v3339_v17 = vrot.slane %v2092_v24, 1  ;;  %v3338_v2 = vrot.slane %v2094_v54, 1  ;;  %v2133_v8 = vld [vmem:[#allocation2 + $0x70] sm:$0xff] }
  0x88   : > { %v553_v59 = vmax.f32 %v422_v63, %v521_v62  ;;  %v760_v20 = vsel %vm738_vm4, %v3334_v58, %v3333_v12  ;;  %v3341_v6 = vrot.slane %v2092_v24, 7  ;;  %v3342_v55 = vrot.slane %v2094_v54, 7  ;;  %v2145_v58 = vld [vmem:[#allocation2 + $0x78] sm:$0xff] }
  0x89   : > { %v783_v11 = vsel %vm771_vm5, %v760_v20, -inf  ;;  %v352_v63 = vsel %vm345_vm0, %v3339_v17, %v3338_v2  ;;  %v3344_v62 = vrot.slane %v2092_v24, 2  ;;  %v3343_v12 = vrot.slane %v2094_v54, 2 }
  0x8a   : > { %v684_v30 = vmax.f32 %v553_v59, %v613_v10  ;;  %v424_v35 = vmax.f32 %v2092_v24, %v352_v63  ;;  %v499_v20 = vsel %vm476_vm1, %v3342_v55, %v3341_v6  ;;  %v3346_v52 = vrot.slane %v2092_v24, 6 }
  0x8b   : > { %v523_v2 = vsel %vm509_vm2, %v499_v20, -inf  ;;  %v614_v59 = vsel %vm607_vm3, %v3344_v62, %v3343_v12  ;;  %v3347_v10 = vrot.slane %v2094_v54, 6  ;;  %v3350_v63 = vrot.slane %v2133_v8, 1 }
  0x8c   : > { %v2165_v17 = vmax.f32 %v684_v30, %v783_v11  ;;  %v555_v31 = vmax.f32 %v424_v35, %v523_v2  ;;  %v3349_v6 = vrot.slane %v2145_v58, 1  ;;  %v3353_v55 = vrot.slane %v2133_v8, 7  ;;  %v2178_v30 = vld [vmem:[#allocation2 + $0x80] sm:$0xff]  ;;  %v2180_v2 = vld [vmem:[#allocation2 + $0x88] sm:$0xff] }
  0x8d   : > { %v761_v20 = vsel %vm738_vm4, %v3347_v10, %v3346_v52  ;;  %v3358_v12 = vrot.slane %v2145_v58, 7  ;;  %v3357_v62 = vrot.slane %v2133_v8, 2  ;;  %v3354_v51 = vrot.slane %v2145_v58, 2 }
  0x8e   : > { %v686_v35 = vmax.f32 %v555_v31, %v614_v59  ;;  %v785_v11 = vsel %vm771_vm5, %v761_v20, -inf  ;;  %v353_v52 = vsel %vm345_vm0, %v3350_v63, %v3349_v6  ;;  %v3355_v10 = vrot.slane %v2133_v8, 6 }
  0x8f   : > { %v426_v27 = vmax.f32 %v2133_v8, %v353_v52  ;;  %v500_v31 = vsel %vm476_vm1, %v3358_v12, %v3353_v55  ;;  %v615_v59 = vsel %vm607_vm3, %v3357_v62, %v3354_v51  ;;  %v3356_v20 = vrot.slane %v2145_v58, 6 }
  0x90   : > { %v2205_v6 = vmax.f32 %v686_v35, %v785_v11  ;;  %v525_v52 = vsel %vm509_vm2, %v500_v31, -inf  ;;  %v3361_v63 = vrot.slane %v2178_v30, 1  ;;  %v3360_v26 = vrot.slane %v2180_v2, 1  ;;  %v2219_v11 = vld [vmem:[#allocation2 + $0x90] sm:$0xff] }
  0x91   : > { %v557_v23 = vmax.f32 %v426_v27, %v525_v52  ;;  %v762_v55 = vsel %vm738_vm4, %v3356_v20, %v3355_v10  ;;  %v3363_v51 = vrot.slane %v2178_v30, 7  ;;  %v3364_v35 = vrot.slane %v2180_v2, 7  ;;  %v2231_v20 = vld [vmem:[#allocation2 + $0x98] sm:$0xff] }
  0x92   : > { %v787_v31 = vsel %vm771_vm5, %v762_v55, -inf  ;;  %v354_v27 = vsel %vm345_vm0, %v3361_v63, %v3360_v26  ;;  %v3366_v52 = vrot.slane %v2178_v30, 2  ;;  %v3365_v10 = vrot.slane %v2180_v2, 2 }
  0x93   : > { %v688_v62 = vmax.f32 %v557_v23, %v615_v59  ;;  %v428_v12 = vmax.f32 %v2178_v30, %v354_v27  ;;  %v501_v55 = vsel %vm476_vm1, %v3364_v35, %v3363_v51  ;;  %v3368_v25 = vrot.slane %v2178_v30, 6 }
  0x94   : > { %v527_v26 = vsel %vm509_vm2, %v501_v55, -inf  ;;  %v616_v23 = vsel %vm607_vm3, %v3366_v52, %v3365_v10  ;;  %v3369_v59 = vrot.slane %v2180_v2, 6  ;;  %v3372_v27 = vrot.slane %v2219_v11, 1 }
  0x95   : > { %v2251_v63 = vmax.f32 %v688_v62, %v787_v31  ;;  %v559_v22 = vmax.f32 %v428_v12, %v527_v26  ;;  %v3371_v51 = vrot.slane %v2231_v20, 1  ;;  %v3375_v35 = vrot.slane %v2219_v11, 7  ;;  %v2264_v62 = vld [vmem:[#allocation2 + $0xa0] sm:$0xff]  ;;  %v2266_v26 = vld [vmem:[#allocation2 + $0xa8] sm:$0xff] }
  0x96   : > { %v763_v55 = vsel %vm738_vm4, %v3369_v59, %v3368_v25  ;;  %v3380_v10 = vrot.slane %v2231_v20, 7  ;;  %v3379_v52 = vrot.slane %v2219_v11, 2  ;;  %v3376_v19 = vrot.slane %v2231_v20, 2 }
  0x97   : > { %v690_v12 = vmax.f32 %v559_v22, %v616_v23  ;;  %v789_v31 = vsel %vm771_vm5, %v763_v55, -inf  ;;  %v355_v25 = vsel %vm345_vm0, %v3372_v27, %v3371_v51  ;;  %v3377_v59 = vrot.slane %v2219_v11, 6 }
  0x98   : > { %v430_v9 = vmax.f32 %v2219_v11, %v355_v25  ;;  %v502_v22 = vsel %vm476_vm1, %v3380_v10, %v3375_v35  ;;  %v617_v23 = vsel %vm607_vm3, %v3379_v52, %v3376_v19  ;;  %v3378_v55 = vrot.slane %v2231_v20, 6 }
  0x99   : > { %v2291_v51 = vmax.f32 %v690_v12, %v789_v31  ;;  %v529_v25 = vsel %vm509_vm2, %v502_v22, -inf  ;;  %v3383_v27 = vrot.slane %v2264_v62, 1  ;;  %v3382_v13 = vrot.slane %v2266_v26, 1  ;;  %v2305_v31 = vld [vmem:[#allocation2 + $0xb0] sm:$0xff] }
  0x9a   : > { %v561_v5 = vmax.f32 %v430_v9, %v529_v25  ;;  %v764_v35 = vsel %vm738_vm4, %v3378_v55, %v3377_v59  ;;  %v3385_v19 = vrot.slane %v2264_v62, 7  ;;  %v3386_v12 = vrot.slane %v2266_v26, 7  ;;  %v2317_v55 = vld [vmem:[#allocation2 + $0xb8] sm:$0xff] }
  0x9b   : > { %v791_v22 = vsel %vm771_vm5, %v764_v35, -inf  ;;  %v356_v9 = vsel %vm345_vm0, %v3383_v27, %v3382_v13  ;;  %v3388_v25 = vrot.slane %v2264_v62, 2  ;;  %v3387_v59 = vrot.slane %v2266_v26, 2 }
  0x9c   : > { %v692_v52 = vmax.f32 %v561_v5, %v617_v23  ;;  %v432_v10 = vmax.f32 %v2264_v62, %v356_v9  ;;  %v503_v35 = vsel %vm476_vm1, %v3386_v12, %v3385_v19  ;;  %v3390_v4 = vrot.slane %v2264_v62, 6 }
  0x9d   : > { %v531_v13 = vsel %vm509_vm2, %v503_v35, -inf  ;;  %v618_v5 = vsel %vm607_vm3, %v3388_v25, %v3387_v59  ;;  %v3391_v23 = vrot.slane %v2266_v26, 6  ;;  %v3394_v9 = vrot.slane %v2305_v31, 1 }
  0x9e   : > { %v2337_v27 = vmax.f32 %v692_v52, %v791_v22  ;;  %v563_v1 = vmax.f32 %v432_v10, %v531_v13  ;;  %v3393_v19 = vrot.slane %v2317_v55, 1  ;;  %v3397_v12 = vrot.slane %v2305_v31, 7  ;;  %v2350_v52 = vld [vmem:[#allocation2 + $0xc0] sm:$0xff]  ;;  %v2352_v13 = vld [vmem:[#allocation2 + $0xc8] sm:$0xff] }
  0x9f   : > { %v765_v35 = vsel %vm738_vm4, %v3391_v23, %v3390_v4  ;;  %v3402_v59 = vrot.slane %v2317_v55, 7  ;;  %v3401_v25 = vrot.slane %v2305_v31, 2  ;;  %v3398_v3 = vrot.slane %v2317_v55, 2 }
  0xa0   : > { %v694_v10 = vmax.f32 %v563_v1, %v618_v5  ;;  %v793_v22 = vsel %vm771_vm5, %v765_v35, -inf  ;;  %v357_v4 = vsel %vm345_vm0, %v3394_v9, %v3393_v19  ;;  %v3399_v23 = vrot.slane %v2305_v31, 6 }
  0xa1   : > { %v434_v0 = vmax.f32 %v2305_v31, %v357_v4  ;;  %v504_v1 = vsel %vm476_vm1, %v3402_v59, %v3397_v12  ;;  %v619_v5 = vsel %vm607_vm3, %v3401_v25, %v3398_v3  ;;  %v3400_v35 = vrot.slane %v2317_v55, 6 }
  0xa2   : > { %v2377_v19 = vmax.f32 %v694_v10, %v793_v22  ;;  %v533_v4 = vsel %vm509_vm2, %v504_v1, -inf  ;;  %v3405_v9 = vrot.slane %v2350_v52, 1  ;;  %v3404_v61 = vrot.slane %v2352_v13, 1  ;;  %v2391_v22 = vld [vmem:[#allocation2 + $0xd0] sm:$0xff] }
  0xa3   : > { %v565_v49 = vmax.f32 %v434_v0, %v533_v4  ;;  %v766_v12 = vsel %vm738_vm4, %v3400_v35, %v3399_v23  ;;  %v3407_v3 = vrot.slane %v2350_v52, 7  ;;  %v3408_v10 = vrot.slane %v2352_v13, 7  ;;  %v2403_v35 = vld [vmem:[#allocation2 + $0xd8] sm:$0xff] }
  0xa4   : > { %v795_v1 = vsel %vm771_vm5, %v766_v12, -inf  ;;  %v358_v0 = vsel %vm345_vm0, %v3405_v9, %v3404_v61  ;;  %v3410_v4 = vrot.slane %v2350_v52, 2  ;;  %v3409_v23 = vrot.slane %v2352_v13, 2 }
  0xa5   : > { %v696_v25 = vmax.f32 %v565_v49, %v619_v5  ;;  %v436_v59 = vmax.f32 %v2350_v52, %v358_v0  ;;  %v505_v12 = vsel %vm476_vm1, %v3408_v10, %v3407_v3  ;;  %v3412_v60 = vrot.slane %v2350_v52, 6 }
  0xa6   : > { %v535_v61 = vsel %vm509_vm2, %v505_v12, -inf  ;;  %v620_v49 = vsel %vm607_vm3, %v3410_v4, %v3409_v23  ;;  %v734_v5 = vrot.slane %v2352_v13, 6  ;;  %v3414_v0 = vrot.slane %v2391_v22, 1 }
  0xa7   : > { %v2423_v9 = vmax.f32 %v696_v25, %v795_v1  ;;  %v567_v48 = vmax.f32 %v436_v59, %v535_v61  ;;  %v3413_v3 = vrot.slane %v2403_v35, 1  ;;  %v3415_v10 = vrot.slane %v2391_v22, 7 }
  0xa8   : > { %v767_v12 = vsel %vm738_vm4, %v734_v5, %v3412_v60  ;;  %v3416_v23 = vrot.slane %v2403_v35, 7  ;;  %v588_v4 = vrot.slane %v2391_v22, 2  ;;  %v604_v47 = vrot.slane %v2403_v35, 2 }
  0xa9   : > { %v698_v25 = vmax.f32 %v567_v48, %v620_v49  ;;  %v797_v61 = vsel %vm771_vm5, %v767_v12, -inf  ;;  %v359_v59 = vsel %vm345_vm0, %v3414_v0, %v3413_v3  ;;  %v3417_v1 = vrot.slane %v2391_v22, 6 }
  0xaa   : > { %v438_v60 = vmax.f32 %v2391_v22, %v359_v59  ;;  %v506_v48 = vsel %vm476_vm1, %v3416_v23, %v3415_v10  ;;  %v621_v49 = vsel %vm607_vm3, %v588_v4, %v604_v47  ;;  %v3418_v12 = vrot.slane %v2403_v35, 6 }
  0xab   : > { %v2459_v3 = vmax.f32 %v698_v25, %v797_v61  ;;  %v537_v59 = vsel %vm509_vm2, %v506_v48, -inf  ;;  %v2464_v0 = vadd.s32 8, %v1873_v42  ;;  %v362_v10 = vsel %vm345_vm0, %v329_v38, %v313_v37 }
  0xac   : > { %v569_v23 = vmax.f32 %v438_v60, %v537_v59  ;;  %v768_v25 = vsel %vm738_vm4, %v3418_v12, %v3417_v1  ;;  %v477_v61 = vsel %vm476_vm1, %v444_v39, %v460_v40  ;;  %v624_v37 = vsel %vm607_vm3, %v591_v44, %v575_v43 }
  0xad   : > { %v799_v38 = vsel %vm771_vm5, %v768_v25, -inf  ;;  %vm379_vm6 = vcmp.lt.s32.totalorder %v2464_v0, 15  ;;  %vm641_vm7 = vcmp.lt.s32.totalorder %v2464_v0, 14  ;;  %v739_v39 = vsel %vm738_vm4, %v706_v45, %v722_v46 }
  0xae   : > { %v700_v40 = vmax.f32 %v569_v23, %v621_v49  ;;  %v381_v60 = vsel %vm379_vm6, %v362_v10, -inf  ;;  %v643_v43 = vsel %vm641_vm7, %v624_v37, -inf  ;;  %v3425_v44 = vrot.slane %v1865_v36, 1 }
  0xaf   : > { %v3426_v48 = vrot.slane %v1871_v41, 1  ;;  %v413_v25 = vmax.f32 %v1863_v34, %v381_v60  ;;  %v3427_v45 = vrot.slane %v1871_v41, 7  ;;  %v3428_v46 = vrot.slane %v1865_v36, 7 }
  0xb0   : > { %v3429_v10 = vrot.slane %v1865_v36, 2  ;;  %v3430_v49 = vrot.slane %v1871_v41, 2  ;;  %v3433_v1 = vrot.slane %v1915_v56, 1  ;;  %v3434_v12 = vrot.slane %v1917_v57, 1 }
  0xb1   : > { %v363_v59 = vsel %vm345_vm0, %v3426_v48, %v3425_v44  ;;  %v478_v23 = vsel %vm476_vm1, %v3428_v46, %v3427_v45  ;;  %v2525_v44 = vmax.f32 %v700_v40, %v799_v38  ;;  %v3431_v48 = vrot.slane %v1871_v41, 6 }
  0xb2   : > { %v383_v33 = vsel %vm379_vm6, %v363_v59, -inf  ;;  %v625_v37 = vsel %vm607_vm3, %v3430_v49, %v3429_v10  ;;  %v3432_v59 = vrot.slane %v1865_v36, 6  ;;  %v544_v46 = vmax.f32 %v413_v25, %v477_v61 }
  0xb3   : > { %v415_v34 = vmax.f32 %v1871_v41, %v383_v33  ;;  %v645_v60 = vsel %vm641_vm7, %v625_v37, -inf  ;;  %v364_v38 = vsel %vm345_vm0, %v3434_v12, %v3433_v1  ;;  %v3435_v40 = vrot.slane %v1917_v57, 7  ;;  %864 = vst [vmem:[#allocation3 + $0xf0] sm:$0xff] %v2525_v44 }
  0xb4   : > { %v740_v45 = vsel %vm738_vm4, %v3432_v59, %v3431_v48  ;;  %v3436_v33 = vrot.slane %v1915_v56, 7  ;;  %v3437_v36 = vrot.slane %v1915_v56, 2  ;;  %v3438_v10 = vrot.slane %v1917_v57, 2 }
  0xb5   : > { %v546_v25 = vmax.f32 %v415_v34, %v478_v23  ;;  %v385_v1 = vsel %vm379_vm6, %v364_v38, -inf  ;;  %v3439_v49 = vrot.slane %v1917_v57, 6  ;;  %v3440_v37 = vrot.slane %v1915_v56, 6 }
  0xb6   : > { %v479_v41 = vsel %vm476_vm1, %v3436_v33, %v3435_v40  ;;  %v626_v61 = vsel %vm607_vm3, %v3438_v10, %v3437_v36  ;;  %v675_v59 = vmax.f32 %v544_v46, %v643_v43  ;;  %v417_v40 = vmax.f32 %v1917_v57, %v385_v1 }
  0xb7   : > { %v647_v12 = vsel %vm641_vm7, %v626_v61, -inf  ;;  %v741_v48 = vsel %vm738_vm4, %v3440_v37, %v3439_v49  ;;  %v3441_v33 = vrot.slane %v1963_v14, 1  ;;  %v3442_v23 = vrot.slane %v1965_v15, 1 }
  0xb8   : > { %v3443_v38 = vrot.slane %v1965_v15, 7  ;;  %v3444_v36 = vrot.slane %v1963_v14, 7  ;;  %v677_v10 = vmax.f32 %v546_v25, %v645_v60  ;;  %v3445_v57 = vrot.slane %v1963_v14, 2 }
  0xb9   : > { %v365_v34 = vsel %vm345_vm0, %v3442_v23, %v3441_v33  ;;  %v3446_v46 = vrot.slane %v1965_v15, 2  ;;  %v3447_v1 = vrot.slane %v1965_v15, 6  ;;  %v3448_v49 = vrot.slane %v1963_v14, 6 }
  0xba   : > { %v480_v56 = vsel %vm476_vm1, %v3444_v36, %v3443_v38  ;;  %v387_v43 = vsel %vm379_vm6, %v365_v34, -inf  ;;  %v2592_v33 = vmax.f32 %v675_v59, %v739_v39  ;;  %v548_v60 = vmax.f32 %v417_v40, %v479_v41 }
  0xbb   : > { %v627_v61 = vsel %vm607_vm3, %v3446_v46, %v3445_v57  ;;  %v742_v37 = vsel %vm738_vm4, %v3448_v49, %v3447_v1  ;;  %v419_v25 = vmax.f32 %v1965_v15, %v387_v43  ;;  %v2597_v34 = vmax.f32 %v677_v10, %v740_v45 }
  0xbc   : > { %v649_v23 = vsel %vm641_vm7, %v627_v61, -inf  ;;  %v3449_v38 = vrot.slane %v1996_v32, 1  ;;  %v3450_v36 = vrot.slane %v2012_v53, 1  ;;  %v3451_v57 = vrot.slane %v2012_v53, 7 }
  0xbd   : > { %v3452_v39 = vrot.slane %v1996_v32, 7  ;;  %v3453_v15 = vrot.slane %v1996_v32, 2  ;;  %v3454_v59 = vrot.slane %v2012_v53, 2  ;;  %v679_v40 = vmax.f32 %v548_v60, %v647_v12 }
  0xbe   : > { %v366_v14 = vsel %vm345_vm0, %v3450_v36, %v3449_v38  ;;  %v550_v10 = vmax.f32 %v419_v25, %v480_v56  ;;  %v3455_v1 = vrot.slane %v2012_v53, 6  ;;  %v3456_v49 = vrot.slane %v1996_v32, 6 }
  0xbf   : > { %v481_v41 = vsel %vm476_vm1, %v3452_v39, %v3451_v57  ;;  %v628_v45 = vsel %vm607_vm3, %v3454_v59, %v3453_v15  ;;  %v389_v43 = vsel %vm379_vm6, %v366_v14, -inf  ;;  %v3457_v36 = vrot.slane %v2047_v21, 1 }
  0xc0   : > { %v651_v46 = vsel %vm641_vm7, %v628_v45, -inf  ;;  %v421_v61 = vmax.f32 %v2012_v53, %v389_v43  ;;  %v743_v38 = vsel %vm738_vm4, %v3456_v49, %v3455_v1  ;;  %v3458_v12 = vrot.slane %v2059_v50, 1 }
  0xc1   : > { %v3459_v60 = vrot.slane %v2059_v50, 7  ;;  %v3460_v25 = vrot.slane %v2047_v21, 7  ;;  %v2640_v53 = vmax.f32 %v679_v40, %v741_v48  ;;  %v681_v32 = vmax.f32 %v550_v10, %v649_v23 }
  0xc2   : > { %v367_v56 = vsel %vm345_vm0, %v3458_v12, %v3457_v36  ;;  %v3461_v39 = vrot.slane %v2047_v21, 2  ;;  %v3462_v15 = vrot.slane %v2059_v50, 2  ;;  %v552_v45 = vmax.f32 %v421_v61, %v481_v41 }
  0xc3   : > { %v482_v14 = vsel %vm476_vm1, %v3460_v25, %v3459_v60  ;;  %v391_v57 = vsel %vm379_vm6, %v367_v56, -inf  ;;  %v3463_v48 = vrot.slane %v2059_v50, 6  ;;  %v3464_v23 = vrot.slane %v2047_v21, 6 }
  0xc4   : > { %v629_v59 = vsel %vm607_vm3, %v3462_v15, %v3461_v39  ;;  %v423_v43 = vmax.f32 %v2059_v50, %v391_v57  ;;  %v2659_v10 = vmax.f32 %v681_v32, %v742_v37  ;;  %v3465_v49 = vrot.slane %v2092_v24, 1 }
  0xc5   : > { %v653_v1 = vsel %vm641_vm7, %v629_v59, -inf  ;;  %v744_v40 = vsel %vm738_vm4, %v3464_v23, %v3463_v48  ;;  %v3466_v36 = vrot.slane %v2094_v54, 1  ;;  %v3467_v61 = vrot.slane %v2094_v54, 7 }
  0xc6   : > { %v3468_v12 = vrot.slane %v2092_v24, 7  ;;  %v3469_v21 = vrot.slane %v2092_v24, 2  ;;  %v3470_v56 = vrot.slane %v2094_v54, 2  ;;  %v683_v60 = vmax.f32 %v552_v45, %v651_v46 }
  0xc7   : > { %v368_v41 = vsel %vm345_vm0, %v3466_v36, %v3465_v49  ;;  %v554_v25 = vmax.f32 %v423_v43, %v482_v14  ;;  %v3471_v15 = vrot.slane %v2094_v54, 6  ;;  %v3472_v59 = vrot.slane %v2092_v24, 6 }
  0xc8   : > { %v483_v50 = vsel %vm476_vm1, %v3468_v12, %v3467_v61  ;;  %v630_v37 = vsel %vm607_vm3, %v3470_v56, %v3469_v21  ;;  %v393_v32 = vsel %vm379_vm6, %v368_v41, -inf  ;;  %v3473_v23 = vrot.slane %v2133_v8, 1 }
  0xc9   : > { %v655_v57 = vsel %vm641_vm7, %v630_v37, -inf  ;;  %v425_v39 = vmax.f32 %v2094_v54, %v393_v32  ;;  %v745_v48 = vsel %vm738_vm4, %v3472_v59, %v3471_v15  ;;  %v3474_v46 = vrot.slane %v2145_v58, 1 }
  0xca   : > { %v3475_v45 = vrot.slane %v2145_v58, 7  ;;  %v3476_v43 = vrot.slane %v2133_v8, 7  ;;  %v2702_v54 = vmax.f32 %v683_v60, %v743_v38  ;;  %v685_v24 = vmax.f32 %v554_v25, %v653_v1 }
  0xcb   : > { %v369_v14 = vsel %vm345_vm0, %v3474_v46, %v3473_v23  ;;  %v3477_v41 = vrot.slane %v2133_v8, 2  ;;  %v3478_v61 = vrot.slane %v2145_v58, 2  ;;  %v556_v21 = vmax.f32 %v425_v39, %v483_v50 }
  0xcc   : > { %v484_v49 = vsel %vm476_vm1, %v3476_v43, %v3475_v45  ;;  %v395_v36 = vsel %vm379_vm6, %v369_v14, -inf  ;;  %v3479_v38 = vrot.slane %v2145_v58, 6  ;;  %v3480_v1 = vrot.slane %v2133_v8, 6 }
  0xcd   : > { %v631_v12 = vsel %vm607_vm3, %v3478_v61, %v3477_v41  ;;  %v427_v56 = vmax.f32 %v2145_v58, %v395_v36  ;;  %v2721_v25 = vmax.f32 %v685_v24, %v744_v40  ;;  %v3481_v32 = vrot.slane %v2178_v30, 1 }
  0xce   : > { %v657_v37 = vsel %vm641_vm7, %v631_v12, -inf  ;;  %v746_v60 = vsel %vm738_vm4, %v3480_v1, %v3479_v38  ;;  %v3482_v15 = vrot.slane %v2180_v2, 1  ;;  %v3483_v39 = vrot.slane %v2180_v2, 7 }
  0xcf   : > { %v3484_v59 = vrot.slane %v2178_v30, 7  ;;  %v3485_v8 = vrot.slane %v2178_v30, 2  ;;  %v3486_v23 = vrot.slane %v2180_v2, 2  ;;  %v687_v46 = vmax.f32 %v556_v21, %v655_v57 }
  0xd0   : > { %v370_v50 = vsel %vm345_vm0, %v3482_v15, %v3481_v32  ;;  %v558_v14 = vmax.f32 %v427_v56, %v484_v49  ;;  %v3487_v36 = vrot.slane %v2180_v2, 6  ;;  %v3488_v41 = vrot.slane %v2178_v30, 6 }
  0xd1   : > { %v485_v58 = vsel %vm476_vm1, %v3484_v59, %v3483_v39  ;;  %v632_v40 = vsel %vm607_vm3, %v3486_v23, %v3485_v8  ;;  %v397_v45 = vsel %vm379_vm6, %v370_v50, -inf  ;;  %v3489_v12 = vrot.slane %v2219_v11, 1 }
  0xd2   : > { %v659_v43 = vsel %vm641_vm7, %v632_v40, -inf  ;;  %v429_v24 = vmax.f32 %v2180_v2, %v397_v45  ;;  %v747_v61 = vsel %vm738_vm4, %v3488_v41, %v3487_v36  ;;  %v3490_v57 = vrot.slane %v2231_v20, 1 }
  0xd3   : > { %v3491_v21 = vrot.slane %v2231_v20, 7  ;;  %v3492_v56 = vrot.slane %v2219_v11, 7  ;;  %v2764_v2 = vmax.f32 %v687_v46, %v745_v48  ;;  %v689_v30 = vmax.f32 %v558_v14, %v657_v37 }
  0xd4   : > { %v371_v49 = vsel %vm345_vm0, %v3490_v57, %v3489_v12  ;;  %v3493_v32 = vrot.slane %v2219_v11, 2  ;;  %v3494_v15 = vrot.slane %v2231_v20, 2  ;;  %v560_v39 = vmax.f32 %v429_v24, %v485_v58 }
  0xd5   : > { %v486_v38 = vsel %vm476_vm1, %v3492_v56, %v3491_v21  ;;  %v399_v1 = vsel %vm379_vm6, %v371_v49, -inf  ;;  %v3495_v48 = vrot.slane %v2231_v20, 6  ;;  %v3496_v37 = vrot.slane %v2219_v11, 6 }
  0xd6   : > { %v633_v50 = vsel %vm607_vm3, %v3494_v15, %v3493_v32  ;;  %v431_v59 = vmax.f32 %v2231_v20, %v399_v1  ;;  %v2783_v40 = vmax.f32 %v689_v30, %v746_v60  ;;  %v3497_v46 = vrot.slane %v2264_v62, 1 }
  0xd7   : > { %v661_v8 = vsel %vm641_vm7, %v633_v50, -inf  ;;  %v748_v23 = vsel %vm738_vm4, %v3496_v37, %v3495_v48  ;;  %v3498_v14 = vrot.slane %v2266_v26, 1  ;;  %v3499_v45 = vrot.slane %v2266_v26, 7 }
  0xd8   : > { %v3500_v24 = vrot.slane %v2264_v62, 7  ;;  %v3501_v11 = vrot.slane %v2264_v62, 2  ;;  %v3502_v36 = vrot.slane %v2266_v26, 2  ;;  %v691_v41 = vmax.f32 %v560_v39, %v659_v43 }
  0xd9   : > { %v372_v58 = vsel %vm345_vm0, %v3498_v14, %v3497_v46  ;;  %v562_v12 = vmax.f32 %v431_v59, %v486_v38  ;;  %v3503_v56 = vrot.slane %v2266_v26, 6  ;;  %v3504_v30 = vrot.slane %v2264_v62, 6 }
  0xda   : > { %v487_v20 = vsel %vm476_vm1, %v3500_v24, %v3499_v45  ;;  %v634_v60 = vsel %vm607_vm3, %v3502_v36, %v3501_v11  ;;  %v401_v57 = vsel %vm379_vm6, %v372_v58, -inf  ;;  %v3505_v32 = vrot.slane %v2305_v31, 1 }
  0xdb   : > { %v663_v49 = vsel %vm641_vm7, %v634_v60, -inf  ;;  %v433_v21 = vmax.f32 %v2266_v26, %v401_v57  ;;  %v749_v1 = vsel %vm738_vm4, %v3504_v30, %v3503_v56  ;;  %v3506_v43 = vrot.slane %v2317_v55, 1 }
  0xdc   : > { %v3507_v15 = vrot.slane %v2317_v55, 7  ;;  %v3508_v50 = vrot.slane %v2305_v31, 7  ;;  %v2826_v26 = vmax.f32 %v691_v41, %v747_v61  ;;  %v693_v62 = vmax.f32 %v562_v12, %v661_v8 }
  0xdd   : > { %v373_v38 = vsel %vm345_vm0, %v3506_v43, %v3505_v32  ;;  %v3509_v48 = vrot.slane %v2305_v31, 2  ;;  %v3510_v37 = vrot.slane %v2317_v55, 2  ;;  %v564_v14 = vmax.f32 %v433_v21, %v487_v20 }
  0xde   : > { %v488_v39 = vsel %vm476_vm1, %v3508_v50, %v3507_v15  ;;  %v403_v59 = vsel %vm379_vm6, %v373_v38, -inf  ;;  %v3511_v61 = vrot.slane %v2317_v55, 6  ;;  %v3512_v8 = vrot.slane %v2305_v31, 6 }
  0xdf   : > { %v635_v46 = vsel %vm607_vm3, %v3510_v37, %v3509_v48  ;;  %v435_v58 = vmax.f32 %v2317_v55, %v403_v59  ;;  %v2845_v11 = vmax.f32 %v693_v62, %v748_v23  ;;  %v3513_v36 = vrot.slane %v2350_v52, 1  ;;  %v307_v37 = vld [vmem:[#allocation2 + $0xe8] sm:$0xff] }
  0xe0   : > { %v665_v45 = vsel %vm641_vm7, %v635_v46, -inf  ;;  %v750_v24 = vsel %vm738_vm4, %v3512_v8, %v3511_v61  ;;  %v3514_v60 = vrot.slane %v2352_v13, 1  ;;  %v3515_v41 = vrot.slane %v2352_v13, 7 }
  0xe1   : > { %v3516_v12 = vrot.slane %v2350_v52, 7  ;;  %v3517_v31 = vrot.slane %v2350_v52, 2  ;;  %v3518_v57 = vrot.slane %v2352_v13, 2  ;;  %v695_v21 = vmax.f32 %v564_v14, %v663_v49 }
  0xe2   : > { %v374_v20 = vsel %vm345_vm0, %v3514_v60, %v3513_v36  ;;  %v566_v56 = vmax.f32 %v435_v58, %v488_v39  ;;  %v3519_v38 = vrot.slane %v2350_v52, 6  ;;  %v3520_v50 = vrot.slane %v2391_v22, 1 }
  0xe3   : > { %v489_v55 = vsel %vm476_vm1, %v3516_v12, %v3515_v41  ;;  %v636_v23 = vsel %vm607_vm3, %v3518_v57, %v3517_v31  ;;  %v405_v30 = vsel %vm379_vm6, %v374_v20, -inf  ;;  %v3521_v49 = vrot.slane %v2403_v35, 1 }
  0xe4   : > { %v667_v32 = vsel %vm641_vm7, %v636_v23, -inf  ;;  %v437_v43 = vmax.f32 %v2352_v13, %v405_v30  ;;  %v751_v15 = vsel %vm738_vm4, %v3519_v38, %v734_v5  ;;  %v3522_v62 = vrot.slane %v2403_v35, 7  ;;  %v306_v13 = vld [vmem:[#allocation2 + $0xe0] sm:$0xff] }
  0xe5   : > { %v375_v39 = vsel %vm345_vm0, %v3521_v49, %v3520_v50  ;;  %v3523_v59 = vrot.slane %v2391_v22, 7  ;;  %v2888_v52 = vmax.f32 %v695_v21, %v749_v1  ;;  %v697_v46 = vmax.f32 %v566_v56, %v665_v45  ;;  %v308_v49 = vld [vmem:[#allocation2 + $0xf0] sm:$0xff] }
  0xe6   : > { %v407_v5 = vsel %vm379_vm6, %v375_v39, -inf  ;;  %v637_v14 = vsel %vm607_vm3, %v604_v47, %v588_v4  ;;  %v568_v58 = vmax.f32 %v437_v43, %v489_v55  ;;  %v3524_v1 = vrot.slane %v2403_v35, 6 }
  0xe7   : > { %v490_v48 = vsel %vm476_vm1, %v3523_v59, %v3522_v62  ;;  %v439_v61 = vmax.f32 %v2403_v35, %v407_v5  ;;  %v669_v8 = vsel %vm641_vm7, %v637_v14, -inf  ;;  %v3525_v45 = vrot.slane %v2391_v22, 6 }
  0xe8   : > { %v2907_v60 = vmax.f32 %v697_v46, %v750_v24  ;;  %v327_v20 = vrot.slane %v306_v13, 1  ;;  %v343_v41 = vrot.slane %v307_v37, 1  ;;  %v458_v12 = vrot.slane %v306_v13, 7 }
  0xe9   : > { %v752_v36 = vsel %vm738_vm4, %v3525_v45, %v3524_v1  ;;  %v699_v31 = vmax.f32 %v568_v58, %v667_v32  ;;  %v570_v47 = vmax.f32 %v439_v61, %v490_v48  ;;  %v474_v4 = vrot.slane %v307_v37, 7 }
  0xea   : > { %v589_v55 = vrot.slane %v306_v13, 2  ;;  %v360_v57 = vsel %vm345_vm0, %v327_v20, %v343_v41  ;;  %v605_v23 = vrot.slane %v307_v37, 2  ;;  %v720_v21 = vrot.slane %v306_v13, 6 }
  0xeb   : > { %v736_v35 = vrot.slane %v307_v37, 6  ;;  %v2911_v56 = vmax.f32 %v699_v31, %v751_v15  ;;  %v701_v22 = vmax.f32 %v570_v47, %v669_v8  ;;  %v440_v30 = vmax.f32 %v306_v13, %v360_v57  ;;  %v309_v15 = vld [vmem:[#allocation2 + $0xf8] sm:$0xff] }
  0xec   : > { %v507_v24 = vsel %vm476_vm1, %v474_v4, %v458_v12  ;;  %v622_v32 = vsel %vm607_vm3, %v589_v55, %v605_v23  ;;  %v376_v50 = vsel %vm345_vm0, %v343_v41, %v327_v20  ;;  %v491_v46 = vsel %vm476_vm1, %v458_v12, %v474_v4 }
  0xed   : > { %v539_v43 = vsel %vm509_vm2, %v507_v24, -inf  ;;  %v769_v38 = vsel %vm738_vm4, %v736_v35, %v720_v21  ;;  %v2923_v39 = vmax.f32 %v701_v22, %v752_v36  ;;  %v409_v48 = vsel %vm379_vm6, %v376_v50, -inf }
  0xee   : > { %v571_v62 = vmax.f32 %v440_v30, %v539_v43  ;;  %v801_v59 = vsel %vm771_vm5, %v769_v38, -inf  ;;  %v441_v13 = vmax.f32 %v307_v37, %v409_v48  ;;  %v638_v5 = vsel %vm607_vm3, %v605_v23, %v589_v55  ;;  %v903_v43 = vld [vmem:[#allocation3 + $0x10] sm:$0xff]  ;;  %v2951_v38 = vld [vmem:[#allocation3 + $0x18] sm:$0xff]  ;;  %v905_v48 = vld [vmem:[#allocation3 + $0x20] sm:$0xff] }
  0xef   : > { %v753_v14 = vsel %vm738_vm4, %v720_v21, %v736_v35  ;;  %v671_v61 = vsel %vm641_vm7, %v638_v5, -inf  ;;  %v328_v8 = vrot.slane %v308_v49, 1  ;;  %v344_v1 = vrot.slane %v309_v15, 1  ;;  %v870_v21 = vld [vmem:[#allocation3] sm:$0xff] }
  0xf0   : > { %v702_v58 = vmax.f32 %v571_v62, %v622_v32  ;;  %v572_v45 = vmax.f32 %v441_v13, %v491_v46  ;;  %v459_v36 = vrot.slane %v308_v49, 7  ;;  %v475_v20 = vrot.slane %v309_v15, 7  ;;  %v871_v32 = vld [vmem:[#allocation3 + $0x8] sm:$0xff]  ;;  %v876_v13 = vld [vmem:[#allocation3 + $0x30] sm:$0xff] }
  0xf1   : > { %v590_v41 = vrot.slane %v308_v49, 2  ;;  %v361_v12 = vsel %vm345_vm0, %v328_v8, %v344_v1  ;;  %v606_v31 = vrot.slane %v309_v15, 2  ;;  %v721_v47 = vrot.slane %v308_v49, 6 }
  0xf2   : > { %v2937_v37 = vmax.f32 %v702_v58, %v801_v59  ;;  %v703_v4 = vmax.f32 %v572_v45, %v671_v61  ;;  %v442_v55 = vmax.f32 %v308_v49, %v361_v12  ;;  %v508_v57 = vsel %vm476_vm1, %v475_v20, %v459_v36 }
  0xf3   : > { %v737_v23 = vrot.slane %v309_v15, 6  ;;  %v541_v35 = vsel %vm509_vm2, %v508_v57, -inf  ;;  %v623_v22 = vsel %vm607_vm3, %v590_v41, %v606_v31  ;;  %v377_v30 = vsel %vm345_vm0, %v344_v1, %v328_v8 }
  0xf4   : > { %v492_v24 = vsel %vm476_vm1, %v459_v36, %v475_v20  ;;  %v2953_v50 = vmax.f32 %v703_v4, %v753_v14  ;;  %v573_v49 = vmax.f32 %v442_v55, %v541_v35  ;;  %v411_v59 = vsel %vm379_vm6, %v377_v30, -inf }
  0xf5   : > { %v770_v62 = vsel %vm738_vm4, %v737_v23, %v721_v47  ;;  %v443_v5 = vmax.f32 %v309_v15, %v411_v59  ;;  %v639_v58 = vsel %vm607_vm3, %v606_v31, %v590_v41  ;;  %v754_v14 = vsel %vm738_vm4, %v721_v47, %v737_v23 }
  0xf6   : > { %v803_v46 = vsel %vm771_vm5, %v770_v62, -inf  ;;  %v704_v61 = vmax.f32 %v573_v49, %v623_v22  ;;  %v673_v8 = vsel %vm641_vm7, %v639_v58, -inf  ;;  %v935_v1 = vmax.f32 %v870_v21, %v903_v43 }
  0xf7   : > { %v936_v45 = vmax.f32 %v871_v32, %v2951_v38  ;;  %v574_v36 = vmax.f32 %v443_v5, %v492_v24  ;;  %v937_v20 = vmax.f32 %v903_v43, %v905_v48  ;;  %v939_v12 = vmax.f32 %v905_v48, %v1987_v28 }
  0xf8   : > { %v941_v4 = vmax.f32 %v876_v13, %v2028_v7  ;;  %v2970_v15 = vmax.f32 %v704_v61, %v803_v46  ;;  %v999_v41 = vmax.f32 %v935_v1, %v1967_v16  ;;  %v943_v31 = vmax.f32 %v2028_v7, %v2079_v29 }
  0xf9   : > { %v1000_v42 = vmax.f32 %v936_v45, %v2592_v33  ;;  %v705_v0 = vmax.f32 %v574_v36, %v673_v8  ;;  %v1001_v47 = vmax.f32 %v937_v20, %v1987_v28  ;;  %v1003_v55 = vmax.f32 %v939_v12, %v2028_v7 }
  0xfa   : > { %v1005_v57 = vmax.f32 %v941_v4, %v2079_v29  ;;  %v1064_v23 = vmax.f32 %v999_v41, %v1987_v28  ;;  %v1007_v16 = vmax.f32 %v943_v31, %v2119_v18  ;;  %v945_v35 = vmax.f32 %v2079_v29, %v2119_v18 }
  0xfb   : > { %v1065_v21 = vmax.f32 %v1000_v42, %v2597_v34  ;;  %v2984_v22 = vmax.f32 %v705_v0, %v754_v14  ;;  %v1066_v30 = vmax.f32 %v1001_v47, %v2028_v7  ;;  %v1068_v24 = vmax.f32 %v1003_v55, %v2079_v29 }
  0xfc   : > { %v1070_v43 = vmax.f32 %v1005_v57, %v2119_v18  ;;  %v2990_v28 = vmax.f32 %v1064_v23, %v2028_v7  ;;  %v1072_v49 = vmax.f32 %v1007_v16, %v2165_v17  ;;  %v1009_v62 = vmax.f32 %v945_v35, %v2165_v17 }
  0xfd   : > { %v2993_v32 = vmax.f32 %v1065_v21, %v2640_v53  ;;  %v2998_v59 = vmax.f32 %v1066_v30, %v2079_v29  ;;  %v3001_v48 = vmax.f32 %v1068_v24, %v2119_v18  ;;  %v947_v7 = vmax.f32 %v2119_v18, %v2165_v17 }
  0xfe   : > { %v3004_v13 = vmax.f32 %v1070_v43, %v2165_v17  ;;  %1161 = vst [vmem:[%s1793_s18] sm:$0xff] %v2990_v28  ;;  %v3013_v46 = vmax.f32 %v1072_v49, %v2205_v6  ;;  %v1074_v29 = vmax.f32 %v1009_v62, %v2205_v6  ;;  %v949_v5 = vmax.f32 %v2165_v17, %v2205_v6 }
  0xff   : > { %1162 = vst [vmem:[%s1793_s18 + $0x8] sm:$0xff] %v2993_v32  ;;  %v951_v58 = vmax.f32 %v2205_v6, %v2251_v63  ;;  %1163 = vst [vmem:[%s1793_s18 + $0x10] sm:$0xff] %v2998_v59  ;;  %v1011_v18 = vmax.f32 %v947_v7, %v2205_v6  ;;  %v953_v14 = vmax.f32 %v2251_v63, %v2291_v51 }
 0x100   : > { %1165 = vst [vmem:[%s1793_s18 + $0x20] sm:$0xff] %v3001_v48  ;;  %1167 = vst [vmem:[%s1793_s18 + $0x30] sm:$0xff] %v3004_v13  ;;  %v955_v61 = vmax.f32 %v2291_v51, %v2337_v27  ;;  %v957_v17 = vmax.f32 %v2337_v27, %v2377_v19  ;;  %v3036_v8 = vmax.f32 %v1074_v29, %v2251_v63 }
 0x101   : > { %1169 = vst [vmem:[%s1793_s18 + $0x40] sm:$0xff] %v3013_v46  ;;  %v1013_v1 = vmax.f32 %v949_v5, %v2251_v63  ;;  %v1015_v45 = vmax.f32 %v951_v58, %v2291_v51  ;;  %v959_v6 = vmax.f32 %v2377_v19, %v2423_v9  ;;  %v1076_v36 = vmax.f32 %v1011_v18, %v2251_v63 }
 0x102   : > { %v1017_v20 = vmax.f32 %v953_v14, %v2337_v27  ;;  %v1019_v12 = vmax.f32 %v955_v61, %v2377_v19  ;;  %v1021_v4 = vmax.f32 %v957_v17, %v2423_v9  ;;  %1171 = vst [vmem:[%s1793_s18 + $0x50] sm:$0xff] %v3036_v8  ;;  %v961_v63 = vmax.f32 %v2423_v9, %v2459_v3  ;;  %v3120_v17 = vld [vmem:[#allocation3 + $0x120] sm:$0xff] }
 0x103   : > { %v1078_v41 = vmax.f32 %v1013_v1, %v2291_v51  ;;  %v1080_v42 = vmax.f32 %v1015_v45, %v2337_v27  ;;  %v1023_v31 = vmax.f32 %v959_v6, %v2459_v3  ;;  %v3054_v0 = vmax.f32 %v1076_v36, %v2291_v51  ;;  %1197 = vst [vmem:[#allocation2] sm:$0xff] (!%p1350_p2), %v2990_v28 }
 0x104   : > { %v1082_v47 = vmax.f32 %v1017_v20, %v2377_v19  ;;  %v1084_v55 = vmax.f32 %v1019_v12, %v2423_v9  ;;  %v1086_v57 = vmax.f32 %v1021_v4, %v2459_v3  ;;  %v1025_v51 = vmax.f32 %v961_v63, %v2525_v44  ;;  %1198 = vst [vmem:[#allocation2 + $0x8] sm:$0xff] (!%p1350_p2), %v2993_v32 }
 0x105   : > { %v3060_v23 = vmax.f32 %v1078_v41, %v2337_v27  ;;  %v3063_v21 = vmax.f32 %v1080_v42, %v2377_v19  ;;  %v1088_v16 = vmax.f32 %v1023_v31, %v2525_v44  ;;  %1173 = vst [vmem:[%s1793_s18 + $0x60] sm:$0xff] %v3054_v0  ;;  %v963_v19 = vmax.f32 %v2459_v3, %v2525_v44 }
 0x106   : > { %v3070_v35 = vmax.f32 %v1082_v47, %v2423_v9  ;;  %v3073_v30 = vmax.f32 %v1084_v55, %v2459_v3  ;;  %v3076_v27 = vmax.f32 %v1086_v57, %v2525_v44  ;;  %v1090_v9 = vmax.f32 %v1025_v51, %v2937_v37  ;;  %1199 = vst [vmem:[#allocation2 + $0x10] sm:$0xff] (!%p1350_p2), %v2998_v59 }
 0x107   : > { %1175 = vst [vmem:[%s1793_s18 + $0x70] sm:$0xff] %v3060_v23  ;;  %1177 = vst [vmem:[%s1793_s18 + $0x80] sm:$0xff] %v3063_v21  ;;  %v3085_v24 = vmax.f32 %v1088_v16, %v2937_v37  ;;  %v938_v43 = vmax.f32 %v2951_v38, %v2592_v33  ;;  %v940_v49 = vmax.f32 %v2592_v33, %v2597_v34 }
 0x108   : > { %1179 = vst [vmem:[%s1793_s18 + $0x90] sm:$0xff] %v3070_v35  ;;  %1181 = vst [vmem:[%s1793_s18 + $0xa0] sm:$0xff] %v3073_v30  ;;  %v1027_v3 = vmax.f32 %v963_v19, %v2937_v37  ;;  %v942_v44 = vmax.f32 %v2597_v34, %v2640_v53  ;;  %v944_v62 = vmax.f32 %v2640_v53, %v2659_v10 }
 0x109   : > { %1183 = vst [vmem:[%s1793_s18 + $0xb0] sm:$0xff] %v3076_v27  ;;  %v946_v38 = vmax.f32 %v2659_v10, %v2702_v54  ;;  %1185 = vst [vmem:[%s1793_s18 + $0xc0] sm:$0xff] %v3085_v24  ;;  %v3108_v33 = vmax.f32 %v1090_v9, %v2970_v15  ;;  %v1002_v7 = vmax.f32 %v938_v43, %v2597_v34  ;;  %v900_v9 = vld [vmem:[#allocation3 + $0xf0] sm:$0xff] }
 0x10a   : > { %v1004_v29 = vmax.f32 %v940_v49, %v2640_v53  ;;  %v948_v5 = vmax.f32 %v2702_v54, %v2721_v25  ;;  %v1092_v58 = vmax.f32 %v1027_v3, %v2970_v15  ;;  %v1006_v18 = vmax.f32 %v942_v44, %v2659_v10  ;;  %1201 = vst [vmem:[#allocation2 + $0x20] sm:$0xff] (!%p1350_p2), %v3001_v48 }
 0x10b   : > { %v1008_v14 = vmax.f32 %v944_v62, %v2702_v54  ;;  %v1010_v61 = vmax.f32 %v946_v38, %v2721_v25  ;;  %1187 = vst [vmem:[%s1793_s18 + $0xd0] sm:$0xff] %v3108_v33  ;;  %v1067_v34 = vmax.f32 %v1002_v7, %v2640_v53  ;;  %v950_v6 = vmax.f32 %v2721_v25, %v2764_v2 }
 0x10c   : > { %v1069_v1 = vmax.f32 %v1004_v29, %v2659_v10  ;;  %v1012_v45 = vmax.f32 %v948_v5, %v2764_v2  ;;  %v3128_v36 = vmax.f32 %v1092_v58, %v3120_v17  ;;  %v1071_v20 = vmax.f32 %v1006_v18, %v2702_v54  ;;  %1203 = vst [vmem:[#allocation2 + $0x30] sm:$0xff] (!%p1350_p2), %v3004_v13 }
 0x10d   : > { %v1073_v12 = vmax.f32 %v1008_v14, %v2721_v25  ;;  %v1075_v4 = vmax.f32 %v1010_v61, %v2764_v2  ;;  %v3134_v53 = vmax.f32 %v1067_v34, %v2659_v10  ;;  %v1014_v31 = vmax.f32 %v950_v6, %v2783_v40  ;;  %1205 = vst [vmem:[#allocation2 + $0x40] sm:$0xff] (!%p1350_p2), %v3013_v46 }
 0x10e   : > { %v3137_v41 = vmax.f32 %v1069_v1, %v2702_v54  ;;  %v1077_v42 = vmax.f32 %v1012_v45, %v2783_v40  ;;  %1189 = vst [vmem:[%s1793_s18 + $0xe0] sm:$0xff] %v3128_v36  ;;  %v3144_v63 = vmax.f32 %v1071_v20, %v2721_v25  ;;  %v952_v54 = vmax.f32 %v2764_v2, %v2783_v40 }
 0x10f   : > { %v3147_v47 = vmax.f32 %v1073_v12, %v2764_v2  ;;  %v3150_v10 = vmax.f32 %v1075_v4, %v2783_v40  ;;  %1164 = vst [vmem:[%s1793_s18 + $0x18] sm:$0xff] %v3134_v53  ;;  %v1079_v25 = vmax.f32 %v1014_v31, %v2826_v26  ;;  %v954_v57 = vmax.f32 %v2783_v40, %v2826_v26  ;;  %v1126_v4 = vld [vmem:[#allocation3 + $0x128] sm:$0xff] }
 0x110   : > { %1166 = vst [vmem:[%s1793_s18 + $0x28] sm:$0xff] %v3137_v41  ;;  %v3159_v55 = vmax.f32 %v1077_v42, %v2826_v26  ;;  %v956_v16 = vmax.f32 %v2826_v26, %v2845_v11  ;;  %1168 = vst [vmem:[%s1793_s18 + $0x38] sm:$0xff] %v3144_v63  ;;  %v1016_v2 = vmax.f32 %v952_v54, %v2826_v26  ;;  %v1127_v42 = vld [vmem:[#allocation3 + $0x130] sm:$0xff] }
 0x111   : > { %1170 = vst [vmem:[%s1793_s18 + $0x48] sm:$0xff] %v3147_v47  ;;  %1172 = vst [vmem:[%s1793_s18 + $0x58] sm:$0xff] %v3150_v10  ;;  %v958_v51 = vmax.f32 %v2845_v11, %v2888_v52  ;;  %v960_v19 = vmax.f32 %v2888_v52, %v2907_v60  ;;  %v962_v40 = vmax.f32 %v2907_v60, %v2911_v56 }
 0x112   : > { %1174 = vst [vmem:[%s1793_s18 + $0x68] sm:$0xff] %v3159_v55  ;;  %v1144_v43 = vmax.f32 %v1079_v25, %v2845_v11  ;;  %v1018_v49 = vmax.f32 %v954_v57, %v2845_v11  ;;  %v1020_v3 = vmax.f32 %v956_v16, %v2888_v52  ;;  %v964_v26 = vmax.f32 %v2911_v56, %v2923_v39  ;;  %v1128_v25 = vld [vmem:[#allocation3 + $0x138] sm:$0xff] }
 0x113   : > { %v1081_v44 = vmax.f32 %v1016_v2, %v2845_v11  ;;  %v1022_v62 = vmax.f32 %v958_v51, %v2907_v60  ;;  %v1024_v38 = vmax.f32 %v960_v19, %v2911_v56  ;;  %v1026_v7 = vmax.f32 %v962_v40, %v2923_v39  ;;  %1200 = vst [vmem:[#allocation2 + $0x18] sm:$0xff] (!%p1350_p2), %v3134_v53 }
 0x114   : > { %1176 = vst [vmem:[%s1793_s18 + $0x78] sm:$0xff] %v1144_v43  ;;  %v1083_v29 = vmax.f32 %v1018_v49, %v2888_v52  ;;  %v1085_v5 = vmax.f32 %v1020_v3, %v2907_v60  ;;  %v1028_v58 = vmax.f32 %v964_v26, %v2953_v50  ;;  %v965_v18 = vmax.f32 %v900_v9, %v2937_v37 }
 0x115   : > { %v1146_v14 = vmax.f32 %v1081_v44, %v2888_v52  ;;  %v1087_v11 = vmax.f32 %v1022_v62, %v2911_v56  ;;  %v1089_v61 = vmax.f32 %v1024_v38, %v2923_v39  ;;  %v1091_v34 = vmax.f32 %v1026_v7, %v2953_v50  ;;  %1202 = vst [vmem:[#allocation2 + $0x28] sm:$0xff] (!%p1350_p2), %v3137_v41 }
 0x116   : > { %v1148_v1 = vmax.f32 %v1083_v29, %v2907_v60  ;;  %v1150_v45 = vmax.f32 %v1085_v5, %v2911_v56  ;;  %v1093_v6 = vmax.f32 %v1028_v58, %v2984_v22  ;;  %v1029_v37 = vmax.f32 %v965_v18, %v2970_v15  ;;  %1204 = vst [vmem:[#allocation2 + $0x38] sm:$0xff] (!%p1350_p2), %v3144_v63 }
 0x117   : > { %1178 = vst [vmem:[%s1793_s18 + $0x88] sm:$0xff] %v1146_v14  ;;  %v1152_v52 = vmax.f32 %v1087_v11, %v2923_v39  ;;  %v1154_v20 = vmax.f32 %v1089_v61, %v2953_v50  ;;  %v1156_v12 = vmax.f32 %v1091_v34, %v2984_v22  ;;  %v966_v60 = vmax.f32 %v2923_v39, %v2953_v50 }
 0x118   : > { %1180 = vst [vmem:[%s1793_s18 + $0x98] sm:$0xff] %v1148_v1  ;;  %1182 = vst [vmem:[%s1793_s18 + $0xa8] sm:$0xff] %v1150_v45  ;;  %v1158_v56 = vmax.f32 %v1093_v6, %v1126_v4  ;;  %v1094_v15 = vmax.f32 %v1029_v37, %v3120_v17 }
 0x119   : > { %1184 = vst [vmem:[%s1793_s18 + $0xb8] sm:$0xff] %v1152_v52  ;;  %1186 = vst [vmem:[%s1793_s18 + $0xc8] sm:$0xff] %v1154_v20  ;;  %v1030_v31 = vmax.f32 %v966_v60, %v2984_v22  ;;  %1196 = sbr.rel (%p1350_p2) target bundleno = 296 (0x128), region = 40 }
 0x11a   : > { %1188 = vst [vmem:[%s1793_s18 + $0xd8] sm:$0xff] %v1156_v12  ;;  %1190 = vst [vmem:[%s1793_s18 + $0xe8] sm:$0xff] %v1158_v56  ;;  %v1159_v54 = vmax.f32 %v1094_v15, %v1127_v42 }
 0x11b   : > { %v1095_v57 = vmax.f32 %v1030_v31, %v1126_v4  ;;  %1206 = vst [vmem:[#allocation2 + $0x48] sm:$0xff] (!%p1350_p2), %v3147_v47  ;;  %1207 = vst [vmem:[#allocation2 + $0x50] sm:$0xff] (!%p1350_p2), %v3036_v8 }
 0x11c   : > { %1191 = vst [vmem:[%s1793_s18 + $0xf0] sm:$0xff] %v1159_v54  ;;  %1208 = vst [vmem:[#allocation2 + $0x58] sm:$0xff] (!%p1350_p2), %v3150_v10 }
 0x11d   : > { %v1160_v16 = vmax.f32 %v1095_v57, %v1128_v25  ;;  %1209 = vst [vmem:[#allocation2 + $0x60] sm:$0xff] (!%p1350_p2), %v3054_v0  ;;  %1210 = vst [vmem:[#allocation2 + $0x68] sm:$0xff] (!%p1350_p2), %v3159_v55 }
 0x11e   : > { %1211 = vst [vmem:[#allocation2 + $0x70] sm:$0xff] (!%p1350_p2), %v3060_v23  ;;  %1212 = vst [vmem:[#allocation2 + $0x78] sm:$0xff] (!%p1350_p2), %v1144_v43 }
 0x11f   : > { %1192 = vst [vmem:[%s1793_s18 + $0xf8] sm:$0xff] %v1160_v16  ;;  %1213 = vst [vmem:[#allocation2 + $0x80] sm:$0xff] (!%p1350_p2), %v3063_v21 }
 0x120   : > { %1214 = vst [vmem:[#allocation2 + $0x88] sm:$0xff] %v1146_v14  ;;  %1215 = vst [vmem:[#allocation2 + $0x90] sm:$0xff] %v3070_v35 }
 0x121   : > { %1216 = vst [vmem:[#allocation2 + $0x98] sm:$0xff] %v1148_v1  ;;  %1217 = vst [vmem:[#allocation2 + $0xa0] sm:$0xff] %v3073_v30 }
 0x122   : > { %1218 = vst [vmem:[#allocation2 + $0xa8] sm:$0xff] %v1150_v45  ;;  %1219 = vst [vmem:[#allocation2 + $0xb0] sm:$0xff] %v3076_v27 }
 0x123   : > { %1220 = vst [vmem:[#allocation2 + $0xb8] sm:$0xff] %v1152_v52  ;;  %1221 = vst [vmem:[#allocation2 + $0xc0] sm:$0xff] %v3085_v24 }
 0x124   : > { %1222 = vst [vmem:[#allocation2 + $0xc8] sm:$0xff] %v1154_v20  ;;  %1223 = vst [vmem:[#allocation2 + $0xd0] sm:$0xff] %v3108_v33 }
 0x125   : > { %1224 = vst [vmem:[#allocation2 + $0xd8] sm:$0xff] %v1156_v12  ;;  %1225 = vst [vmem:[#allocation2 + $0xe0] sm:$0xff] %v3128_v36 }
 0x126   : > { %1226 = vst [vmem:[#allocation2 + $0xe8] sm:$0xff] %v1158_v56  ;;  %1227 = vst [vmem:[#allocation2 + $0xf0] sm:$0xff] %v1159_v54 }
 0x127   : > { %1228 = vst [vmem:[#allocation2 + $0xf8] sm:$0xff] %v1160_v16 }
 0x128 PF: > { %s1237_s25 = ssub.s32 3, %s1601_s12  ;;  %s1352_s28 = sshll.u32 %s1605_s13, 7 }
 0x129   : > { %s1246_s9 = sshll.u32 %s1793_s18, 4  ;;  %s1243_s23 = sadd.s32 %s1352_s28, %s1237_s25  ;;  %s3245_s9 = int_to_ptr.vmem [resolvable:$true] %s1246_s9 }
 0x12a   : > { %s1353_s29 = sshll.u32 %s1243_s23, 7  ;;  %s3254_s5 = scalar_lea.sflag [#allocation6], %s160_s27 }
 0x12b   : > { %s3250_s24 = scalar_lea.hbm %s3316_s1, %s1353_s29  ;;  %s1495_s17 = scalar_lea.vmem %s3245_s9, 4096 }
 0x12c   : > { %p1496_p4 = scmp.ne.s32.totalorder %s3245_s9, %s1495_s17  ;;  %p3526_p13 = scmp.ne.s32.totalorder %s3421_s3, 0 }
 0x12d   : > { %s1623_s12 = smov [#allocation7]  }
 0x12e   : > { %p1497_p1 = pnand %p1496_p4, %p3526_p13  ;;  %s1499_s13 = sshll.u32 %s1623_s12, 4  ;;  %s1500_s13 = int_to_ptr.vmem [resolvable:$false] %s1499_s13 }
 0x12f   : > { %s1501_s26 = scalar_lea.vmem %s1500_s13, 8192  ;;  %p1502_p9 = scmp.lt.s32.totalorder %s3245_s9, %s1500_s13 }
 0x130   : > { %p1498_p6 = pneg %p1497_p1  ;;  %p1503_p3 = scmp.lt.s32.totalorder %s1501_s26, %s1495_s17 }
 0x132   : > { %p1504_p11 = por %p1503_p3, %p1502_p9 }
 0x134   : > { %p1505_p12 = pnand %p1504_p11, %p1498_p6 }
 0x136   : > { %1508 = shalt.err (!%p1505_p12)
}
 0x137   : > { %s1509_s27 = scalar_lea.hbm %s3250_s24, 4096  ;;  %s1513_s28 = scalar_lea.hbm %s3316_s1, 32768 }
 0x138   : > { %p1510_p5 = scmp.ne.s32.totalorder %s3250_s24, %s1509_s27  ;;  %p1514_p0 = scmp.lt.u32.totalorder %s3250_s24, %s3316_s1 }
 0x139   : > { %p1515_p7 = scmp.lt.u32.totalorder %s1513_s28, %s1509_s27  ;;  %p1517_p4 = scmp.lt.u32.totalorder %s1509_s27, %s3250_s24 }
 0x13a   : > { %p1511_p8 = pnand %p1510_p5, %p3526_p13 }
 0x13b   : > { %p1516_p2 = por %p1515_p7, %p1514_p0 }
 0x13c   : > { %p1512_p10 = pneg %p1511_p8 }
 0x13d   : > { %p1518_p1 = por %p1517_p4, %p1516_p2 }
 0x13f   : > { %p1519_p6 = pnand %p1518_p1, %p1512_p10 }
 0x141   : > { %1522 = shalt.err (!%p1519_p6)
}
 0x142   : > { %s1624_s22 = smov 128   ;;  %s1625_s21 = smov 512  }
 0x143   : > { %s1626_s17 = smov 8  }
 0x144   : > { %1359 = dma.vmem_to_hbm [thread:$0]  (%p3526_p13), %s3245_s9, 4096, %s3250_s24, %s3254_s5, %s1624_s22, %s1625_s21, %s1626_s17  }
 0x145 PF: > { %p1370_p9 = scmp.ge.s32.totalorder %s1617_s16, 2  ;;  %s1261_s12 = sand.u32 1, %s1577_s6  }
 0x146   : > { %p3527_p3 = scmp.ne.s32.totalorder %s3422_s4, 0  ;;  %s1262_s13 = scalar_lea.sflag [#allocation6], %s1261_s12 }
 0x148   : > { %p1366_p11 = pnand %p1370_p9, %p3527_p3 }
 0x14a   : > { %1572 = dma.done.wait (!%p1366_p11), %s1262_s13, 4096  }
 0x14b   : > { %1574 = vsyncadd (!%p1366_p11), %s1262_s13, 4294963200  ;;  %s17_s16 = sadd.s32 1, %s1617_s16   ;;  %s3528_s6 = smov %s1581_s7 }
 0x14c   : > { %p14_p12 = scmp.ge.s32.totalorder %s17_s16, 10   ;;  %s3529_s7 = smov %s1585_s8 }
 0x14d   : > { %s3530_s8 = smov %s1723_s2  ;;  %s3531_s9 = smov %s1593_s10 }
 0x14e   : > { %s3532_s10 = smov %s1597_s11  ;;  %s3533_s11 = smov %s1720_s30 }
 0x14f   : > { %s3534_s12 = smov %s1609_s14  ;;  %s3535_s13 = smov %s1613_s15 }
 0x150   : > { %s3536_s14 = smov %s3539_s19  ;;  %s3537_s15 = smov %s3543_s20 }
 0x151   :  { %16 = sbr.rel (!%p14_p12) target bundleno = 9 (0x9), region = 86 }
 0x158   :  { %1267 = vsyncpa [#allocation5], 1 }
 0x159   :  { %1269 = vsyncpa [#allocation5 + $0x1], 1 }
 0x15a   :  { %1270 = vsyncpa [#allocation6], 1 }
 0x15b   :  { %1272 = vsyncpa [#allocation6 + $0x1], 1 }

// kernel: tpu_custom_call.1
= control target key start
LH: loop header
LB: loop body
LE: loop exit
PB: predicated region body
PF: predicated region fallthrough
CT: control target
= control target key end

     0   :  { %6 = vsyncpa [#allocation5], 0  ;;  %s2268_s0 = inlined_call_operand.hbm [shape: f32[2,16,16,128], index: 0, kind: input, shape index: {}]   ;;  %s2269_s1 = inlined_call_operand.hbm [shape: f32[2,16,16,512], index: 1, kind: output, shape index: {}]  }
   0x1   :  { %8 = vsyncpa [#allocation5 + $0x1], 0 }
   0x2   :  { %9 = vsyncpa [#allocation6], 0 }
   0x3   :  { %11 = vsyncpa [#allocation6 + $0x1], 0  ;;  %s1474_s6 = smov 0   ;;  %s1476_s7 = smov 0  }
   0x4   :  { %s1478_s8 = smov 0   ;;  %s1480_s9 = smov 0  }
   0x5   :  { %s1482_s10 = smov 0   ;;  %s1484_s11 = smov 0  }
   0x6   :  { %s1486_s12 = smov 0   ;;  %s1488_s13 = smov 0  }
   0x7   :  { %s1490_s14 = smov 0   ;;  %s1492_s15 = smov 0  }
   0x8   :  { %s1494_s16 = smov 0  }
   0x9 LB: > { %s1175_s17 = sadd.s32 4294967295, %s1454_s16   ;;  %s1176_s18 = sadd.s32 4294967294, %s1454_s16   ;;  %s1454_s16 = sphi %s1494_s16, %s17_s16   ;;  %s1450_s15 = sphi %s1492_s15, %s2288_s15   ;;  %s1446_s14 = sphi %s1490_s14, %s2287_s14   ;;  %s1442_s13 = sphi %s1488_s13, %s2286_s13   ;;  %s1438_s12 = sphi %s1486_s12, %s2285_s12   ;;  %s1434_s11 = sphi %s1484_s11, %s2284_s11   ;;  %s1430_s10 = sphi %s1482_s10, %s2283_s10   ;;  %s1426_s9 = sphi %s1480_s9, %s2282_s9   ;;  %s1422_s8 = sphi %s1478_s8, %s2281_s8   ;;  %s1418_s7 = sphi %s1476_s7, %s2280_s7   ;;  %s1414_s6 = sphi %s1474_s6, %s2279_s6  }
   0xa   : > { %s29_s19 = sadd.s32 1, %s1446_s14  ;;  %s36_s20 = sadd.s32 1, %s1450_s15 }
   0xb   : > { %p30_p0 = scmp.ge.s32.totalorder %s29_s19, 4  ;;  %s45_s21 = sadd.s32 1, %s1434_s11 }
   0xc   : > { %p52_p1 = scmp.ne.s32.totalorder %s1434_s11, %s1430_s10  ;;  %p53_p2 = scmp.eq.s32.totalorder %s1454_s16, 0 }
   0xd   : > { %s2290_s19 = smov (%p30_p0, %s29_s19), 0  ;;  %s2292_s20 = smov (!%p30_p0, %s36_s20), %s1450_s15 }
   0xe   : > { %p1538_p3 = por %p53_p2, %p52_p1  ;;  %p58_p4 = scmp.ne.s32.totalorder %s1430_s10, %s1426_s9 }
   0xf   : > { %p38_p5 = scmp.ge.s32.totalorder %s2292_s20, 2  ;;  %p59_p6 = scmp.eq.s32.totalorder %s1175_s17, 0 }
  0x10   : > { %s68_s23 = ssub.s32 3, %s1446_s14  ;;  %s70_s24 = ssub.s32 3, %s2290_s19 }
  0x11   : > { %s2294_s20 = smov (%p38_p5, %s2292_s20), 0  ;;  %p1547_p7 = por %p59_p6, %p58_p4 }
  0x12   : > { %s73_s26 = ssub.s32 %s68_s23, %s70_s24  ;;  %s40_s27 = ssub.s32 %s1450_s15, %s2294_s20 }
  0x13   : > { %s77_s28 = sadd.s32 1, %s1422_s8  ;;  %p43_p8 = scmp.eq.s32.totalorder %s40_s27, 0 }
  0x14   : > { %s74_s29 = sor.u32 %s73_s26, %s40_s27  ;;  %p87_p10 = scmp.ne.s32.totalorder %s1422_s8, %s1418_s7 }
  0x15   : > { %p75_p9 = scmp.eq.s32.totalorder %s74_s29, 0  ;;  %p88_p11 = scmp.eq.s32.totalorder %s1175_s17, 7 }
  0x16   : > { %s1557_s30 = scalar_select %p43_p8, %s1434_s11, %s45_s21  }
  0x17   : > { %s1560_s2 = scalar_select %p75_p9, %s1422_s8, %s77_s28  }
  0x18   : > { %p93_p12 = scmp.ne.s32.totalorder %s1418_s7, %s1414_s6  ;;  %p94_p13 = scmp.eq.s32.totalorder %s1176_s18, 7 }
  0x19   : > { %p1564_p0 = por %p88_p11, %p87_p10  ;;  %p1206_p1 = scmp.lt.s32.totalorder %s1454_s16, 8 }
  0x1a   : > { %p1569_p2 = por %p94_p13, %p93_p12  ;;  %s114_s5 = sand.u32 1, %s1434_s11  }
  0x1b   : > { %s2273_s3 = scalar_select %p1564_p0, 1, 0 }
  0x1c   : > { %s2274_s4 = scalar_select %p1569_p2, 1, 0 }
  0x1d   : > { %s1179_s9 = sshll.u32 %s114_s5, 8  ;;  %s1193_s23 = sshll.u32 %s1450_s15, 12 }
  0x1e   : > { %s1578_s26 = scalar_lea.hbm %s2268_s0, %s1193_s23  ;;  %s118_s17 = scalar_lea.vmem [#allocation4], %s1179_s9 }
  0x1f   : > { %s126_s18 = sshll.u32 %s118_s17, 4  ;;  %p1584_p4 = pnand %p1206_p1, %p1538_p3  ;;  %s1580_s18 = int_to_ptr.vmem [resolvable:$true] %s126_s18 }
  0x20   : > { %s1589_s28 = scalar_lea.sflag [#allocation5], %s114_s5  ;;  %s1302_s29 = scalar_lea.hbm %s1578_s26, 4096 }
  0x21   : > { %p1303_p6 = scmp.ne.s32.totalorder %s1578_s26, %s1302_s29  ;;  %p1304_p8 = pneg %p1584_p4 }
  0x22   : > { %s1307_s22 = scalar_lea.hbm %s2268_s0, 8192  ;;  %p1308_p3 = scmp.lt.u32.totalorder %s1578_s26, %s2268_s0 }
  0x23   : > { %p1305_p9 = pnand %p1304_p8, %p1303_p6  ;;  %p1309_p11 = scmp.lt.u32.totalorder %s1307_s22, %s1302_s29 }
  0x24   : > { %p1311_p13 = scmp.lt.u32.totalorder %s1302_s29, %s1578_s26 }
  0x25   : > { %p1306_p10 = pneg %p1305_p9  ;;  %p1310_p12 = por %p1309_p11, %p1308_p3 }
  0x27   : > { %p1312_p1 = por %p1311_p13, %p1310_p12 }
  0x29   : > { %p1313_p5 = pnand %p1312_p1, %p1306_p10 }
  0x2b   : > { %1316 = shalt.err (!%p1313_p5)
}
  0x2c   : > { %s1317_s5 = scalar_lea.vmem %s1580_s18, 4096  ;;  %s1456_s17 = smov [#allocation4]  }
  0x2d   : > { %p1318_p6 = scmp.ne.s32.totalorder %s1580_s18, %s1317_s5  ;;  %s1322_s9 = sshll.u32 %s1456_s17, 4  ;;  %s1323_s9 = int_to_ptr.vmem [resolvable:$false] %s1322_s9 }
  0x2e   : > { %s1324_s23 = scalar_lea.vmem %s1323_s9, 8192  ;;  %p1325_p0 = scmp.lt.s32.totalorder %s1580_s18, %s1323_s9 }
  0x2f   : > { %p1320_p9 = pnand %p1318_p6, %p1304_p8  ;;  %p1326_p3 = scmp.lt.s32.totalorder %s1324_s23, %s1317_s5 }
  0x31   : > { %p1321_p2 = pneg %p1320_p9  ;;  %p1327_p11 = por %p1326_p3, %p1325_p0 }
  0x33   : > { %p1328_p12 = pnand %p1327_p11, %p1321_p2 }
  0x35   : > { %1331 = shalt.err (!%p1328_p12)
}
  0x36   : > { %s1457_s29 = smov 128   ;;  %s1458_s22 = smov 8  }
  0x37   : > { %1201 = dma.hbm_to_vmem [thread:$0]  (!%p1584_p4), %s1578_s26, 4096, %s1580_s18, %s1589_s28, %s1457_s29, %s1457_s29, %s1458_s22  }
  0x38   : > { %p134_p5 = scmp.lt.s32.totalorder %s1454_s16, 9  ;;  %p2276_p8 = scmp.ge.s32.totalorder %s1454_s16, 1 }
  0x3a   : > { %p135_p10 = pnand %p2276_p8, %p134_p5 }
  0x3b   : > { %s140_s21 = sand.u32 (!%p135_p10), 1, %s1430_s10  }
  0x3c   : > { %138 = sbr.rel (%p135_p10) target bundleno = 254 (0xfe), region = 24  ;;  %s1183_s24 = sshll.u32 (!%p135_p10), %s140_s21, 8 }
  0x3d   : > { %s141_s5 = scalar_lea.sflag (!%p135_p10), [#allocation5], %s140_s21  ;;  %s1621_s17 = scalar_lea.vmem (!%p135_p10), [#allocation4], %s1183_s24 }
  0x43   : > { %1405 = dma.done.wait (%p1547_p7), %s141_s5, 4096  }
  0x44   : > { %1407 = vsyncadd (%p1547_p7), %s141_s5, 4294963200  ;;  %s160_s27 = sand.u32 1, %s1418_s7   ;;  %p1185_p0 = scmp.ne.s32.totalorder %s1438_s12, 0 }
  0x45   : > { %s1184_s26 = sshll.u32 %s160_s27, 8  ;;  %v222_v0 = vld [vmem:[%s1621_s17] sm:$0xff] (!%p1185_p0)  ;;  %v223_v1 = vld [vmem:[%s1621_s17 + $0x8] sm:$0xff] (!%p1185_p0)  ;;  %v224_v2 = vld [vmem:[%s1621_s17 + $0x10] sm:$0xff] (!%p1185_p0)  ;;  %v1459_v3 = vmov (!%p1185_p0), -inf  }
  0x46   : > { %s1630_s18 = scalar_lea.vmem [#allocation7], %s1184_s26  ;;  %168 = sbr.rel (%p1185_p0) target bundleno = 124 (0x7c), region = 32  ;;  %169 = vst [vmem:[#allocation3] sm:$0xff] (!%p1185_p0), %v1459_v3  ;;  %170 = vst [vmem:[#allocation3 + $0x8] sm:$0xff] (!%p1185_p0), %v1459_v3  ;;  %v225_v4 = vld [vmem:[%s1621_s17 + $0x18] sm:$0xff] (!%p1185_p0)  ;;  %v226_v5 = vld [vmem:[%s1621_s17 + $0x20] sm:$0xff] (!%p1185_p0) }
  0x47   : > { %171 = vst [vmem:[#allocation3 + $0x10] sm:$0xf] (!%p1185_p0), %v1459_v3  ;;  %172 = vst [vmem:[#allocation3 + $0x18] sm:$0xff] (!%p1185_p0), %v1459_v3  ;;  %v227_v6 = vld [vmem:[%s1621_s17 + $0x28] sm:$0xff] (!%p1185_p0)  ;;  %v228_v7 = vld [vmem:[%s1621_s17 + $0x30] sm:$0xff] (!%p1185_p0) }
  0x48   : > { %173 = vst [vmem:[#allocation3 + $0x20] sm:$0xff] (!%p1185_p0), %v1459_v3  ;;  %174 = vst [vmem:[#allocation3 + $0x28] sm:$0xf] (!%p1185_p0), %v1459_v3  ;;  %v229_v8 = vld [vmem:[%s1621_s17 + $0x38] sm:$0xff] (!%p1185_p0)  ;;  %v230_v9 = vld [vmem:[%s1621_s17 + $0x40] sm:$0xff] (!%p1185_p0) }
  0x49   : > { %176 = vst [vmem:[#allocation3 + $0x1b0] sm:$0xff] (!%p1185_p0), %v1459_v3  ;;  %177 = vst [vmem:[#allocation3 + $0x1b8] sm:$0xff] (!%p1185_p0), %v1459_v3  ;;  %v231_v10 = vld [vmem:[%s1621_s17 + $0x48] sm:$0xff] (!%p1185_p0)  ;;  %v232_v11 = vld [vmem:[%s1621_s17 + $0x50] sm:$0xff] (!%p1185_p0) }
  0x4a   : > { %178 = vst [vmem:[#allocation3 + $0x1c0] sm:$0xf] (!%p1185_p0), %v1459_v3  ;;  %179 = vst [vmem:[#allocation3 + $0x1c8] sm:$0xff] (!%p1185_p0), %v1459_v3  ;;  %v233_v12 = vld [vmem:[%s1621_s17 + $0x58] sm:$0xff] (!%p1185_p0)  ;;  %v234_v13 = vld [vmem:[%s1621_s17 + $0x60] sm:$0xff] (!%p1185_p0) }
  0x4b   : > { %180 = vst [vmem:[#allocation3 + $0x1d0] sm:$0xff] (!%p1185_p0), %v1459_v3  ;;  %181 = vst [vmem:[#allocation3 + $0x1d8] sm:$0xf] (!%p1185_p0), %v1459_v3  ;;  %v235_v14 = vld [vmem:[%s1621_s17 + $0x68] sm:$0xff] (!%p1185_p0)  ;;  %v236_v15 = vld [vmem:[%s1621_s17 + $0x70] sm:$0xff] (!%p1185_p0) }
  0x4c   : > { %184 = vst [vmem:[#allocation3 + $0x30] sm:$0x3] (!%p1185_p0), %v1459_v3  ;;  %185 = vst [vmem:[#allocation3 + $0x48] sm:$0x3] (!%p1185_p0), %v1459_v3  ;;  %v237_v16 = vld [vmem:[%s1621_s17 + $0x78] sm:$0xff] (!%p1185_p0)  ;;  %v238_v17 = vld [vmem:[%s1621_s17 + $0x80] sm:$0xff] (!%p1185_p0) }
  0x4d   : > { %186 = vst [vmem:[#allocation3 + $0x60] sm:$0x3] %v1459_v3  ;;  %187 = vst [vmem:[#allocation3 + $0x78] sm:$0x3] %v1459_v3  ;;  %v239_v18 = vld [vmem:[%s1621_s17 + $0x88] sm:$0xff]  ;;  %v240_v19 = vld [vmem:[%s1621_s17 + $0x90] sm:$0xff] }
  0x4e   : > { %188 = vst [vmem:[#allocation3 + $0x90] sm:$0x3] %v1459_v3  ;;  %189 = vst [vmem:[#allocation3 + $0xa8] sm:$0x3] %v1459_v3  ;;  %v241_v20 = vld [vmem:[%s1621_s17 + $0x98] sm:$0xff]  ;;  %v242_v21 = vld [vmem:[%s1621_s17 + $0xa0] sm:$0xff] }
  0x4f   : > { %190 = vst [vmem:[#allocation3 + $0xc0] sm:$0x3] %v1459_v3  ;;  %191 = vst [vmem:[#allocation3 + $0xd8] sm:$0x3] %v1459_v3  ;;  %v243_v22 = vld [vmem:[%s1621_s17 + $0xa8] sm:$0xff]  ;;  %v244_v23 = vld [vmem:[%s1621_s17 + $0xb0] sm:$0xff] }
  0x50   : > { %192 = vst [vmem:[#allocation3 + $0xf0] sm:$0x3] %v1459_v3  ;;  %193 = vst [vmem:[#allocation3 + $0x108] sm:$0x3] %v1459_v3  ;;  %v245_v24 = vld [vmem:[%s1621_s17 + $0xb8] sm:$0xff]  ;;  %v246_v25 = vld [vmem:[%s1621_s17 + $0xc0] sm:$0xff] }
  0x51   : > { %194 = vst [vmem:[#allocation3 + $0x120] sm:$0x3] %v1459_v3  ;;  %195 = vst [vmem:[#allocation3 + $0x138] sm:$0x3] %v1459_v3  ;;  %v247_v26 = vld [vmem:[%s1621_s17 + $0xc8] sm:$0xff]  ;;  %v248_v27 = vld [vmem:[%s1621_s17 + $0xd0] sm:$0xff] }
  0x52   : > { %196 = vst [vmem:[#allocation3 + $0x150] sm:$0x3] %v1459_v3  ;;  %197 = vst [vmem:[#allocation3 + $0x168] sm:$0x3] %v1459_v3  ;;  %v249_v28 = vld [vmem:[%s1621_s17 + $0xd8] sm:$0xff]  ;;  %v250_v29 = vld [vmem:[%s1621_s17 + $0xe0] sm:$0xff] }
  0x53   : > { %198 = vst [vmem:[#allocation3 + $0x180] sm:$0x3] %v1459_v3  ;;  %199 = vst [vmem:[#allocation3 + $0x198] sm:$0x3] %v1459_v3  ;;  %v251_v30 = vld [vmem:[%s1621_s17 + $0xe8] sm:$0xff]  ;;  %v252_v31 = vld [vmem:[%s1621_s17 + $0xf0] sm:$0xff] }
  0x54   : > { %204 = vst [vmem:[#allocation3 + $0x42] sm:$0x3] %v1459_v3  ;;  %205 = vst [vmem:[#allocation3 + $0x5a] sm:$0x3] %v1459_v3  ;;  %v253_v32 = vld [vmem:[%s1621_s17 + $0xf8] sm:$0xff] }
  0x55   : > { %206 = vst [vmem:[#allocation3 + $0x72] sm:$0x3] %v1459_v3  ;;  %207 = vst [vmem:[#allocation3 + $0x8a] sm:$0x3] %v1459_v3 }
  0x56   : > { %208 = vst [vmem:[#allocation3 + $0xa2] sm:$0x3] %v1459_v3  ;;  %209 = vst [vmem:[#allocation3 + $0xba] sm:$0x3] %v1459_v3 }
  0x57   : > { %210 = vst [vmem:[#allocation3 + $0xd2] sm:$0x3] %v1459_v3  ;;  %211 = vst [vmem:[#allocation3 + $0xea] sm:$0x3] %v1459_v3 }
  0x58   : > { %212 = vst [vmem:[#allocation3 + $0x102] sm:$0x3] %v1459_v3  ;;  %213 = vst [vmem:[#allocation3 + $0x11a] sm:$0x3] %v1459_v3 }
  0x59   : > { %214 = vst [vmem:[#allocation3 + $0x132] sm:$0x3] %v1459_v3  ;;  %215 = vst [vmem:[#allocation3 + $0x14a] sm:$0x3] %v1459_v3 }
  0x5a   : > { %216 = vst [vmem:[#allocation3 + $0x162] sm:$0x3] %v1459_v3  ;;  %217 = vst [vmem:[#allocation3 + $0x17a] sm:$0x3] %v1459_v3 }
  0x5b   : > { %218 = vst [vmem:[#allocation3 + $0x192] sm:$0x3] %v1459_v3  ;;  %219 = vst [vmem:[#allocation3 + $0x1aa] sm:$0x3] %v1459_v3 }
  0x5c   : > { %254 = vst [vmem:[#allocation2] sm:$0xff] %v222_v0  ;;  %286 = vst [vmem:[%s1630_s18] sm:$0xff] %v222_v0 }
  0x5d   : > { %255 = vst [vmem:[#allocation2 + $0x8] sm:$0xff] %v223_v1  ;;  %287 = vst [vmem:[%s1630_s18 + $0x8] sm:$0xff] %v223_v1 }
  0x5e   : > { %256 = vst [vmem:[#allocation2 + $0x10] sm:$0xff] %v224_v2  ;;  %288 = vst [vmem:[%s1630_s18 + $0x10] sm:$0xff] %v224_v2 }
  0x5f   : > { %257 = vst [vmem:[#allocation2 + $0x18] sm:$0xff] %v225_v4  ;;  %289 = vst [vmem:[%s1630_s18 + $0x18] sm:$0xff] %v225_v4 }
  0x60   : > { %258 = vst [vmem:[#allocation2 + $0x20] sm:$0xff] %v226_v5  ;;  %290 = vst [vmem:[%s1630_s18 + $0x20] sm:$0xff] %v226_v5 }
  0x61   : > { %259 = vst [vmem:[#allocation2 + $0x28] sm:$0xff] %v227_v6  ;;  %291 = vst [vmem:[%s1630_s18 + $0x28] sm:$0xff] %v227_v6 }
  0x62   : > { %260 = vst [vmem:[#allocation2 + $0x30] sm:$0xff] %v228_v7  ;;  %292 = vst [vmem:[%s1630_s18 + $0x30] sm:$0xff] %v228_v7 }
  0x63   : > { %261 = vst [vmem:[#allocation2 + $0x38] sm:$0xff] %v229_v8  ;;  %293 = vst [vmem:[%s1630_s18 + $0x38] sm:$0xff] %v229_v8 }
  0x64   : > { %262 = vst [vmem:[#allocation2 + $0x40] sm:$0xff] %v230_v9  ;;  %294 = vst [vmem:[%s1630_s18 + $0x40] sm:$0xff] %v230_v9 }
  0x65   : > { %263 = vst [vmem:[#allocation2 + $0x48] sm:$0xff] %v231_v10  ;;  %295 = vst [vmem:[%s1630_s18 + $0x48] sm:$0xff] %v231_v10 }
  0x66   : > { %264 = vst [vmem:[#allocation2 + $0x50] sm:$0xff] %v232_v11  ;;  %296 = vst [vmem:[%s1630_s18 + $0x50] sm:$0xff] %v232_v11 }
  0x67   : > { %265 = vst [vmem:[#allocation2 + $0x58] sm:$0xff] %v233_v12  ;;  %297 = vst [vmem:[%s1630_s18 + $0x58] sm:$0xff] %v233_v12 }
  0x68   : > { %266 = vst [vmem:[#allocation2 + $0x60] sm:$0xff] %v234_v13  ;;  %298 = vst [vmem:[%s1630_s18 + $0x60] sm:$0xff] %v234_v13 }
  0x69   : > { %267 = vst [vmem:[#allocation2 + $0x68] sm:$0xff] %v235_v14  ;;  %299 = vst [vmem:[%s1630_s18 + $0x68] sm:$0xff] %v235_v14 }
  0x6a   : > { %268 = vst [vmem:[#allocation2 + $0x70] sm:$0xff] %v236_v15  ;;  %300 = vst [vmem:[%s1630_s18 + $0x70] sm:$0xff] %v236_v15 }
  0x6b   : > { %269 = vst [vmem:[#allocation2 + $0x78] sm:$0xff] %v237_v16  ;;  %301 = vst [vmem:[%s1630_s18 + $0x78] sm:$0xff] %v237_v16 }
  0x6c   : > { %270 = vst [vmem:[#allocation2 + $0x80] sm:$0xff] %v238_v17  ;;  %302 = vst [vmem:[%s1630_s18 + $0x80] sm:$0xff] %v238_v17 }
  0x6d   : > { %271 = vst [vmem:[#allocation2 + $0x88] sm:$0xff] %v239_v18  ;;  %303 = vst [vmem:[%s1630_s18 + $0x88] sm:$0xff] %v239_v18 }
  0x6e   : > { %272 = vst [vmem:[#allocation2 + $0x90] sm:$0xff] %v240_v19  ;;  %304 = vst [vmem:[%s1630_s18 + $0x90] sm:$0xff] %v240_v19 }
  0x6f   : > { %273 = vst [vmem:[#allocation2 + $0x98] sm:$0xff] %v241_v20  ;;  %305 = vst [vmem:[%s1630_s18 + $0x98] sm:$0xff] %v241_v20 }
  0x70   : > { %274 = vst [vmem:[#allocation2 + $0xa0] sm:$0xff] %v242_v21  ;;  %306 = vst [vmem:[%s1630_s18 + $0xa0] sm:$0xff] %v242_v21 }
  0x71   : > { %275 = vst [vmem:[#allocation2 + $0xa8] sm:$0xff] %v243_v22  ;;  %307 = vst [vmem:[%s1630_s18 + $0xa8] sm:$0xff] %v243_v22 }
  0x72   : > { %276 = vst [vmem:[#allocation2 + $0xb0] sm:$0xff] %v244_v23  ;;  %308 = vst [vmem:[%s1630_s18 + $0xb0] sm:$0xff] %v244_v23 }
  0x73   : > { %277 = vst [vmem:[#allocation2 + $0xb8] sm:$0xff] %v245_v24  ;;  %309 = vst [vmem:[%s1630_s18 + $0xb8] sm:$0xff] %v245_v24 }
  0x74   : > { %278 = vst [vmem:[#allocation2 + $0xc0] sm:$0xff] %v246_v25  ;;  %310 = vst [vmem:[%s1630_s18 + $0xc0] sm:$0xff] %v246_v25 }
  0x75   : > { %279 = vst [vmem:[#allocation2 + $0xc8] sm:$0xff] %v247_v26  ;;  %311 = vst [vmem:[%s1630_s18 + $0xc8] sm:$0xff] %v247_v26 }
  0x76   : > { %280 = vst [vmem:[#allocation2 + $0xd0] sm:$0xff] %v248_v27  ;;  %312 = vst [vmem:[%s1630_s18 + $0xd0] sm:$0xff] %v248_v27 }
  0x77   : > { %281 = vst [vmem:[#allocation2 + $0xd8] sm:$0xff] %v249_v28  ;;  %313 = vst [vmem:[%s1630_s18 + $0xd8] sm:$0xff] %v249_v28 }
  0x78   : > { %282 = vst [vmem:[#allocation2 + $0xe0] sm:$0xff] %v250_v29  ;;  %314 = vst [vmem:[%s1630_s18 + $0xe0] sm:$0xff] %v250_v29 }
  0x79   : > { %283 = vst [vmem:[#allocation2 + $0xe8] sm:$0xff] %v251_v30  ;;  %315 = vst [vmem:[%s1630_s18 + $0xe8] sm:$0xff] %v251_v30 }
  0x7a   : > { %284 = vst [vmem:[#allocation2 + $0xf0] sm:$0xff] %v252_v31  ;;  %316 = vst [vmem:[%s1630_s18 + $0xf0] sm:$0xff] %v252_v31 }
  0x7b   : > { %285 = vst [vmem:[#allocation2 + $0xf8] sm:$0xff] %v253_v32  ;;  %317 = vst [vmem:[%s1630_s18 + $0xf8] sm:$0xff] %v253_v32 }
  0x7c PF: > { %p1186_p7 = scmp.le.s32.totalorder %s1438_s12, 0 }
  0x7d   : > { %v1698_v33 = vld [vmem:[#allocation2] sm:$0xff] (!%p1186_p7)  ;;  %v1700_v34 = vld [vmem:[#allocation2 + $0x8] sm:$0xff] (!%p1186_p7)  ;;  %v1702_v35 = vld [vmem:[#allocation2 + $0x10] sm:$0xff] (!%p1186_p7)  ;;  %p1187_p2 = scmp.ge.s32.totalorder (!%p1186_p7), %s1438_s12, 3 }
  0x7e   : > { %321 = sbr.rel (%p1186_p7) target bundleno = 225 (0xe1), region = 36  ;;  %355 = vst [vmem:[#allocation3 + $0x32] sm:$0xff] (!%p1186_p7), %v1698_v33  ;;  %356 = vst [vmem:[#allocation3 + $0x3a] sm:$0xff] (!%p1186_p7), %v1700_v34  ;;  %v1707_v36 = vld [vmem:[#allocation2 + $0x18] sm:$0xff] (!%p1186_p7)  ;;  %v1709_v37 = vld [vmem:[#allocation2 + $0x20] sm:$0xff] (!%p1186_p7) }
  0x7f   : > { %357 = vst [vmem:[#allocation3 + $0x4a] sm:$0xff] (!%p1186_p7), %v1702_v35  ;;  %v1711_v38 = vld [vmem:[#allocation2 + $0x28] sm:$0xff] (!%p1186_p7)  ;;  %358 = vst [vmem:[#allocation3 + $0x52] sm:$0xff] (!%p1186_p7), %v1707_v36  ;;  %v1716_v39 = vld [vmem:[#allocation2 + $0x30] sm:$0xff] (!%p1186_p7) }
  0x80   : > { %359 = vst [vmem:[#allocation3 + $0x62] sm:$0xff] (!%p1186_p7), %v1709_v37  ;;  %360 = vst [vmem:[#allocation3 + $0x6a] sm:$0xff] (!%p1186_p7), %v1711_v38  ;;  %v1718_v40 = vld [vmem:[#allocation2 + $0x38] sm:$0xff] (!%p1186_p7)  ;;  %v1720_v41 = vld [vmem:[#allocation2 + $0x40] sm:$0xff] (!%p1186_p7) }
  0x81   : > { %361 = vst [vmem:[#allocation3 + $0x7a] sm:$0xff] (!%p1186_p7), %v1716_v39  ;;  %362 = vst [vmem:[#allocation3 + $0x82] sm:$0xff] (!%p1186_p7), %v1718_v40  ;;  %v1725_v42 = vld [vmem:[#allocation2 + $0x48] sm:$0xff] (!%p1186_p7)  ;;  %v1727_v43 = vld [vmem:[#allocation2 + $0x50] sm:$0xff] (!%p1186_p7) }
  0x82   : > { %363 = vst [vmem:[#allocation3 + $0x92] sm:$0xff] (!%p1186_p7), %v1720_v41  ;;  %v1729_v44 = vld [vmem:[#allocation2 + $0x58] sm:$0xff] (!%p1186_p7)  ;;  %364 = vst [vmem:[#allocation3 + $0x9a] sm:$0xff] (!%p1186_p7), %v1725_v42  ;;  %v1734_v45 = vld [vmem:[#allocation2 + $0x60] sm:$0xff] (!%p1186_p7) }
  0x83   : > { %365 = vst [vmem:[#allocation3 + $0xaa] sm:$0xff] (!%p1186_p7), %v1727_v43  ;;  %366 = vst [vmem:[#allocation3 + $0xb2] sm:$0xff] (!%p1186_p7), %v1729_v44  ;;  %v1736_v46 = vld [vmem:[#allocation2 + $0x68] sm:$0xff] (!%p1186_p7)  ;;  %v1738_v47 = vld [vmem:[#allocation2 + $0x70] sm:$0xff] (!%p1186_p7) }
  0x84   : > { %367 = vst [vmem:[#allocation3 + $0xc2] sm:$0xff] (!%p1186_p7), %v1734_v45  ;;  %368 = vst [vmem:[#allocation3 + $0xca] sm:$0xff] (!%p1186_p7), %v1736_v46  ;;  %v1743_v48 = vld [vmem:[#allocation2 + $0x78] sm:$0xff] (!%p1186_p7)  ;;  %v1745_v49 = vld [vmem:[#allocation2 + $0x80] sm:$0xff] (!%p1186_p7) }
  0x85   : > { %369 = vst [vmem:[#allocation3 + $0xda] sm:$0xff] %v1738_v47  ;;  %v1747_v50 = vld [vmem:[#allocation2 + $0x88] sm:$0xff]  ;;  %370 = vst [vmem:[#allocation3 + $0xe2] sm:$0xff] %v1743_v48  ;;  %v1752_v51 = vld [vmem:[#allocation2 + $0x90] sm:$0xff] }
  0x86   : > { %371 = vst [vmem:[#allocation3 + $0xf2] sm:$0xff] %v1745_v49  ;;  %372 = vst [vmem:[#allocation3 + $0xfa] sm:$0xff] %v1747_v50  ;;  %v1754_v52 = vld [vmem:[#allocation2 + $0x98] sm:$0xff]  ;;  %v1756_v53 = vld [vmem:[#allocation2 + $0xa0] sm:$0xff] }
  0x87   : > { %373 = vst [vmem:[#allocation3 + $0x10a] sm:$0xff] %v1752_v51  ;;  %374 = vst [vmem:[#allocation3 + $0x112] sm:$0xff] %v1754_v52  ;;  %v1761_v54 = vld [vmem:[#allocation2 + $0xa8] sm:$0xff]  ;;  %v1763_v55 = vld [vmem:[#allocation2 + $0xb0] sm:$0xff] }
  0x88   : > { %375 = vst [vmem:[#allocation3 + $0x122] sm:$0xff] %v1756_v53  ;;  %v1765_v56 = vld [vmem:[#allocation2 + $0xb8] sm:$0xff]  ;;  %376 = vst [vmem:[#allocation3 + $0x12a] sm:$0xff] %v1761_v54  ;;  %v1770_v57 = vld [vmem:[#allocation2 + $0xc0] sm:$0xff] }
  0x89   : > { %377 = vst [vmem:[#allocation3 + $0x13a] sm:$0xff] %v1763_v55  ;;  %378 = vst [vmem:[#allocation3 + $0x142] sm:$0xff] %v1765_v56  ;;  %v1772_v58 = vld [vmem:[#allocation2 + $0xc8] sm:$0xff]  ;;  %v1774_v59 = vld [vmem:[#allocation2 + $0xd0] sm:$0xff] }
  0x8a   : > { %379 = vst [vmem:[#allocation3 + $0x152] sm:$0xff] %v1770_v57  ;;  %380 = vst [vmem:[#allocation3 + $0x15a] sm:$0xff] %v1772_v58  ;;  %v1779_v60 = vld [vmem:[#allocation2 + $0xd8] sm:$0xff]  ;;  %v1781_v61 = vld [vmem:[#allocation2 + $0xe0] sm:$0xff] }
  0x8b   : > { %381 = vst [vmem:[#allocation3 + $0x16a] sm:$0xff] %v1774_v59  ;;  %v1783_v62 = vld [vmem:[#allocation2 + $0xe8] sm:$0xff]  ;;  %382 = vst [vmem:[#allocation3 + $0x172] sm:$0xff] %v1779_v60  ;;  %v1788_v63 = vld [vmem:[#allocation2 + $0xf0] sm:$0xff] }
  0x8c   : > { %383 = vst [vmem:[#allocation3 + $0x182] sm:$0xff] %v1781_v61  ;;  %384 = vst [vmem:[#allocation3 + $0x18a] sm:$0xff] %v1783_v62  ;;  %v1790_v0 = vld [vmem:[#allocation2 + $0xf8] sm:$0xff]  ;;  %v387_v1 = vld [vmem:[#allocation3 + $0x30] sm:$0xff] }
  0x8d   : > { %385 = vst [vmem:[#allocation3 + $0x19a] sm:$0xff] %v1788_v63  ;;  %386 = vst [vmem:[#allocation3 + $0x1a2] sm:$0xff] %v1790_v0  ;;  %v388_v2 = vld [vmem:[#allocation3 + $0x38] sm:$0xff]  ;;  %v389_v7 = vld [vmem:[#allocation3 + $0x48] sm:$0xff] }
  0x8e   : > { %v419_v3 = vld [vmem:[#allocation3 + $0x31] sm:$0xff]  ;;  %v420_v4 = vld [vmem:[#allocation3 + $0x39] sm:$0xff]  ;;  %v421_v11 = vld [vmem:[#allocation3 + $0x49] sm:$0xff] }
  0x8f   : > { %v451_v5 = vmax.f32 %v387_v1, %v419_v3  ;;  %v452_v6 = vmax.f32 %v388_v2, %v420_v4  ;;  %v390_v8 = vld [vmem:[#allocation3 + $0x50] sm:$0xff]  ;;  %v548_v14 = vld [vmem:[#allocation3 + $0x3b] sm:$0xff]  ;;  %v453_v15 = vmax.f32 %v389_v7, %v421_v11  ;;  %v392_v20 = vld [vmem:[#allocation3 + $0x68] sm:$0xff] }
  0x90   : > { %v422_v12 = vld [vmem:[#allocation3 + $0x51] sm:$0xff]  ;;  %v391_v19 = vld [vmem:[#allocation3 + $0x60] sm:$0xff]  ;;  %v424_v26 = vld [vmem:[#allocation3 + $0x69] sm:$0xff] }
  0x91   : > { %v515_v9 = vmax.f32 %v451_v5, %v1698_v33  ;;  %v516_v10 = vmax.f32 %v452_v6, %v1700_v34  ;;  %v547_v13 = vld [vmem:[#allocation3 + $0x33] sm:$0xff]  ;;  %v454_v16 = vmax.f32 %v390_v8, %v422_v12  ;;  %v423_v21 = vld [vmem:[#allocation3 + $0x61] sm:$0xff]  ;;  %v517_v24 = vmax.f32 %v453_v15, %v1702_v35  ;;  %v549_v30 = vld [vmem:[#allocation3 + $0x4b] sm:$0xff] }
  0x92   : > { %v611_v22 = vld [vmem:[#allocation3 + $0x34] sm:$0xff]  ;;  %v612_v23 = vld [vmem:[#allocation3 + $0x3c] sm:$0xff]  ;;  %v455_v27 = vmax.f32 %v391_v19, %v423_v21  ;;  %v456_v32 = vmax.f32 %v392_v20, %v424_v26  ;;  %v613_v35 = vld [vmem:[#allocation3 + $0x4c] sm:$0xff] }
  0x93   : > { %v579_v17 = vmax.f32 %v515_v9, %v547_v13  ;;  %v580_v18 = vmax.f32 %v516_v10, %v548_v14  ;;  %v518_v25 = vmax.f32 %v454_v16, %v1707_v36  ;;  %v550_v31 = vld [vmem:[#allocation3 + $0x53] sm:$0xff]  ;;  %v581_v34 = vmax.f32 %v517_v24, %v549_v30  ;;  %v394_v3 = vld [vmem:[#allocation3 + $0x80] sm:$0xff]  ;;  %v397_v30 = vld [vmem:[#allocation3 + $0xa8] sm:$0xff] }
  0x94   : > { %v393_v33 = vld [vmem:[#allocation3 + $0x78] sm:$0xff]  ;;  %v519_v2 = vmax.f32 %v455_v27, %v1709_v37  ;;  %v426_v5 = vld [vmem:[#allocation3 + $0x81] sm:$0xff]  ;;  %v520_v7 = vmax.f32 %v456_v32, %v1711_v38  ;;  %v552_v37 = vld [vmem:[#allocation3 + $0x6b] sm:$0xff] }
  0x95   : > { %v1798_v28 = vmax.f32 %v579_v17, %v611_v22  ;;  %v1800_v29 = vmax.f32 %v580_v18, %v612_v23  ;;  %v582_v1 = vmax.f32 %v518_v25, %v550_v31  ;;  %v425_v4 = vld [vmem:[#allocation3 + $0x79] sm:$0xff]  ;;  %v551_v6 = vld [vmem:[#allocation3 + $0x63] sm:$0xff]  ;;  %v458_v9 = vmax.f32 %v394_v3, %v426_v5  ;;  %v395_v13 = vld [vmem:[#allocation3 + $0x90] sm:$0xff] }
  0x96   : > { %v614_v36 = vld [vmem:[#allocation3 + $0x54] sm:$0xff]  ;;  %v457_v8 = vmax.f32 %v393_v33, %v425_v4  ;;  %v1806_v10 = vmax.f32 %v581_v34, %v613_v35  ;;  %v583_v12 = vmax.f32 %v519_v2, %v551_v6  ;;  %v615_v15 = vld [vmem:[#allocation3 + $0x64] sm:$0xff]  ;;  %v584_v16 = vmax.f32 %v520_v7, %v552_v37  ;;  %v616_v21 = vld [vmem:[#allocation3 + $0x6c] sm:$0xff] }
  0x97   : > { %675 = vst [vmem:[#allocation3 + $0x32] sm:$0xff] %v1798_v28  ;;  %676 = vst [vmem:[#allocation3 + $0x3a] sm:$0xff] %v1800_v29  ;;  %v1808_v11 = vmax.f32 %v582_v1, %v614_v36  ;;  %v396_v14 = vld [vmem:[#allocation3 + $0x98] sm:$0xff]  ;;  %v522_v18 = vmax.f32 %v458_v9, %v1718_v40  ;;  %v554_v23 = vld [vmem:[#allocation3 + $0x83] sm:$0xff] }
  0x98   : > { %v521_v17 = vmax.f32 %v457_v8, %v1716_v39  ;;  %v427_v19 = vld [vmem:[#allocation3 + $0x91] sm:$0xff]  ;;  %v428_v20 = vld [vmem:[#allocation3 + $0x99] sm:$0xff]  ;;  %677 = vst [vmem:[#allocation3 + $0x4a] sm:$0xff] %v1806_v10  ;;  %v1814_v38 = vmax.f32 %v583_v12, %v615_v15  ;;  %v776_v26 = vmax.f32 %v1798_v28, %v1806_v10  ;;  %v1818_v27 = vmax.f32 %v584_v16, %v616_v21  ;;  %v429_v32 = vld [vmem:[#allocation3 + $0xa9] sm:$0xff] }
  0x99   : > { %678 = vst [vmem:[#allocation3 + $0x52] sm:$0xff] %v1808_v11  ;;  %v553_v22 = vld [vmem:[#allocation3 + $0x7b] sm:$0xff]  ;;  %v459_v24 = vmax.f32 %v395_v13, %v427_v19  ;;  %v460_v25 = vmax.f32 %v396_v14, %v428_v20  ;;  %v586_v40 = vmax.f32 %v522_v18, %v554_v23  ;;  %v398_v31 = vld [vmem:[#allocation3 + $0xb0] sm:$0xff]  ;;  %v777_v33 = vmax.f32 %v1800_v29, %v1808_v11  ;;  %v618_v1 = vld [vmem:[#allocation3 + $0x84] sm:$0xff] }
  0x9a   : > { %v585_v39 = vmax.f32 %v521_v17, %v553_v22  ;;  %679 = vst [vmem:[#allocation3 + $0x62] sm:$0xff] %v1814_v38  ;;  %v617_v34 = vld [vmem:[#allocation3 + $0x7c] sm:$0xff]  ;;  %v430_v4 = vld [vmem:[#allocation3 + $0xb1] sm:$0xff]  ;;  %v461_v5 = vmax.f32 %v397_v30, %v429_v32  ;;  %v840_v35 = vmax.f32 %v776_v26, %v1814_v38  ;;  %680 = vst [vmem:[#allocation3 + $0x6a] sm:$0xff] %v1818_v27 }
  0x9b   : > { %v523_v2 = vmax.f32 %v459_v24, %v1720_v41  ;;  %v524_v3 = vmax.f32 %v460_v25, %v1725_v42  ;;  %v1829_v6 = vmax.f32 %v586_v40, %v618_v1  ;;  %v555_v7 = vld [vmem:[#allocation3 + $0x93] sm:$0xff]  ;;  %v556_v8 = vld [vmem:[#allocation3 + $0x9b] sm:$0xff]  ;;  %v462_v9 = vmax.f32 %v398_v31, %v430_v4  ;;  %v400_v14 = vld [vmem:[#allocation3 + $0xc8] sm:$0xff] }
  0x9c   : > { %v1827_v36 = vmax.f32 %v585_v39, %v617_v34  ;;  %v399_v12 = vld [vmem:[#allocation3 + $0xc0] sm:$0xff]  ;;  %v841_v37 = vmax.f32 %v777_v33, %v1818_v27  ;;  %v525_v42 = vmax.f32 %v461_v5, %v1727_v43  ;;  %v432_v16 = vld [vmem:[#allocation3 + $0xc9] sm:$0xff]  ;;  %v778_v17 = vmax.f32 %v1806_v10, %v1814_v38  ;;  %v619_v18 = vld [vmem:[#allocation3 + $0x94] sm:$0xff] }
  0x9d   : > { %v587_v13 = vmax.f32 %v523_v2, %v555_v7  ;;  %v588_v41 = vmax.f32 %v524_v3, %v556_v8  ;;  %v431_v15 = vld [vmem:[#allocation3 + $0xc1] sm:$0xff]  ;;  %682 = vst [vmem:[#allocation3 + $0x82] sm:$0xff] %v1829_v6  ;;  %v557_v20 = vld [vmem:[#allocation3 + $0xab] sm:$0xff]  ;;  %v526_v21 = vmax.f32 %v462_v9, %v1729_v44  ;;  %v464_v23 = vmax.f32 %v400_v14, %v432_v16  ;;  %v558_v39 = vld [vmem:[#allocation3 + $0xb3] sm:$0xff] }
  0x9e   : > { %681 = vst [vmem:[#allocation3 + $0x7a] sm:$0xff] %v1827_v36  ;;  %v620_v19 = vld [vmem:[#allocation3 + $0x9c] sm:$0xff]  ;;  %v463_v22 = vmax.f32 %v399_v12, %v431_v15  ;;  %v905_v24 = vmax.f32 %v840_v35, %v1827_v36  ;;  %v589_v26 = vmax.f32 %v525_v42, %v557_v20  ;;  %v906_v31 = vmax.f32 %v841_v37, %v1829_v6  ;;  %v621_v32 = vld [vmem:[#allocation3 + $0xac] sm:$0xff]  ;;  %v622_v5 = vld [vmem:[#allocation3 + $0xb4] sm:$0xff] }
  0x9f   : > { %v1839_v43 = vmax.f32 %v587_v13, %v619_v18  ;;  %v1841_v25 = vmax.f32 %v588_v41, %v620_v19  ;;  %v401_v40 = vld [vmem:[#allocation3 + $0xd8] sm:$0xff]  ;;  %v402_v30 = vld [vmem:[#allocation3 + $0xe0] sm:$0xff]  ;;  %v590_v33 = vmax.f32 %v526_v21, %v558_v39  ;;  %v528_v44 = vmax.f32 %v464_v23, %v1736_v46  ;;  %v560_v7 = vld [vmem:[#allocation3 + $0xcb] sm:$0xff] }
  0xa0   : > { %v527_v34 = vmax.f32 %v463_v22, %v1734_v45  ;;  %v433_v1 = vld [vmem:[#allocation3 + $0xd9] sm:$0xff]  ;;  %v434_v2 = vld [vmem:[#allocation3 + $0xe1] sm:$0xff]  ;;  %v842_v3 = vmax.f32 %v778_v17, %v1827_v36  ;;  %v1849_v4 = vmax.f32 %v589_v26, %v621_v32  ;;  %v403_v13 = vld [vmem:[#allocation3 + $0xf0] sm:$0xff] }
  0xa1   : > { %683 = vst [vmem:[#allocation3 + $0x92] sm:$0xff] %v1839_v43  ;;  %684 = vst [vmem:[#allocation3 + $0x9a] sm:$0xff] %v1841_v25  ;;  %v559_v35 = vld [vmem:[#allocation3 + $0xc3] sm:$0xff]  ;;  %v465_v8 = vmax.f32 %v401_v40, %v433_v1  ;;  %v466_v9 = vmax.f32 %v402_v30, %v434_v2  ;;  %v1852_v45 = vmax.f32 %v905_v24, %v1839_v43  ;;  %v404_v41 = vld [vmem:[#allocation3 + $0xf8] sm:$0xff] }
  0xa2   : > { %v1854_v46 = vmax.f32 %v590_v33, %v622_v5  ;;  %v591_v12 = vmax.f32 %v527_v34, %v559_v35  ;;  %v592_v37 = vmax.f32 %v528_v44, %v560_v7  ;;  %v435_v42 = vld [vmem:[#allocation3 + $0xf1] sm:$0xff]  ;;  %v1857_v14 = vmax.f32 %v906_v31, %v1841_v25  ;;  %685 = vst [vmem:[#allocation3 + $0xaa] sm:$0xff] %v1849_v4  ;;  %v623_v15 = vld [vmem:[#allocation3 + $0xc4] sm:$0xff]  ;;  %v436_v19 = vld [vmem:[#allocation3 + $0xf9] sm:$0xff] }
  0xa3   : > { %v624_v16 = vld [vmem:[#allocation3 + $0xcc] sm:$0xff]  ;;  %v529_v17 = vmax.f32 %v465_v8, %v1738_v47  ;;  %v530_v18 = vmax.f32 %v466_v9, %v1743_v48  ;;  %v467_v20 = vmax.f32 %v403_v13, %v435_v42  ;;  %1002 = vst [vmem:[%s1630_s18 + $0x20] sm:$0xff] %v1852_v45  ;;  %v907_v21 = vmax.f32 %v842_v3, %v1839_v43  ;;  %v561_v24 = vld [vmem:[#allocation3 + $0xdb] sm:$0xff]  ;;  %v562_v26 = vld [vmem:[#allocation3 + $0xe3] sm:$0xff] }
  0xa4   : > { %686 = vst [vmem:[#allocation3 + $0xb2] sm:$0xff] %v1854_v46  ;;  %v1866_v22 = vmax.f32 %v591_v12, %v623_v15  ;;  %v1868_v23 = vmax.f32 %v592_v37, %v624_v16  ;;  %v468_v39 = vmax.f32 %v404_v41, %v436_v19  ;;  %v405_v40 = vld [vmem:[#allocation3 + $0x108] sm:$0xff]  ;;  %1003 = vst [vmem:[%s1630_s18 + $0x28] sm:$0xff] %v1857_v14  ;;  %v406_v32 = vld [vmem:[#allocation3 + $0x110] sm:$0xff] }
  0xa5   : > { %v779_v47 = vmax.f32 %v1808_v11, %v1818_v27  ;;  %v593_v48 = vmax.f32 %v529_v17, %v561_v24  ;;  %v594_v30 = vmax.f32 %v530_v18, %v562_v26  ;;  %v531_v31 = vmax.f32 %v467_v20, %v1745_v49  ;;  %v437_v33 = vld [vmem:[#allocation3 + $0x109] sm:$0xff]  ;;  %v438_v34 = vld [vmem:[#allocation3 + $0x111] sm:$0xff]  ;;  %v625_v1 = vld [vmem:[#allocation3 + $0xdc] sm:$0xff]  ;;  %1038 = vst [vmem:[#allocation2 + $0x20] sm:$0xff] (!%p1187_p2), %v1852_v45 }
  0xa6   : > { %v1876_v44 = vmax.f32 %v907_v21, %v1849_v4  ;;  %687 = vst [vmem:[#allocation3 + $0xc2] sm:$0xff] %v1866_v22  ;;  %688 = vst [vmem:[#allocation3 + $0xca] sm:$0xff] %v1868_v23  ;;  %v626_v2 = vld [vmem:[#allocation3 + $0xe4] sm:$0xff]  ;;  %v563_v3 = vld [vmem:[#allocation3 + $0xf3] sm:$0xff]  ;;  %v532_v5 = vmax.f32 %v468_v39, %v1747_v50  ;;  %v469_v35 = vmax.f32 %v405_v40, %v437_v33 }
  0xa7   : > { %v470_v7 = vmax.f32 %v406_v32, %v438_v34  ;;  %v843_v49 = vmax.f32 %v779_v47, %v1829_v6  ;;  %v1882_v8 = vmax.f32 %v593_v48, %v625_v1  ;;  %v1884_v9 = vmax.f32 %v594_v30, %v626_v2  ;;  %v564_v37 = vld [vmem:[#allocation3 + $0xfb] sm:$0xff]  ;;  %v408_v41 = vld [vmem:[#allocation3 + $0x128] sm:$0xff]  ;;  %v566_v39 = vld [vmem:[#allocation3 + $0x113] sm:$0xff]  ;;  %1039 = vst [vmem:[#allocation2 + $0x28] sm:$0xff] (!%p1187_p2), %v1857_v14 }
  0xa8   : > { %v595_v12 = vmax.f32 %v531_v31, %v563_v3  ;;  %v407_v13 = vld [vmem:[#allocation3 + $0x120] sm:$0xff]  ;;  %1004 = vst [vmem:[%s1630_s18 + $0x30] sm:$0xff] %v1876_v44  ;;  %v780_v42 = vmax.f32 %v1814_v38, %v1827_v36  ;;  %v627_v15 = vld [vmem:[#allocation3 + $0xf4] sm:$0xff]  ;;  %v596_v16 = vmax.f32 %v532_v5, %v564_v37  ;;  %v533_v50 = vmax.f32 %v469_v35, %v1752_v51  ;;  %v440_v19 = vld [vmem:[#allocation3 + $0x129] sm:$0xff] }
  0xa9   : > { %v534_v17 = vmax.f32 %v470_v7, %v1754_v52  ;;  %v439_v18 = vld [vmem:[#allocation3 + $0x121] sm:$0xff]  ;;  %v908_v20 = vmax.f32 %v843_v49, %v1841_v25  ;;  %689 = vst [vmem:[#allocation3 + $0xda] sm:$0xff] %v1882_v8  ;;  %690 = vst [vmem:[#allocation3 + $0xe2] sm:$0xff] %v1884_v9  ;;  %v565_v26 = vld [vmem:[#allocation3 + $0x10b] sm:$0xff]  ;;  %v472_v47 = vmax.f32 %v408_v41, %v440_v19 }
  0xaa   : > { %v1895_v21 = vmax.f32 %v595_v12, %v627_v15  ;;  %v628_v24 = vld [vmem:[#allocation3 + $0xfc] sm:$0xff]  ;;  %v471_v40 = vmax.f32 %v407_v13, %v439_v18  ;;  %v844_v48 = vmax.f32 %v780_v42, %v1839_v43  ;;  %v597_v52 = vmax.f32 %v533_v50, %v565_v26  ;;  %v629_v1 = vld [vmem:[#allocation3 + $0x10c] sm:$0xff]  ;;  %v630_v2 = vld [vmem:[#allocation3 + $0x114] sm:$0xff]  ;;  %1040 = vst [vmem:[#allocation2 + $0x30] sm:$0xff] (!%p1187_p2), %v1876_v44 }
  0xab   : > { %v1898_v51 = vmax.f32 %v596_v16, %v628_v24  ;;  %v598_v30 = vmax.f32 %v534_v17, %v566_v39  ;;  %v409_v31 = vld [vmem:[#allocation3 + $0x138] sm:$0xff]  ;;  %v410_v32 = vld [vmem:[#allocation3 + $0x140] sm:$0xff]  ;;  %v1901_v34 = vmax.f32 %v908_v20, %v1854_v46  ;;  %v536_v5 = vmax.f32 %v472_v47, %v1761_v54  ;;  %v568_v41 = vld [vmem:[#allocation3 + $0x12b] sm:$0xff] }
  0xac   : > { %v441_v33 = vld [vmem:[#allocation3 + $0x139] sm:$0xff]  ;;  %691 = vst [vmem:[#allocation3 + $0xf2] sm:$0xff] %v1895_v21  ;;  %v535_v3 = vmax.f32 %v471_v40, %v1756_v53  ;;  %v442_v35 = vld [vmem:[#allocation3 + $0x141] sm:$0xff]  ;;  %v909_v49 = vmax.f32 %v844_v48, %v1849_v4  ;;  %v1908_v12 = vmax.f32 %v597_v52, %v629_v1  ;;  %v411_v15 = vld [vmem:[#allocation3 + $0x150] sm:$0xff]  ;;  %v781_v53 = vmax.f32 %v1818_v27, %v1829_v6 }
  0xad   : > { %v473_v7 = vmax.f32 %v409_v31, %v441_v33  ;;  %692 = vst [vmem:[#allocation3 + $0xfa] sm:$0xff] %v1898_v51  ;;  %v1910_v37 = vmax.f32 %v598_v30, %v630_v2  ;;  %v567_v13 = vld [vmem:[#allocation3 + $0x123] sm:$0xff]  ;;  %v474_v42 = vmax.f32 %v410_v32, %v442_v35  ;;  %1005 = vst [vmem:[%s1630_s18 + $0x38] sm:$0xff] %v1901_v34  ;;  %v412_v17 = vld [vmem:[#allocation3 + $0x158] sm:$0xff] }
  0xae   : > { %v599_v54 = vmax.f32 %v535_v3, %v567_v13  ;;  %v600_v16 = vmax.f32 %v536_v5, %v568_v41  ;;  %v443_v18 = vld [vmem:[#allocation3 + $0x151] sm:$0xff]  ;;  %v444_v19 = vld [vmem:[#allocation3 + $0x159] sm:$0xff]  ;;  %v1918_v20 = vmax.f32 %v909_v49, %v1866_v22  ;;  %693 = vst [vmem:[#allocation3 + $0x10a] sm:$0xff] %v1908_v12  ;;  %v631_v24 = vld [vmem:[#allocation3 + $0x124] sm:$0xff]  ;;  %v782_v2 = vmax.f32 %v1827_v36, %v1839_v43 }
  0xaf   : > { %v537_v50 = vmax.f32 %v473_v7, %v1763_v55  ;;  %694 = vst [vmem:[#allocation3 + $0x112] sm:$0xff] %v1910_v37  ;;  %v632_v26 = vld [vmem:[#allocation3 + $0x12c] sm:$0xff]  ;;  %v569_v39 = vld [vmem:[#allocation3 + $0x13b] sm:$0xff]  ;;  %v538_v40 = vmax.f32 %v474_v42, %v1765_v56  ;;  %v475_v47 = vmax.f32 %v411_v15, %v443_v18  ;;  %v476_v48 = vmax.f32 %v412_v17, %v444_v19  ;;  %v570_v32 = vld [vmem:[#allocation3 + $0x143] sm:$0xff] }
  0xb0   : > { %v845_v55 = vmax.f32 %v781_v53, %v1841_v25  ;;  %v1924_v52 = vmax.f32 %v599_v54, %v631_v24  ;;  %v1926_v30 = vmax.f32 %v600_v16, %v632_v26  ;;  %v413_v33 = vld [vmem:[#allocation3 + $0x168] sm:$0xff]  ;;  %v414_v1 = vld [vmem:[#allocation3 + $0x170] sm:$0xff]  ;;  %1006 = vst [vmem:[%s1630_s18 + $0x40] sm:$0xff] %v1918_v20  ;;  %v633_v3 = vld [vmem:[#allocation3 + $0x13c] sm:$0xff] }
  0xb1   : > { %v601_v31 = vmax.f32 %v537_v50, %v569_v39  ;;  %v602_v5 = vmax.f32 %v538_v40, %v570_v32  ;;  %v539_v56 = vmax.f32 %v475_v47, %v1770_v57  ;;  %v540_v35 = vmax.f32 %v476_v48, %v1772_v58  ;;  %v445_v7 = vld [vmem:[#allocation3 + $0x169] sm:$0xff]  ;;  %v446_v49 = vld [vmem:[#allocation3 + $0x171] sm:$0xff]  ;;  %v572_v53 = vld [vmem:[#allocation3 + $0x15b] sm:$0xff]  ;;  %1041 = vst [vmem:[#allocation2 + $0x38] sm:$0xff] (!%p1187_p2), %v1901_v34 }
  0xb2   : > { %v910_v13 = vmax.f32 %v845_v55, %v1854_v46  ;;  %695 = vst [vmem:[#allocation3 + $0x122] sm:$0xff] %v1924_v52  ;;  %696 = vst [vmem:[#allocation3 + $0x12a] sm:$0xff] %v1926_v30  ;;  %v634_v42 = vld [vmem:[#allocation3 + $0x144] sm:$0xff]  ;;  %v571_v15 = vld [vmem:[#allocation3 + $0x153] sm:$0xff]  ;;  %v477_v54 = vmax.f32 %v413_v33, %v445_v7  ;;  %v478_v16 = vmax.f32 %v414_v1, %v446_v49 }
  0xb3   : > { %v1937_v41 = vmax.f32 %v601_v31, %v633_v3  ;;  %v846_v50 = vmax.f32 %v782_v2, %v1849_v4  ;;  %v1940_v57 = vmax.f32 %v602_v5, %v634_v42  ;;  %v603_v58 = vmax.f32 %v539_v56, %v571_v15  ;;  %v415_v18 = vld [vmem:[#allocation3 + $0x180] sm:$0xff]  ;;  %v416_v19 = vld [vmem:[#allocation3 + $0x188] sm:$0xff]  ;;  %v635_v39 = vld [vmem:[#allocation3 + $0x154] sm:$0xff]  ;;  %1042 = vst [vmem:[#allocation2 + $0x40] sm:$0xff] (!%p1187_p2), %v1918_v20 }
  0xb4   : > { %v604_v17 = vmax.f32 %v540_v35, %v572_v53  ;;  %v447_v24 = vld [vmem:[#allocation3 + $0x181] sm:$0xff]  ;;  %v1943_v26 = vmax.f32 %v910_v13, %v1868_v23  ;;  %v541_v47 = vmax.f32 %v477_v54, %v1774_v59  ;;  %v542_v48 = vmax.f32 %v478_v16, %v1779_v60  ;;  %v448_v55 = vld [vmem:[#allocation3 + $0x189] sm:$0xff]  ;;  %v574_v3 = vld [vmem:[#allocation3 + $0x173] sm:$0xff] }
  0xb5   : > { %697 = vst [vmem:[#allocation3 + $0x13a] sm:$0xff] %v1937_v41  ;;  %v636_v40 = vld [vmem:[#allocation3 + $0x15c] sm:$0xff]  ;;  %v479_v31 = vmax.f32 %v415_v18, %v447_v24  ;;  %v911_v32 = vmax.f32 %v846_v50, %v1866_v22  ;;  %698 = vst [vmem:[#allocation3 + $0x142] sm:$0xff] %v1940_v57  ;;  %v1950_v33 = vmax.f32 %v603_v58, %v635_v39  ;;  %v573_v2 = vld [vmem:[#allocation3 + $0x16b] sm:$0xff] }
  0xb6   : > { %v1952_v1 = vmax.f32 %v604_v17, %v636_v40  ;;  %v480_v5 = vmax.f32 %v416_v19, %v448_v55  ;;  %v417_v56 = vld [vmem:[#allocation3 + $0x198] sm:$0xff]  ;;  %1007 = vst [vmem:[%s1630_s18 + $0x48] sm:$0xff] %v1943_v26  ;;  %v783_v59 = vmax.f32 %v1829_v6, %v1841_v25  ;;  %v605_v60 = vmax.f32 %v541_v47, %v573_v2  ;;  %v418_v49 = vld [vmem:[#allocation3 + $0x1a0] sm:$0xff]  ;;  %v637_v53 = vld [vmem:[#allocation3 + $0x16c] sm:$0xff] }
  0xb7   : > { %v606_v35 = vmax.f32 %v542_v48, %v574_v3  ;;  %v543_v7 = vmax.f32 %v479_v31, %v1781_v61  ;;  %v449_v13 = vld [vmem:[#allocation3 + $0x199] sm:$0xff]  ;;  %v450_v42 = vld [vmem:[#allocation3 + $0x1a1] sm:$0xff]  ;;  %v1960_v15 = vmax.f32 %v911_v32, %v1882_v8  ;;  %699 = vst [vmem:[#allocation3 + $0x152] sm:$0xff] %v1950_v33  ;;  %v576_v39 = vld [vmem:[#allocation3 + $0x18b] sm:$0xff]  ;;  %v784_v48 = vmax.f32 %v1839_v43, %v1849_v4 }
  0xb8   : > { %700 = vst [vmem:[#allocation3 + $0x15a] sm:$0xff] %v1952_v1  ;;  %v638_v54 = vld [vmem:[#allocation3 + $0x174] sm:$0xff]  ;;  %v575_v16 = vld [vmem:[#allocation3 + $0x183] sm:$0xff]  ;;  %v544_v50 = vmax.f32 %v480_v5, %v1783_v62  ;;  %v481_v58 = vmax.f32 %v417_v56, %v449_v13  ;;  %v482_v17 = vmax.f32 %v418_v49, %v450_v42  ;;  %v847_v61 = vmax.f32 %v783_v59, %v1854_v46  ;;  %v640_v59 = vld [vmem:[#allocation3 + $0x18c] sm:$0xff] }
  0xb9   : > { %v1966_v18 = vmax.f32 %v605_v60, %v637_v53  ;;  %v1968_v19 = vmax.f32 %v606_v35, %v638_v54  ;;  %v607_v24 = vmax.f32 %v543_v7, %v575_v16  ;;  %v707_v40 = vld [vmem:[#allocation3 + $0x2] sm:$0xff]  ;;  %v740_v47 = vld [vmem:[#allocation3 + $0x1a] sm:$0xff]  ;;  %1008 = vst [vmem:[%s1630_s18 + $0x50] sm:$0xff] %v1960_v15  ;;  %v708_v3 = vld [vmem:[#allocation3 + $0xa] sm:$0xff] }
  0xba   : > { %v639_v55 = vld [vmem:[#allocation3 + $0x184] sm:$0xff]  ;;  %v608_v31 = vmax.f32 %v544_v50, %v576_v39  ;;  %v545_v62 = vmax.f32 %v481_v58, %v1788_v63  ;;  %v546_v32 = vmax.f32 %v482_v17, %v1790_v0  ;;  %v772_v2 = vmax.f32 %v707_v40, %v740_v47  ;;  %v577_v60 = vld [vmem:[#allocation3 + $0x19b] sm:$0xff]  ;;  %1043 = vst [vmem:[#allocation2 + $0x48] sm:$0xff] (!%p1187_p2), %v1943_v26 }
  0xbb   : > { %v741_v5 = vld [vmem:[#allocation3 + $0x22] sm:$0xff]  ;;  %701 = vst [vmem:[#allocation3 + $0x16a] sm:$0xff] %v1966_v18  ;;  %702 = vst [vmem:[#allocation3 + $0x172] sm:$0xff] %v1968_v19  ;;  %v1978_v56 = vmax.f32 %v607_v24, %v639_v55  ;;  %v774_v43 = vmax.f32 %v740_v47, %v1798_v28  ;;  %v912_v17 = vmax.f32 %v847_v61, %v1868_v23 }
  0xbc   : > { %v578_v35 = vld [vmem:[#allocation3 + $0x1a3] sm:$0xff]  ;;  %v773_v7 = vmax.f32 %v708_v3, %v741_v5  ;;  %v775_v49 = vmax.f32 %v741_v5, %v1800_v29  ;;  %v1982_v63 = vmax.f32 %v608_v31, %v640_v59  ;;  %v609_v0 = vmax.f32 %v545_v62, %v577_v60  ;;  %1044 = vst [vmem:[#allocation2 + $0x50] sm:$0xff] (!%p1187_p2), %v1960_v15 }
  0xbd   : > { %v610_v13 = vmax.f32 %v546_v32, %v578_v35  ;;  %v836_v42 = vmax.f32 %v772_v2, %v1798_v28  ;;  %703 = vst [vmem:[#allocation3 + $0x182] sm:$0xff] %v1978_v56  ;;  %v641_v53 = vld [vmem:[#allocation3 + $0x19c] sm:$0xff]  ;;  %v642_v54 = vld [vmem:[#allocation3 + $0x1a4] sm:$0xff]  ;;  %v838_v50 = vmax.f32 %v774_v43, %v1806_v10  ;;  %v848_v40 = vmax.f32 %v784_v48, %v1866_v22 }
  0xbe   : > { %v837_v16 = vmax.f32 %v773_v7, %v1800_v29  ;;  %v839_v58 = vmax.f32 %v775_v49, %v1808_v11  ;;  %704 = vst [vmem:[#allocation3 + $0x18a] sm:$0xff] %v1982_v63  ;;  %v1991_v24 = vmax.f32 %v609_v0, %v641_v53  ;;  %v2001_v61 = vmax.f32 %v912_v17, %v1884_v9 }
  0xbf   : > { %v1993_v39 = vmax.f32 %v610_v13, %v642_v54  ;;  %v901_v28 = vmax.f32 %v836_v42, %v1806_v10  ;;  %v903_v47 = vmax.f32 %v838_v50, %v1814_v38  ;;  %v913_v48 = vmax.f32 %v848_v40, %v1882_v8 }
  0xc0   : > { %v902_v29 = vmax.f32 %v837_v16, %v1808_v11  ;;  %v904_v55 = vmax.f32 %v839_v58, %v1818_v27  ;;  %705 = vst [vmem:[#allocation3 + $0x19a] sm:$0xff] %v1991_v24  ;;  %v785_v11 = vmax.f32 %v1841_v25, %v1854_v46  ;;  %v786_v31 = vmax.f32 %v1849_v4, %v1866_v22 }
  0xc1   : > { %706 = vst [vmem:[#allocation3 + $0x1a2] sm:$0xff] %v1993_v39  ;;  %v2006_v10 = vmax.f32 %v901_v28, %v1814_v38  ;;  %v2017_v32 = vmax.f32 %v903_v47, %v1827_v36  ;;  %1009 = vst [vmem:[%s1630_s18 + $0x58] sm:$0xff] %v2001_v61  ;;  %v787_v38 = vmax.f32 %v1854_v46, %v1868_v23 }
  0xc2   : > { %v2014_v62 = vmax.f32 %v902_v29, %v1818_v27  ;;  %v2020_v2 = vmax.f32 %v904_v55, %v1829_v6  ;;  %v2029_v25 = vmax.f32 %v913_v48, %v1895_v21  ;;  %v849_v27 = vmax.f32 %v785_v11, %v1868_v23  ;;  %1045 = vst [vmem:[#allocation2 + $0x58] sm:$0xff] (!%p1187_p2), %v2001_v61 }
  0xc3   : > { %998 = vst [vmem:[%s1630_s18] sm:$0xff] %v2006_v10  ;;  %v850_v4 = vmax.f32 %v786_v31, %v1882_v8  ;;  %v788_v36 = vmax.f32 %v1866_v22, %v1882_v8  ;;  %1000 = vst [vmem:[%s1630_s18 + $0x10] sm:$0xff] %v2017_v32  ;;  %v851_v6 = vmax.f32 %v787_v38, %v1884_v9 }
  0xc4   : > { %999 = vst [vmem:[%s1630_s18 + $0x8] sm:$0xff] %v2014_v62  ;;  %1001 = vst [vmem:[%s1630_s18 + $0x18] sm:$0xff] %v2020_v2  ;;  %v789_v46 = vmax.f32 %v1868_v23, %v1884_v9  ;;  %v790_v3 = vmax.f32 %v1882_v8, %v1895_v21  ;;  %v791_v5 = vmax.f32 %v1884_v9, %v1898_v51 }
  0xc5   : > { %1010 = vst [vmem:[%s1630_s18 + $0x60] sm:$0xff] %v2029_v25  ;;  %v914_v22 = vmax.f32 %v849_v27, %v1884_v9  ;;  %v915_v59 = vmax.f32 %v850_v4, %v1895_v21  ;;  %v852_v60 = vmax.f32 %v788_v36, %v1895_v21  ;;  %v792_v35 = vmax.f32 %v1895_v21, %v1908_v12 }
  0xc6   : > { %v916_v23 = vmax.f32 %v851_v6, %v1898_v51  ;;  %v853_v8 = vmax.f32 %v789_v46, %v1898_v51  ;;  %v854_v7 = vmax.f32 %v790_v3, %v1908_v12  ;;  %v855_v43 = vmax.f32 %v791_v5, %v1910_v37  ;;  %1034 = vst [vmem:[#allocation2] sm:$0xff] (!%p1187_p2), %v2006_v10 }
  0xc7   : > { %v2060_v9 = vmax.f32 %v914_v22, %v1898_v51  ;;  %v2063_v49 = vmax.f32 %v915_v59, %v1908_v12  ;;  %v917_v0 = vmax.f32 %v852_v60, %v1908_v12  ;;  %v856_v13 = vmax.f32 %v792_v35, %v1924_v52  ;;  %1035 = vst [vmem:[#allocation2 + $0x8] sm:$0xff] (!%p1187_p2), %v2014_v62 }
  0xc8   : > { %v2068_v21 = vmax.f32 %v916_v23, %v1910_v37  ;;  %v918_v42 = vmax.f32 %v853_v8, %v1910_v37  ;;  %v919_v53 = vmax.f32 %v854_v7, %v1924_v52  ;;  %v920_v54 = vmax.f32 %v855_v43, %v1926_v30  ;;  %1036 = vst [vmem:[#allocation2 + $0x10] sm:$0xff] (!%p1187_p2), %v2017_v32 }
  0xc9   : > { %1011 = vst [vmem:[%s1630_s18 + $0x68] sm:$0xff] %v2060_v9  ;;  %1012 = vst [vmem:[%s1630_s18 + $0x70] sm:$0xff] %v2063_v49  ;;  %v2078_v16 = vmax.f32 %v917_v0, %v1924_v52  ;;  %v921_v50 = vmax.f32 %v856_v13, %v1937_v41  ;;  %v793_v58 = vmax.f32 %v1898_v51, %v1910_v37 }
  0xca   : > { %v794_v17 = vmax.f32 %v1908_v12, %v1924_v52  ;;  %1013 = vst [vmem:[%s1630_s18 + $0x78] sm:$0xff] %v2068_v21  ;;  %v2088_v28 = vmax.f32 %v918_v42, %v1926_v30  ;;  %v2091_v40 = vmax.f32 %v919_v53, %v1937_v41  ;;  %v2094_v29 = vmax.f32 %v920_v54, %v1940_v57  ;;  %v962_v53 = vld [vmem:[#allocation3 + $0x1b2] sm:$0xff] }
  0xcb   : > { %v795_v47 = vmax.f32 %v1910_v37, %v1926_v30  ;;  %1014 = vst [vmem:[%s1630_s18 + $0x80] sm:$0xff] %v2078_v16  ;;  %v2101_v51 = vmax.f32 %v921_v50, %v1950_v33  ;;  %v857_v12 = vmax.f32 %v793_v58, %v1926_v30  ;;  %v796_v48 = vmax.f32 %v1924_v52, %v1937_v41 }
  0xcc   : > { %v858_v55 = vmax.f32 %v794_v17, %v1937_v41  ;;  %1015 = vst [vmem:[%s1630_s18 + $0x88] sm:$0xff] %v2088_v28  ;;  %1016 = vst [vmem:[%s1630_s18 + $0x90] sm:$0xff] %v2091_v40  ;;  %v797_v11 = vmax.f32 %v1926_v30, %v1940_v57  ;;  %v798_v31 = vmax.f32 %v1937_v41, %v1950_v33 }
  0xcd   : > { %1017 = vst [vmem:[%s1630_s18 + $0x98] sm:$0xff] %v2094_v29  ;;  %v859_v37 = vmax.f32 %v795_v47, %v1940_v57  ;;  %v799_v38 = vmax.f32 %v1940_v57, %v1952_v1  ;;  %1018 = vst [vmem:[%s1630_s18 + $0xa0] sm:$0xff] %v2101_v51  ;;  %v922_v52 = vmax.f32 %v857_v12, %v1940_v57  ;;  %v965_v12 = vld [vmem:[#allocation3 + $0x1d2] sm:$0xff] }
  0xce   : > { %v923_v27 = vmax.f32 %v858_v55, %v1950_v33  ;;  %v860_v4 = vmax.f32 %v796_v48, %v1950_v33  ;;  %v800_v36 = vmax.f32 %v1950_v33, %v1966_v18  ;;  %v861_v41 = vmax.f32 %v797_v11, %v1952_v1  ;;  %1037 = vst [vmem:[#allocation2 + $0x18] sm:$0xff] (!%p1187_p2), %v2020_v2 }
  0xcf   : > { %v924_v30 = vmax.f32 %v859_v37, %v1952_v1  ;;  %v862_v6 = vmax.f32 %v798_v31, %v1966_v18  ;;  %v863_v46 = vmax.f32 %v799_v38, %v1968_v19  ;;  %v2132_v57 = vmax.f32 %v922_v52, %v1952_v1  ;;  %1046 = vst [vmem:[#allocation2 + $0x60] sm:$0xff] (!%p1187_p2), %v2029_v25 }
  0xd0   : > { %v2135_v3 = vmax.f32 %v923_v27, %v1966_v18  ;;  %v925_v5 = vmax.f32 %v860_v4, %v1966_v18  ;;  %v864_v22 = vmax.f32 %v800_v36, %v1978_v56  ;;  %v926_v59 = vmax.f32 %v861_v41, %v1968_v19  ;;  %1047 = vst [vmem:[#allocation2 + $0x68] sm:$0xff] (!%p1187_p2), %v2060_v9 }
  0xd1   : > { %v989_v33 = vmax.f32 %v924_v30, %v1968_v19  ;;  %v927_v60 = vmax.f32 %v862_v6, %v1978_v56  ;;  %v928_v35 = vmax.f32 %v863_v46, %v1982_v63  ;;  %1019 = vst [vmem:[%s1630_s18 + $0xa8] sm:$0xff] %v2132_v57  ;;  %v801_v7 = vmax.f32 %v1952_v1, %v1968_v19  ;;  %v963_v1 = vld [vmem:[#allocation3 + $0x1ba] sm:$0xff] }
  0xd2   : > { %1020 = vst [vmem:[%s1630_s18 + $0xb0] sm:$0xff] %v2135_v3  ;;  %v990_v23 = vmax.f32 %v925_v5, %v1978_v56  ;;  %v929_v8 = vmax.f32 %v864_v22, %v1991_v24  ;;  %v802_v43 = vmax.f32 %v1966_v18, %v1978_v56  ;;  %v991_v0 = vmax.f32 %v926_v59, %v1982_v63  ;;  %v964_v56 = vld [vmem:[#allocation3 + $0x1ca] sm:$0xff] }
  0xd3   : > { %1021 = vst [vmem:[%s1630_s18 + $0xb8] sm:$0xff] %v989_v33  ;;  %v992_v13 = vmax.f32 %v927_v60, %v1991_v24  ;;  %v993_v42 = vmax.f32 %v928_v35, %v1993_v39  ;;  %v803_v54 = vmax.f32 %v1968_v19, %v1982_v63  ;;  %v865_v58 = vmax.f32 %v801_v7, %v1982_v63 }
  0xd4   : > { %1022 = vst [vmem:[%s1630_s18 + $0xc0] sm:$0xff] %v990_v23  ;;  %v994_v50 = vmax.f32 %v929_v8, %v962_v53  ;;  %v866_v18 = vmax.f32 %v802_v43, %v1991_v24  ;;  %1023 = vst [vmem:[%s1630_s18 + $0xc8] sm:$0xff] %v991_v0 }
  0xd5   : > { %1024 = vst [vmem:[%s1630_s18 + $0xd0] sm:$0xff] %v992_v13  ;;  %1025 = vst [vmem:[%s1630_s18 + $0xd8] sm:$0xff] %v993_v42  ;;  %v867_v17 = vmax.f32 %v803_v54, %v1993_v39  ;;  %v930_v47 = vmax.f32 %v865_v58, %v1993_v39  ;;  %1033 = sbr.rel (%p1187_p2) target bundleno = 225 (0xe1), region = 40 }
  0xd6   : > { %1026 = vst [vmem:[%s1630_s18 + $0xe0] sm:$0xff] %v994_v50  ;;  %v931_v19 = vmax.f32 %v866_v18, %v962_v53  ;;  %1048 = vst [vmem:[#allocation2 + $0x70] sm:$0xff] (!%p1187_p2), %v2063_v49 }
  0xd7   : > { %v932_v55 = vmax.f32 %v867_v17, %v963_v1  ;;  %v995_v48 = vmax.f32 %v930_v47, %v963_v1  ;;  %1049 = vst [vmem:[#allocation2 + $0x78] sm:$0xff] (!%p1187_p2), %v2068_v21  ;;  %1050 = vst [vmem:[#allocation2 + $0x80] sm:$0xff] (!%p1187_p2), %v2078_v16 }
  0xd8   : > { %v996_v63 = vmax.f32 %v931_v19, %v964_v56  ;;  %1051 = vst [vmem:[#allocation2 + $0x88] sm:$0xff] (!%p1187_p2), %v2088_v28  ;;  %1052 = vst [vmem:[#allocation2 + $0x90] sm:$0xff] (!%p1187_p2), %v2091_v40 }
  0xd9   : > { %v997_v37 = vmax.f32 %v932_v55, %v965_v12  ;;  %1027 = vst [vmem:[%s1630_s18 + $0xe8] sm:$0xff] %v995_v48  ;;  %1053 = vst [vmem:[#allocation2 + $0x98] sm:$0xff] (!%p1187_p2), %v2094_v29 }
  0xda   : > { %1028 = vst [vmem:[%s1630_s18 + $0xf0] sm:$0xff] %v996_v63  ;;  %1054 = vst [vmem:[#allocation2 + $0xa0] sm:$0xff] (!%p1187_p2), %v2101_v51 }
  0xdb   : > { %1029 = vst [vmem:[%s1630_s18 + $0xf8] sm:$0xff] %v997_v37  ;;  %1055 = vst [vmem:[#allocation2 + $0xa8] sm:$0xff] (!%p1187_p2), %v2132_v57 }
  0xdc   : > { %1056 = vst [vmem:[#allocation2 + $0xb0] sm:$0xff] %v2135_v3  ;;  %1057 = vst [vmem:[#allocation2 + $0xb8] sm:$0xff] %v989_v33 }
  0xdd   : > { %1058 = vst [vmem:[#allocation2 + $0xc0] sm:$0xff] %v990_v23  ;;  %1059 = vst [vmem:[#allocation2 + $0xc8] sm:$0xff] %v991_v0 }
  0xde   : > { %1060 = vst [vmem:[#allocation2 + $0xd0] sm:$0xff] %v992_v13  ;;  %1061 = vst [vmem:[#allocation2 + $0xd8] sm:$0xff] %v993_v42 }
  0xdf   : > { %1062 = vst [vmem:[#allocation2 + $0xe0] sm:$0xff] %v994_v50  ;;  %1063 = vst [vmem:[#allocation2 + $0xe8] sm:$0xff] %v995_v48 }
  0xe0   : > { %1064 = vst [vmem:[#allocation2 + $0xf0] sm:$0xff] %v996_v63  ;;  %1065 = vst [vmem:[#allocation2 + $0xf8] sm:$0xff] %v997_v37 }
  0xe1 PF: > { %s1074_s25 = ssub.s32 3, %s1438_s12  ;;  %s1189_s28 = sshll.u32 %s1442_s13, 7 }
  0xe2   : > { %s1083_s9 = sshll.u32 %s1630_s18, 4  ;;  %s1080_s23 = sadd.s32 %s1189_s28, %s1074_s25  ;;  %s2198_s9 = int_to_ptr.vmem [resolvable:$true] %s1083_s9 }
  0xe3   : > { %s1190_s29 = sshll.u32 %s1080_s23, 7  ;;  %s2207_s5 = scalar_lea.sflag [#allocation6], %s160_s27 }
  0xe4   : > { %s2203_s24 = scalar_lea.hbm %s2269_s1, %s1190_s29  ;;  %s1332_s17 = scalar_lea.vmem %s2198_s9, 4096 }
  0xe5   : > { %p1333_p4 = scmp.ne.s32.totalorder %s2198_s9, %s1332_s17  ;;  %p2277_p13 = scmp.ne.s32.totalorder %s2273_s3, 0 }
  0xe6   : > { %s1460_s12 = smov [#allocation7]  }
  0xe7   : > { %p1334_p1 = pnand %p1333_p4, %p2277_p13  ;;  %s1336_s13 = sshll.u32 %s1460_s12, 4  ;;  %s1337_s13 = int_to_ptr.vmem [resolvable:$false] %s1336_s13 }
  0xe8   : > { %s1338_s26 = scalar_lea.vmem %s1337_s13, 8192  ;;  %p1339_p9 = scmp.lt.s32.totalorder %s2198_s9, %s1337_s13 }
  0xe9   : > { %p1335_p6 = pneg %p1334_p1  ;;  %p1340_p3 = scmp.lt.s32.totalorder %s1338_s26, %s1332_s17 }
  0xeb   : > { %p1341_p11 = por %p1340_p3, %p1339_p9 }
  0xed   : > { %p1342_p12 = pnand %p1341_p11, %p1335_p6 }
  0xef   : > { %1345 = shalt.err (!%p1342_p12)
}
  0xf0   : > { %s1346_s27 = scalar_lea.hbm %s2203_s24, 4096  ;;  %s1350_s28 = scalar_lea.hbm %s2269_s1, 32768 }
  0xf1   : > { %p1347_p5 = scmp.ne.s32.totalorder %s2203_s24, %s1346_s27  ;;  %p1351_p0 = scmp.lt.u32.totalorder %s2203_s24, %s2269_s1 }
  0xf2   : > { %p1352_p7 = scmp.lt.u32.totalorder %s1350_s28, %s1346_s27  ;;  %p1354_p4 = scmp.lt.u32.totalorder %s1346_s27, %s2203_s24 }
  0xf3   : > { %p1348_p8 = pnand %p1347_p5, %p2277_p13 }
  0xf4   : > { %p1353_p2 = por %p1352_p7, %p1351_p0 }
  0xf5   : > { %p1349_p10 = pneg %p1348_p8 }
  0xf6   : > { %p1355_p1 = por %p1354_p4, %p1353_p2 }
  0xf8   : > { %p1356_p6 = pnand %p1355_p1, %p1349_p10 }
  0xfa   : > { %1359 = shalt.err (!%p1356_p6)
}
  0xfb   : > { %s1461_s22 = smov 128   ;;  %s1462_s21 = smov 512  }
  0xfc   : > { %s1463_s17 = smov 8  }
  0xfd   : > { %1196 = dma.vmem_to_hbm [thread:$0]  (%p2277_p13), %s2198_s9, 4096, %s2203_s24, %s2207_s5, %s1461_s22, %s1462_s21, %s1463_s17  }
  0xfe PF: > { %p1207_p9 = scmp.ge.s32.totalorder %s1454_s16, 2  ;;  %s1098_s12 = sand.u32 1, %s1414_s6  }
  0xff   : > { %p2278_p3 = scmp.ne.s32.totalorder %s2274_s4, 0  ;;  %s1099_s13 = scalar_lea.sflag [#allocation6], %s1098_s12 }
 0x101   : > { %p1203_p11 = pnand %p1207_p9, %p2278_p3 }
 0x103   : > { %1409 = dma.done.wait (!%p1203_p11), %s1099_s13, 4096  }
 0x104   : > { %1411 = vsyncadd (!%p1203_p11), %s1099_s13, 4294963200  ;;  %s17_s16 = sadd.s32 1, %s1454_s16   ;;  %s2279_s6 = smov %s1418_s7 }
 0x105   : > { %p14_p12 = scmp.ge.s32.totalorder %s17_s16, 10   ;;  %s2280_s7 = smov %s1422_s8 }
 0x106   : > { %s2281_s8 = smov %s1560_s2  ;;  %s2282_s9 = smov %s1430_s10 }
 0x107   : > { %s2283_s10 = smov %s1434_s11  ;;  %s2284_s11 = smov %s1557_s30 }
 0x108   : > { %s2285_s12 = smov %s1446_s14  ;;  %s2286_s13 = smov %s1450_s15 }
 0x109   : > { %s2287_s14 = smov %s2290_s19  ;;  %s2288_s15 = smov %s2294_s20 }
 0x10a   :  { %16 = sbr.rel (!%p14_p12) target bundleno = 9 (0x9), region = 86 }
 0x111   :  { %1104 = vsyncpa [#allocation5], 1 }
 0x112   :  { %1106 = vsyncpa [#allocation5 + $0x1], 1 }
 0x113   :  { %1107 = vsyncpa [#allocation6], 1 }
 0x114   :  { %1109 = vsyncpa [#allocation6 + $0x1], 1 }

</bundles_post_ra>
